<compile_context>
chip_gen: v5e
topology: v5e:2x2
jax: 0.10.0
libtpu: 0.0.40
codegen_flags: <defaults>
</compile_context>

<pallas_src>
import math
import functools

import jax
import jax.numpy as jnp
import numpy as np
from jax.experimental import pallas as pl
from jax.experimental.pallas import tpu as pltpu


# Row indices inside the packed per-layer (16, D) f32 parameter slab.
_SA_BQ, _SA_BK, _SA_BV, _SA_BO = 0, 1, 2, 3
_CA_BQ, _CA_BK, _CA_BV, _CA_BO = 4, 5, 6, 7
_LN1_G, _LN1_B = 8, 9
_LN2_G, _LN2_B = 10, 11
_LN3_G, _LN3_B = 12, 13
_FFN_B2 = 14
_N_PACK_ROWS = 16          # padded to a full sublane tile


# ---------------------------------------------------------------------------
# In-kernel helpers
# ---------------------------------------------------------------------------
def _mm(x, w):
    """bf16-input matmul with f32 accumulation (weights already bf16)."""
    return jnp.dot(x.astype(jnp.bfloat16), w, preferred_element_type=jnp.float32)


def _layernorm(x, g, b, eps):
    mu = jnp.mean(x, axis=-1, keepdims=True)
    xc = x - mu
    var = jnp.mean(xc * xc, axis=-1, keepdims=True)
    return xc * jax.lax.rsqrt(var + eps) * g + b


def _split_heads(t2, bblk, seq, nhead, hd):
    """(bblk*seq, nhead*hd) f32 -> (bblk*nhead, seq, hd) bf16 (head-major)."""
    parts = []
    for i in range(bblk):                                    # bblk is small & static
        ti = t2[i * seq:(i + 1) * seq, :].reshape(seq, nhead, hd)
        parts.append(jnp.transpose(ti, (1, 0, 2)))           # (nhead, seq, hd)
    out = parts[0] if bblk == 1 else jnp.concatenate(parts, axis=0)
    return out.astype(jnp.bfloat16)


def _merge_heads(o3, bblk, seq, nhead, hd):
    """(bblk*nhead, seq, hd) f32 -> (bblk*seq, nhead*hd)."""
    parts = []
    for i in range(bblk):
        oi = o3[i * nhead:(i + 1) * nhead]                   # (nhead, seq, hd)
        parts.append(jnp.transpose(oi, (1, 0, 2)).reshape(seq, nhead * hd))
    return parts[0] if bblk == 1 else jnp.concatenate(parts, axis=0)


def _attention(qp, kp, vp, bblk, lq, lk, nhead, hd):
    """SDPA; the 1/sqrt(hd) scale is pre-folded into the Q projection."""
    q3 = _split_heads(qp, bblk, lq, nhead, hd)
    k3 = _split_heads(kp, bblk, lk, nhead, hd)
    v3 = _split_heads(vp, bblk, lk, nhead, hd)
    # One batched einsum over (bblk*nhead); f32 softmax with exact division.
    s = jnp.einsum("bqd,bkd->bqk", q3, k3, preferred_element_type=jnp.float32)
    s = s - jnp.max(s, axis=-1, keepdims=True)
    p = jnp.exp(s)
    p = p / jnp.sum(p, axis=-1, keepdims=True)
    o = jnp.einsum("bqk,bkd->bqd", p.astype(jnp.bfloat16), v3,
                   preferred_element_type=jnp.float32)
    return _merge_heads(o, bblk, lq, nhead, hd)


# ---------------------------------------------------------------------------
# Fused decoder kernel: grid = (batch_blocks, num_layers)
# ---------------------------------------------------------------------------
def _decoder_kernel(*refs, num_layers, nhead, head_dim, b_block, eps,
                    apply_final_norm, has_qpos, has_pos):
    idx = 0
    tgt_ref = refs[idx]; idx += 1
    mem_ref = refs[idx]; idx += 1
    if has_qpos:
        qpos_ref = refs[idx]; idx += 1
    if has_pos:
        memk_ref = refs[idx]; idx += 1
    (sa_wq, sa_wk, sa_wv, sa_wo,
     ca_wq, ca_wk, ca_wv, ca_wo,
     ffn_w1, ffn_w2, par_ref, fb1_ref, fn_ref) = refs[idx:idx + 13]
    out_ref = refs[idx + 13]

    D = nhead * head_dim
    T = tgt_ref.shape[1]
    S = mem_ref.shape[1]
    Mq = b_block * T
    Mk = b_block * S
    layer = pl.program_id(1)

    # Residual stream lives in the resident output block across the (inner,
    # "arbitrary") layer axis; initialise it from tgt on the first layer.
    @pl.when(layer == 0)
    def _init():
        out_ref[...] = tgt_ref[...]

    def prow(i):                                      # packed per-layer vector
        return par_ref[i:i + 1, :]                    # (1, D) f32

    x = out_ref[...].reshape(Mq, D)                   # f32 residual stream
    mem = mem_ref[...].reshape(Mk, D)
    mem_k = memk_ref[...].reshape(Mk, D) if has_pos else mem
    qpos = qpos_ref[...].reshape(Mq, D) if has_qpos else None

    # ---- self-attention: q = k = x + query_pos, v = x -----------------------
    q_in = x + qpos if has_qpos else x
    qp = _mm(q_in, sa_wq[...]) + prow(_SA_BQ)         # scale folded into wq/bq
    kp = _mm(q_in, sa_wk[...]) + prow(_SA_BK)
    vp = _mm(x, sa_wv[...]) + prow(_SA_BV)
    attn = _attention(qp, kp, vp, b_block, T, T, nhead, head_dim)
    x = _layernorm(x + _mm(attn, sa_wo[...]) + prow(_SA_BO),
                   prow(_LN1_G), prow(_LN1_B), eps)

    # ---- cross-attention: q = x + query_pos, k = memory + pos, v = memory ---
    q_in = x + qpos if has_qpos else x
    qp = _mm(q_in, ca_wq[...]) + prow(_CA_BQ)
    kp = _mm(mem_k, ca_wk[...]) + prow(_CA_BK)
    vp = _mm(mem, ca_wv[...]) + prow(_CA_BV)
    attn = _attention(qp, kp, vp, b_block, T, S, nhead, head_dim)
    x = _layernorm(x + _mm(attn, ca_wo[...]) + prow(_CA_BO),
                   prow(_LN2_G), prow(_LN2_B), eps)

    # ---- feed-forward --------------------------------------------------------
    h = jnp.maximum(_mm(x, ffn_w1[...]) + fb1_ref[...], 0.0)
    x = _layernorm(x + _mm(h, ffn_w2[...]) + prow(_FFN_B2),
                   prow(_LN3_G), prow(_LN3_B), eps)

    out_ref[...] = x.reshape(b_block, T, D)

    if apply_final_norm:
        @pl.when(layer == num_layers - 1)
        def _final():
            y = _layernorm(out_ref[...].reshape(Mq, D),
                           fn_ref[0:1, :], fn_ref[1:2, :], eps)
            out_ref[...] = y.reshape(b_block, T, D)


# ---------------------------------------------------------------------------
# Weight preparation (do once and cache across forward calls)
# ---------------------------------------------------------------------------
def prepare_decoder_weights(layer_params, nhead, final_norm=None,
                            weight_dtype=jnp.bfloat16):
    D = layer_params[0]["self_attn"][0].shape[0]
    hd = D // nhead
    scale = 1.0 / math.sqrt(hd)
    f32 = jnp.float32

    def stack_w(get):   # torch (out,in) -> (in,out), stacked over layers
        return jnp.stack([get(p) for p in layer_params]).astype(weight_dtype)

    sa_wq = stack_w(lambda p: p["self_attn"][0].T * scale)
    sa_wk = stack_w(lambda p: p["self_attn"][1].T)
    sa_wv = stack_w(lambda p: p["self_attn"][2].T)
    sa_wo = stack_w(lambda p: p["self_attn"][6].T)
    ca_wq = stack_w(lambda p: p["cross_attn"][0].T * scale)
    ca_wk = stack_w(lambda p: p["cross_attn"][1].T)
    ca_wv = stack_w(lambda p: p["cross_attn"][2].T)
    ca_wo = stack_w(lambda p: p["cross_attn"][6].T)
    ffn_w1 = stack_w(lambda p: p["ffn"][0].T)          # (NL, D, F)
    ffn_w2 = stack_w(lambda p: p["ffn"][2].T)          # (NL, F, D)

    def pack(p):
        zero = jnp.zeros((D,), f32)
        rows = [None] * _N_PACK_ROWS
        rows[_SA_BQ] = p["self_attn"][3] * scale
        rows[_SA_BK] = p["self_attn"][4]
        rows[_SA_BV] = p["self_attn"][5]
        rows[_SA_BO] = p["self_attn"][7]
        rows[_CA_BQ] = p["cross_attn"][3] * scale
        rows[_CA_BK] = p["cross_attn"][4]
        rows[_CA_BV] = p["cross_attn"][5]
        rows[_CA_BO] = p["cross_attn"][7]
        rows[_LN1_G], rows[_LN1_B] = p["norm1"]
        rows[_LN2_G], rows[_LN2_B] = p["norm2"]
        rows[_LN3_G], rows[_LN3_B] = p["norm3"]
        rows[_FFN_B2] = p["ffn"][3]
        rows = [zero if r is None else r.astype(f32) for r in rows]
        return jnp.stack(rows)                          # (16, D)

    par_pack = jnp.stack([pack(p) for p in layer_params])                # (NL,16,D)
    ffn_b1 = jnp.stack([p["ffn"][1].reshape(1, -1)
                        for p in layer_params]).astype(f32)              # (NL,1,F)

    if final_norm is not None:
        fn = jnp.stack([final_norm[0], final_norm[1]]).astype(f32)        # (2, D)
    else:
        fn = jnp.stack([jnp.ones((D,), f32), jnp.zeros((D,), f32)])

    return dict(sa_wq=sa_wq, sa_wk=sa_wk, sa_wv=sa_wv, sa_wo=sa_wo,
                ca_wq=ca_wq, ca_wk=ca_wk, ca_wv=ca_wv, ca_wo=ca_wo,
                ffn_w1=ffn_w1, ffn_w2=ffn_w2, par_pack=par_pack,
                ffn_b1=ffn_b1, fn=fn,
                apply_final_norm=final_norm is not None)


# ---------------------------------------------------------------------------
# Wrapper
# ---------------------------------------------------------------------------
def transformer_decoder(tgt, memory, layer_params, nhead, pos=None,
                        query_pos=None, final_norm=None, eps=1e-5,
                        b_block=None, prepared=None):
    """tgt (T,B,D), memory (S,B,D); returns (1,T,B,D) like output.unsqueeze(0)."""
    T, B, D = tgt.shape
    S = memory.shape[0]
    NL = len(layer_params)
    hd = D // nhead
    f32 = jnp.float32

    if prepared is None:
        # Callers should cache this — it is a pure function of the weights.
        prepared = prepare_decoder_weights(layer_params, nhead, final_norm)

    # Batch elements per grid step: aim for an MXU-friendly M = b_block*T while
    # keeping b_block a divisor of B (bounded to keep the attention unroll small).
    if b_block is None:
        target = max(1, min(16, 128 // max(T, 1)))
        b_block = 1
        for cand in range(1, B + 1):
            if B % cand == 0 and cand <= target:
                b_block = cand
    assert B % b_block == 0

    has_qpos = query_pos is not None
    has_pos = pos is not None

    # Batch-first once for the whole decoder.
    tgt_b = jnp.transpose(tgt, (1, 0, 2)).astype(f32)
    mem_b = jnp.transpose(memory, (1, 0, 2)).astype(f32)
    acts = [tgt_b, mem_b]
    if has_qpos:
        acts.append(jnp.transpose(query_pos, (1, 0, 2)).astype(f32))
    if has_pos:
        # memory + pos (cross-attn keys) precomputed once for all layers.
        acts.append(mem_b + jnp.transpose(pos, (1, 0, 2)).astype(f32))

    weights = [prepared[k] for k in ("sa_wq", "sa_wk", "sa_wv", "sa_wo",
                                     "ca_wq", "ca_wk", "ca_wv", "ca_wo",
                                     "ffn_w1", "ffn_w2", "par_pack",
                                     "ffn_b1", "fn")]

    def act_spec(L_):
        return pl.BlockSpec((b_block, L_, D), lambda b, l: (b, 0, 0))

    def layer_spec(arr):        # per-layer weight slab, pipelined over the l axis
        return pl.BlockSpec((None,) + arr.shape[1:], lambda b, l: (l, 0, 0))

    in_specs = ([act_spec(T), act_spec(S)]
                + ([act_spec(T)] if has_qpos else [])
                + ([act_spec(S)] if has_pos else [])
                + [layer_spec(w) for w in weights[:-1]]
                + [pl.BlockSpec(weights[-1].shape, lambda b, l: (0, 0))])

    kernel = functools.partial(
        _decoder_kernel, num_layers=NL, nhead=nhead, head_dim=hd,
        b_block=b_block, eps=eps,
        apply_final_norm=prepared["apply_final_norm"],
        has_qpos=has_qpos, has_pos=has_pos)

    out = pl.pallas_call(
        kernel,
        out_shape=jax.ShapeDtypeStruct((B, T, D), f32),
        grid=(B // b_block, NL),
        in_specs=in_specs,
        out_specs=act_spec(T),
        compiler_params=pltpu.CompilerParams(
            dimension_semantics=("parallel", "arbitrary")),
    )(*acts, *weights)

    # back to (T, B, D) and mimic output.unsqueeze(0)
    return jnp.transpose(out, (1, 0, 2))[None]


# ---------------------------------------------------------------------------
# Pure-JAX f32 reference (original module semantics)
# ---------------------------------------------------------------------------
def _ref_attn(q, k, v, p, nhead):
    wq, wk, wv, bq, bk, bv, wo, bo = p
    Lq, B, D = q.shape
    hd = D // nhead
    scale = 1.0 / math.sqrt(hd)

    def proj(x, w, b):   # (L,B,D) -> (B,H,L,hd)
        y = x @ w.T + b
        return y.transpose(1, 0, 2).reshape(B, -1, nhead, hd).transpose(0, 2, 1, 3)

    qh = proj(q, wq, bq) * scale
    kh = proj(k, wk, bk)
    vh = proj(v, wv, bv)
    s = qh @ kh.transpose(0, 1, 3, 2)
    a = jax.nn.softmax(s, axis=-1)
    o = (a @ vh).transpose(2, 0, 1, 3).reshape(Lq, B, D)
    return o @ wo.T + bo


def _ref_ln(x, g, b, eps=1e-5):
    mu = jnp.mean(x, axis=-1, keepdims=True)
    var = jnp.mean((x - mu) ** 2, axis=-1, keepdims=True)
    return (x - mu) / jnp.sqrt(var + eps) * g + b


def _ref_layer(x, memory, p, nhead, pos, qpos):
    q = k = x + qpos
    t2 = _ref_attn(q, k, x, p["self_attn"], nhead)
    x = _ref_ln(x + t2, *p["norm1"])
    t2 = _ref_attn(x + qpos, memory + pos, memory, p["cross_attn"], nhead)
    x = _ref_ln(x + t2, *p["norm2"])
    w1, b1, w2, b2 = p["ffn"]
    t2 = jnp.maximum(x @ w1.T + b1, 0.0) @ w2.T + b2
    x = _ref_ln(x + t2, *p["norm3"])
    return x


def _ref_decoder(tgt, memory, layer_params, nhead, pos, qpos, final_norm):
    x = tgt
    for p in layer_params:
        x = _ref_layer(x, memory, p, nhead, pos, qpos)
    if final_norm is not None:
        x = _ref_ln(x, *final_norm)
    return x[None]


# ---------------------------------------------------------------------------
# Parameter construction (PyTorch-convention shapes: W is (out,in), b is (out,))
# ---------------------------------------------------------------------------
def make_params(key, d_model, dim_feedforward, num_layers):
    s = 0.05
    keys = jax.random.split(key, num_layers)

    def attn_params(k0):
        kk = jax.random.split(k0, 8)
        return (
            s * jax.random.normal(kk[0], (d_model, d_model), jnp.float32),  # wq
            s * jax.random.normal(kk[1], (d_model, d_model), jnp.float32),  # wk
            s * jax.random.normal(kk[2], (d_model, d_model), jnp.float32),  # wv
            s * jax.random.normal(kk[3], (d_model,), jnp.float32),          # bq
            s * jax.random.normal(kk[4], (d_model,), jnp.float32),          # bk
            s * jax.random.normal(kk[5], (d_model,), jnp.float32),          # bv
            s * jax.random.normal(kk[6], (d_model, d_model), jnp.float32),  # wo
            s * jax.random.normal(kk[7], (d_model,), jnp.float32),          # bo
        )

    def layer(k0):
        kk = jax.random.split(k0, 6)
        ones = jnp.ones((d_model,), jnp.float32)
        zeros = jnp.zeros((d_model,), jnp.float32)
        return {
            "self_attn": attn_params(kk[0]),
            "cross_attn": attn_params(kk[1]),
            "ffn": (
                s * jax.random.normal(kk[2], (dim_feedforward, d_model), jnp.float32),
                s * jax.random.normal(kk[3], (dim_feedforward,), jnp.float32),
                s * jax.random.normal(kk[4], (d_model, dim_feedforward), jnp.float32),
                s * jax.random.normal(kk[5], (d_model,), jnp.float32),
            ),
            "norm1": (ones, zeros),
            "norm2": (ones, zeros),
            "norm3": (ones, zeros),
        }

    layers = [layer(keys[i]) for i in range(num_layers)]
    final_norm = (jnp.ones((d_model,), jnp.float32), jnp.zeros((d_model,), jnp.float32))
    return layers, final_norm


if __name__ == "__main__":
    d_model = 32
    nhead = 4
    dim_feedforward = 64
    num_layers = 2
    T, S, B = 8, 16, 2   # tgt seq, memory seq, batch

    key = jax.random.PRNGKey(0)
    k_in, k_p = jax.random.split(key)
    kt, km, kq, kpos = jax.random.split(k_in, 4)

    tgt = jax.random.normal(kt, (T, B, d_model), jnp.float32)
    memory = jax.random.normal(km, (S, B, d_model), jnp.float32)
    query_pos = jax.random.normal(kq, (T, B, d_model), jnp.float32)
    pos = jax.random.normal(kpos, (S, B, d_model), jnp.float32)

    layer_params, final_norm = make_params(k_p, d_model, dim_feedforward, num_layers)

    prepared = prepare_decoder_weights(layer_params, nhead, final_norm)  # cacheable
    out = transformer_decoder(tgt, memory, layer_params, nhead,
                              pos=pos, query_pos=query_pos,
                              final_norm=final_norm, prepared=prepared)
    out = jax.block_until_ready(out)

    ref = _ref_decoder(tgt, memory, layer_params, nhead, pos, query_pos, final_norm)

    # Tolerance loosened because the kernel uses bf16 MXU inputs.
    np.testing.assert_allclose(np.asarray(out), np.asarray(ref), rtol=4e-2, atol=4e-2)

    print("KERNEL_OK")
</pallas_src>

<mosaic_0001>
module attributes {stable_mosaic.version = 11 : i64} {
  func.func @_decoder_kernel(%arg0: i32, %arg1: i32, %arg2: memref<2x8x32xf32, #tpu.memory_space<vmem>>, %arg3: memref<2x16x32xf32, #tpu.memory_space<vmem>>, %arg4: memref<2x8x32xf32, #tpu.memory_space<vmem>>, %arg5: memref<2x16x32xf32, #tpu.memory_space<vmem>>, %arg6: memref<1x32x32xbf16, #tpu.memory_space<vmem>>, %arg7: memref<1x32x32xbf16, #tpu.memory_space<vmem>>, %arg8: memref<1x32x32xbf16, #tpu.memory_space<vmem>>, %arg9: memref<1x32x32xbf16, #tpu.memory_space<vmem>>, %arg10: memref<1x32x32xbf16, #tpu.memory_space<vmem>>, %arg11: memref<1x32x32xbf16, #tpu.memory_space<vmem>>, %arg12: memref<1x32x32xbf16, #tpu.memory_space<vmem>>, %arg13: memref<1x32x32xbf16, #tpu.memory_space<vmem>>, %arg14: memref<1x32x64xbf16, #tpu.memory_space<vmem>>, %arg15: memref<1x64x32xbf16, #tpu.memory_space<vmem>>, %arg16: memref<1x16x32xf32, #tpu.memory_space<vmem>>, %arg17: memref<1x1x64xf32, #tpu.memory_space<vmem>>, %arg18: memref<2x32xf32, #tpu.memory_space<vmem>>, %arg19: memref<2x8x32xf32, #tpu.memory_space<vmem>>) attributes {dimension_semantics = [#tpu.dimension_semantics<parallel>, #tpu.dimension_semantics<arbitrary>], iteration_bounds = array<i64: 1, 2>, scalar_prefetch = 0 : i64, scratch_operands = 0 : i64, tpu.core_type = #tpu.core_type<tc>, window_params = [{transform_indices = @transform_0, window_bounds = array<i64: 2, 8, 32>}, {transform_indices = @transform_1, window_bounds = array<i64: 2, 16, 32>}, {transform_indices = @transform_2, window_bounds = array<i64: 2, 8, 32>}, {transform_indices = @transform_3, window_bounds = array<i64: 2, 16, 32>}, {transform_indices = @transform_4, window_bounds = array<i64: 1, 32, 32>}, {transform_indices = @transform_5, window_bounds = array<i64: 1, 32, 32>}, {transform_indices = @transform_6, window_bounds = array<i64: 1, 32, 32>}, {transform_indices = @transform_7, window_bounds = array<i64: 1, 32, 32>}, {transform_indices = @transform_8, window_bounds = array<i64: 1, 32, 32>}, {transform_indices = @transform_9, window_bounds = array<i64: 1, 32, 32>}, {transform_indices = @transform_10, window_bounds = array<i64: 1, 32, 32>}, {transform_indices = @transform_11, window_bounds = array<i64: 1, 32, 32>}, {transform_indices = @transform_12, window_bounds = array<i64: 1, 32, 64>}, {transform_indices = @transform_13, window_bounds = array<i64: 1, 64, 32>}, {transform_indices = @transform_14, window_bounds = array<i64: 1, 16, 32>}, {transform_indices = @transform_15, window_bounds = array<i64: 1, 1, 64>}, {pipeline_mode = #tpu.pipeline_mode<synchronous>, transform_indices = @transform_16, window_bounds = array<i64: 2, 32>}, {transform_indices = @transform_17, window_bounds = array<i64: 2, 8, 32>}]} {
    %c0_i32 = arith.constant 0 : i32
    %0 = arith.cmpi eq, %arg1, %c0_i32 : i32
    %1 = arith.extui %0 : i1 to i32
    %c0_i32_0 = arith.constant 0 : i32
    %2 = arith.cmpi ne, %1, %c0_i32_0 : i32
    scf.if %2 {
      %c0_113 = arith.constant 0 : index
      %c0_114 = arith.constant 0 : index
      %c0_115 = arith.constant 0 : index
      %261 = vector.load %arg2[%c0_113, %c0_114, %c0_115] : memref<2x8x32xf32, #tpu.memory_space<vmem>>, vector<2x8x32xf32>
      %c0_116 = arith.constant 0 : index
      %c0_117 = arith.constant 0 : index
      %c0_118 = arith.constant 0 : index
      %262 = vector.load %arg19[%c0_116, %c0_117, %c0_118] : memref<2x8x32xf32, #tpu.memory_space<vmem>>, vector<2x8x32xf32>
      tpu.vector_store %arg19[%c0_116, %c0_117, %c0_118], %261 {strides = array<i32>} : memref<2x8x32xf32, #tpu.memory_space<vmem>>, vector<2x8x32xf32>,
    } else {
    }
    %c0 = arith.constant 0 : index
    %c0_1 = arith.constant 0 : index
    %c0_2 = arith.constant 0 : index
    %3 = vector.load %arg19[%c0, %c0_1, %c0_2] : memref<2x8x32xf32, #tpu.memory_space<vmem>>, vector<2x8x32xf32>
    %4 = vector.shape_cast %3 : vector<2x8x32xf32> to vector<16x32xf32>
    %c0_3 = arith.constant 0 : index
    %c0_4 = arith.constant 0 : index
    %c0_5 = arith.constant 0 : index
    %5 = vector.load %arg3[%c0_3, %c0_4, %c0_5] : memref<2x16x32xf32, #tpu.memory_space<vmem>>, vector<2x16x32xf32>
    %6 = vector.shape_cast %5 : vector<2x16x32xf32> to vector<32x32xf32>
    %c0_6 = arith.constant 0 : index
    %c0_7 = arith.constant 0 : index
    %c0_8 = arith.constant 0 : index
    %7 = vector.load %arg5[%c0_6, %c0_7, %c0_8] : memref<2x16x32xf32, #tpu.memory_space<vmem>>, vector<2x16x32xf32>
    %8 = vector.shape_cast %7 : vector<2x16x32xf32> to vector<32x32xf32>
    %c0_9 = arith.constant 0 : index
    %c0_10 = arith.constant 0 : index
    %c0_11 = arith.constant 0 : index
    %9 = vector.load %arg4[%c0_9, %c0_10, %c0_11] : memref<2x8x32xf32, #tpu.memory_space<vmem>>, vector<2x8x32xf32>
    %10 = vector.shape_cast %9 : vector<2x8x32xf32> to vector<16x32xf32>
    %11 = arith.addf %4, %10 : vector<16x32xf32>
    %c0_12 = arith.constant 0 : index
    %c0_13 = arith.constant 0 : index
    %c0_14 = arith.constant 0 : index
    %12 = vector.load %arg6[%c0_12, %c0_13, %c0_14] : memref<1x32x32xbf16, #tpu.memory_space<vmem>>, vector<1x32x32xbf16>
    %13 = vector.shape_cast %12 : vector<1x32x32xbf16> to vector<32x32xbf16>
    %14 = arith.truncf %11 : vector<16x32xf32> to vector<16x32xbf16>
    %cst = arith.constant dense<0.000000e+00> : vector<16x32xf32>
    %15 = tpu.matmul %14, %13, %cst {dimension_numbers = #tpu.dot_dimension_numbers<[1], [0], [0], [1], [0, 0, 1, 1], [], []>} : vector<16x32xbf16>, vector<32x32xbf16>, vector<16x32xf32> -> vector<16x32xf32>
    %c0_15 = arith.constant 0 : index
    %c0_16 = arith.constant 0 : index
    %c0_17 = arith.constant 0 : index
    %16 = vector.load %arg16[%c0_15, %c0_16, %c0_17] : memref<1x16x32xf32, #tpu.memory_space<vmem>>, vector<1x1x32xf32>
    %17 = vector.shape_cast %16 : vector<1x1x32xf32> to vector<1x32xf32>
    %18 = vector.broadcast %17 : vector<1x32xf32> to vector<16x32xf32>
    %19 = arith.addf %15, %18 : vector<16x32xf32>
    %c0_18 = arith.constant 0 : index
    %c0_19 = arith.constant 0 : index
    %c0_20 = arith.constant 0 : index
    %20 = vector.load %arg7[%c0_18, %c0_19, %c0_20] : memref<1x32x32xbf16, #tpu.memory_space<vmem>>, vector<1x32x32xbf16>
    %21 = vector.shape_cast %20 : vector<1x32x32xbf16> to vector<32x32xbf16>
    %22 = arith.truncf %11 : vector<16x32xf32> to vector<16x32xbf16>
    %cst_21 = arith.constant dense<0.000000e+00> : vector<16x32xf32>
    %23 = tpu.matmul %22, %21, %cst_21 {dimension_numbers = #tpu.dot_dimension_numbers<[1], [0], [0], [1], [0, 0, 1, 1], [], []>} : vector<16x32xbf16>, vector<32x32xbf16>, vector<16x32xf32> -> vector<16x32xf32>
    %c0_22 = arith.constant 0 : index
    %c1 = arith.constant 1 : index
    %c0_23 = arith.constant 0 : index
    %24 = vector.load %arg16[%c0_22, %c1, %c0_23] : memref<1x16x32xf32, #tpu.memory_space<vmem>>, vector<1x1x32xf32>
    %25 = vector.shape_cast %24 : vector<1x1x32xf32> to vector<1x32xf32>
    %26 = vector.broadcast %25 : vector<1x32xf32> to vector<16x32xf32>
    %27 = arith.addf %23, %26 : vector<16x32xf32>
    %c0_24 = arith.constant 0 : index
    %c0_25 = arith.constant 0 : index
    %c0_26 = arith.constant 0 : index
    %28 = vector.load %arg8[%c0_24, %c0_25, %c0_26] : memref<1x32x32xbf16, #tpu.memory_space<vmem>>, vector<1x32x32xbf16>
    %29 = vector.shape_cast %28 : vector<1x32x32xbf16> to vector<32x32xbf16>
    %30 = arith.truncf %4 : vector<16x32xf32> to vector<16x32xbf16>
    %cst_27 = arith.constant dense<0.000000e+00> : vector<16x32xf32>
    %31 = tpu.matmul %30, %29, %cst_27 {dimension_numbers = #tpu.dot_dimension_numbers<[1], [0], [0], [1], [0, 0, 1, 1], [], []>} : vector<16x32xbf16>, vector<32x32xbf16>, vector<16x32xf32> -> vector<16x32xf32>
    %c0_28 = arith.constant 0 : index
    %c2 = arith.constant 2 : index
    %c0_29 = arith.constant 0 : index
    %32 = vector.load %arg16[%c0_28, %c2, %c0_29] : memref<1x16x32xf32, #tpu.memory_space<vmem>>, vector<1x1x32xf32>
    %33 = vector.shape_cast %32 : vector<1x1x32xf32> to vector<1x32xf32>
    %34 = vector.broadcast %33 : vector<1x32xf32> to vector<16x32xf32>
    %35 = arith.addf %31, %34 : vector<16x32xf32>
    %36 = vector.extract_strided_slice %19 {offsets = [0, 0], sizes = [8, 32], strides = [1, 1]} : vector<16x32xf32> to vector<8x32xf32>
    %37 = vector.shape_cast %36 : vector<8x32xf32> to vector<8x4x8xf32>
    %38 = tpu.transpose %37, [1, 0, 2] : vector<8x4x8xf32> -> vector<4x8x8xf32>
    %39 = vector.extract_strided_slice %19 {offsets = [8, 0], sizes = [8, 32], strides = [1, 1]} : vector<16x32xf32> to vector<8x32xf32>
    %40 = vector.shape_cast %39 : vector<8x32xf32> to vector<8x4x8xf32>
    %41 = tpu.transpose %40, [1, 0, 2] : vector<8x4x8xf32> -> vector<4x8x8xf32>
    %42 = tpu.concatenate %38, %41 in 0 : vector<4x8x8xf32>, vector<4x8x8xf32> -> vector<8x8x8xf32>
    %43 = arith.truncf %42 : vector<8x8x8xf32> to vector<8x8x8xbf16>
    %44 = vector.extract_strided_slice %27 {offsets = [0, 0], sizes = [8, 32], strides = [1, 1]} : vector<16x32xf32> to vector<8x32xf32>
    %45 = vector.shape_cast %44 : vector<8x32xf32> to vector<8x4x8xf32>
    %46 = tpu.transpose %45, [1, 0, 2] : vector<8x4x8xf32> -> vector<4x8x8xf32>
    %47 = vector.extract_strided_slice %27 {offsets = [8, 0], sizes = [8, 32], strides = [1, 1]} : vector<16x32xf32> to vector<8x32xf32>
    %48 = vector.shape_cast %47 : vector<8x32xf32> to vector<8x4x8xf32>
    %49 = tpu.transpose %48, [1, 0, 2] : vector<8x4x8xf32> -> vector<4x8x8xf32>
    %50 = tpu.concatenate %46, %49 in 0 : vector<4x8x8xf32>, vector<4x8x8xf32> -> vector<8x8x8xf32>
    %51 = arith.truncf %50 : vector<8x8x8xf32> to vector<8x8x8xbf16>
    %52 = vector.extract_strided_slice %35 {offsets = [0, 0], sizes = [8, 32], strides = [1, 1]} : vector<16x32xf32> to vector<8x32xf32>
    %53 = vector.shape_cast %52 : vector<8x32xf32> to vector<8x4x8xf32>
    %54 = tpu.transpose %53, [1, 0, 2] : vector<8x4x8xf32> -> vector<4x8x8xf32>
    %55 = vector.extract_strided_slice %35 {offsets = [8, 0], sizes = [8, 32], strides = [1, 1]} : vector<16x32xf32> to vector<8x32xf32>
    %56 = vector.shape_cast %55 : vector<8x32xf32> to vector<8x4x8xf32>
    %57 = tpu.transpose %56, [1, 0, 2] : vector<8x4x8xf32> -> vector<4x8x8xf32>
    %58 = tpu.concatenate %54, %57 in 0 : vector<4x8x8xf32>, vector<4x8x8xf32> -> vector<8x8x8xf32>
    %59 = arith.truncf %58 : vector<8x8x8xf32> to vector<8x8x8xbf16>
    "tpu.trace_start"() <{level = 10 : i32, message = "bqd,bkd->bqk"}> : () -> ()
    %cst_30 = arith.constant dense<0.000000e+00> : vector<8x8x8xf32>
    %60 = tpu.matmul %43, %51, %cst_30 {dimension_numbers = #tpu.dot_dimension_numbers<[2], [2], [1], [1], [0, 0, 0, 1, 1, 1], [0], [0]>} : vector<8x8x8xbf16>, vector<8x8x8xbf16>, vector<8x8x8xf32> -> vector<8x8x8xf32>
    "tpu.trace_stop"() : () -> ()
    %cst_31 = arith.constant dense<0xFF800000> : vector<8x8xf32>
    %61 = vector.multi_reduction <maximumf>, %60, %cst_31 [2] : vector<8x8x8xf32> to vector<8x8xf32>
    %62 = vector.shape_cast %61 : vector<8x8xf32> to vector<8x8x1xf32>
    %63 = vector.broadcast %62 : vector<8x8x1xf32> to vector<8x8x8xf32>
    %64 = arith.subf %60, %63 : vector<8x8x8xf32>
    %65 = math.exp %64 : vector<8x8x8xf32>
    %cst_32 = arith.constant dense<0.000000e+00> : vector<8x8xf32>
    %66 = vector.multi_reduction <add>, %65, %cst_32 [2] : vector<8x8x8xf32> to vector<8x8xf32>
    %67 = vector.shape_cast %66 : vector<8x8xf32> to vector<8x8x1xf32>
    %68 = vector.broadcast %67 : vector<8x8x1xf32> to vector<8x8x8xf32>
    %69 = arith.divf %65, %68 : vector<8x8x8xf32>
    %70 = arith.truncf %69 : vector<8x8x8xf32> to vector<8x8x8xbf16>
    "tpu.trace_start"() <{level = 10 : i32, message = "bqk,bkd->bqd"}> : () -> ()
    %cst_33 = arith.constant dense<0.000000e+00> : vector<8x8x8xf32>
    %71 = tpu.matmul %70, %59, %cst_33 {dimension_numbers = #tpu.dot_dimension_numbers<[2], [1], [1], [2], [0, 0, 0, 1, 1, 2], [0], [0]>} : vector<8x8x8xbf16>, vector<8x8x8xbf16>, vector<8x8x8xf32> -> vector<8x8x8xf32>
    "tpu.trace_stop"() : () -> ()
    %72 = vector.extract_strided_slice %71 {offsets = [0, 0, 0], sizes = [4, 8, 8], strides = [1, 1, 1]} : vector<8x8x8xf32> to vector<4x8x8xf32>
    %73 = tpu.transpose %72, [1, 0, 2] : vector<4x8x8xf32> -> vector<8x4x8xf32>
    %74 = vector.shape_cast %73 : vector<8x4x8xf32> to vector<8x32xf32>
    %75 = vector.extract_strided_slice %71 {offsets = [4, 0, 0], sizes = [4, 8, 8], strides = [1, 1, 1]} : vector<8x8x8xf32> to vector<4x8x8xf32>
    %76 = tpu.transpose %75, [1, 0, 2] : vector<4x8x8xf32> -> vector<8x4x8xf32>
    %77 = vector.shape_cast %76 : vector<8x4x8xf32> to vector<8x32xf32>
    %78 = tpu.concatenate %74, %77 in 0 : vector<8x32xf32>, vector<8x32xf32> -> vector<16x32xf32>
    %c0_34 = arith.constant 0 : index
    %c0_35 = arith.constant 0 : index
    %c0_36 = arith.constant 0 : index
    %79 = vector.load %arg9[%c0_34, %c0_35, %c0_36] : memref<1x32x32xbf16, #tpu.memory_space<vmem>>, vector<1x32x32xbf16>
    %80 = vector.shape_cast %79 : vector<1x32x32xbf16> to vector<32x32xbf16>
    %81 = arith.truncf %78 : vector<16x32xf32> to vector<16x32xbf16>
    %cst_37 = arith.constant dense<0.000000e+00> : vector<16x32xf32>
    %82 = tpu.matmul %81, %80, %cst_37 {dimension_numbers = #tpu.dot_dimension_numbers<[1], [0], [0], [1], [0, 0, 1, 1], [], []>} : vector<16x32xbf16>, vector<32x32xbf16>, vector<16x32xf32> -> vector<16x32xf32>
    %83 = arith.addf %4, %82 : vector<16x32xf32>
    %c0_38 = arith.constant 0 : index
    %c3 = arith.constant 3 : index
    %c0_39 = arith.constant 0 : index
    %84 = vector.load %arg16[%c0_38, %c3, %c0_39] : memref<1x16x32xf32, #tpu.memory_space<vmem>>, vector<1x1x32xf32>
    %85 = vector.shape_cast %84 : vector<1x1x32xf32> to vector<1x32xf32>
    %86 = vector.broadcast %85 : vector<1x32xf32> to vector<16x32xf32>
    %87 = arith.addf %83, %86 : vector<16x32xf32>
    %c0_40 = arith.constant 0 : index
    %c8 = arith.constant 8 : index
    %c0_41 = arith.constant 0 : index
    %88 = vector.load %arg16[%c0_40, %c8, %c0_41] : memref<1x16x32xf32, #tpu.memory_space<vmem>>, vector<1x1x32xf32>
    %89 = vector.shape_cast %88 : vector<1x1x32xf32> to vector<1x32xf32>
    %c0_42 = arith.constant 0 : index
    %c9 = arith.constant 9 : index
    %c0_43 = arith.constant 0 : index
    %90 = vector.load %arg16[%c0_42, %c9, %c0_43] : memref<1x16x32xf32, #tpu.memory_space<vmem>>, vector<1x1x32xf32>
    %91 = vector.shape_cast %90 : vector<1x1x32xf32> to vector<1x32xf32>
    %cst_44 = arith.constant dense<0.000000e+00> : vector<16xf32>
    %92 = vector.multi_reduction <add>, %87, %cst_44 [1] : vector<16x32xf32> to vector<16xf32>
    %93 = vector.shape_cast %92 : vector<16xf32> to vector<16x1xf32>
    %cst_45 = arith.constant 3.200000e+01 : f32
    %94 = vector.broadcast %cst_45 : f32 to vector<16x1xf32>
    %95 = arith.divf %93, %94 : vector<16x1xf32>
    %96 = vector.broadcast %95 : vector<16x1xf32> to vector<16x32xf32>
    %97 = arith.subf %87, %96 : vector<16x32xf32>
    %98 = arith.mulf %97, %97 : vector<16x32xf32>
    %cst_46 = arith.constant dense<0.000000e+00> : vector<16xf32>
    %99 = vector.multi_reduction <add>, %98, %cst_46 [1] : vector<16x32xf32> to vector<16xf32>
    %100 = vector.shape_cast %99 : vector<16xf32> to vector<16x1xf32>
    %cst_47 = arith.constant 3.200000e+01 : f32
    %101 = vector.broadcast %cst_47 : f32 to vector<16x1xf32>
    %102 = arith.divf %100, %101 : vector<16x1xf32>
    %cst_48 = arith.constant 9.99999974E-6 : f32
    %103 = vector.broadcast %cst_48 : f32 to vector<16x1xf32>
    %104 = arith.addf %102, %103 : vector<16x1xf32>
    %105 = math.rsqrt %104 : vector<16x1xf32>
    %106 = vector.broadcast %105 : vector<16x1xf32> to vector<16x32xf32>
    %107 = arith.mulf %97, %106 : vector<16x32xf32>
    %108 = vector.broadcast %89 : vector<1x32xf32> to vector<16x32xf32>
    %109 = arith.mulf %107, %108 : vector<16x32xf32>
    %110 = vector.broadcast %91 : vector<1x32xf32> to vector<16x32xf32>
    %111 = arith.addf %109, %110 : vector<16x32xf32>
    %112 = arith.addf %111, %10 : vector<16x32xf32>
    %c0_49 = arith.constant 0 : index
    %c0_50 = arith.constant 0 : index
    %c0_51 = arith.constant 0 : index
    %113 = vector.load %arg10[%c0_49, %c0_50, %c0_51] : memref<1x32x32xbf16, #tpu.memory_space<vmem>>, vector<1x32x32xbf16>
    %114 = vector.shape_cast %113 : vector<1x32x32xbf16> to vector<32x32xbf16>
    %115 = arith.truncf %112 : vector<16x32xf32> to vector<16x32xbf16>
    %cst_52 = arith.constant dense<0.000000e+00> : vector<16x32xf32>
    %116 = tpu.matmul %115, %114, %cst_52 {dimension_numbers = #tpu.dot_dimension_numbers<[1], [0], [0], [1], [0, 0, 1, 1], [], []>} : vector<16x32xbf16>, vector<32x32xbf16>, vector<16x32xf32> -> vector<16x32xf32>
    %c0_53 = arith.constant 0 : index
    %c4 = arith.constant 4 : index
    %c0_54 = arith.constant 0 : index
    %117 = vector.load %arg16[%c0_53, %c4, %c0_54] : memref<1x16x32xf32, #tpu.memory_space<vmem>>, vector<1x1x32xf32>
    %118 = vector.shape_cast %117 : vector<1x1x32xf32> to vector<1x32xf32>
    %119 = vector.broadcast %118 : vector<1x32xf32> to vector<16x32xf32>
    %120 = arith.addf %116, %119 : vector<16x32xf32>
    %c0_55 = arith.constant 0 : index
    %c0_56 = arith.constant 0 : index
    %c0_57 = arith.constant 0 : index
    %121 = vector.load %arg11[%c0_55, %c0_56, %c0_57] : memref<1x32x32xbf16, #tpu.memory_space<vmem>>, vector<1x32x32xbf16>
    %122 = vector.shape_cast %121 : vector<1x32x32xbf16> to vector<32x32xbf16>
    %123 = arith.truncf %8 : vector<32x32xf32> to vector<32x32xbf16>
    %cst_58 = arith.constant dense<0.000000e+00> : vector<32x32xf32>
    %124 = tpu.matmul %123, %122, %cst_58 {dimension_numbers = #tpu.dot_dimension_numbers<[1], [0], [0], [1], [0, 0, 1, 1], [], []>} : vector<32x32xbf16>, vector<32x32xbf16>, vector<32x32xf32> -> vector<32x32xf32>
    %c0_59 = arith.constant 0 : index
    %c5 = arith.constant 5 : index
    %c0_60 = arith.constant 0 : index
    %125 = vector.load %arg16[%c0_59, %c5, %c0_60] : memref<1x16x32xf32, #tpu.memory_space<vmem>>, vector<1x1x32xf32>
    %126 = vector.shape_cast %125 : vector<1x1x32xf32> to vector<1x32xf32>
    %127 = vector.broadcast %126 : vector<1x32xf32> to vector<32x32xf32>
    %128 = arith.addf %124, %127 : vector<32x32xf32>
    %c0_61 = arith.constant 0 : index
    %c0_62 = arith.constant 0 : index
    %c0_63 = arith.constant 0 : index
    %129 = vector.load %arg12[%c0_61, %c0_62, %c0_63] : memref<1x32x32xbf16, #tpu.memory_space<vmem>>, vector<1x32x32xbf16>
    %130 = vector.shape_cast %129 : vector<1x32x32xbf16> to vector<32x32xbf16>
    %131 = arith.truncf %6 : vector<32x32xf32> to vector<32x32xbf16>
    %cst_64 = arith.constant dense<0.000000e+00> : vector<32x32xf32>
    %132 = tpu.matmul %131, %130, %cst_64 {dimension_numbers = #tpu.dot_dimension_numbers<[1], [0], [0], [1], [0, 0, 1, 1], [], []>} : vector<32x32xbf16>, vector<32x32xbf16>, vector<32x32xf32> -> vector<32x32xf32>
    %c0_65 = arith.constant 0 : index
    %c6 = arith.constant 6 : index
    %c0_66 = arith.constant 0 : index
    %133 = vector.load %arg16[%c0_65, %c6, %c0_66] : memref<1x16x32xf32, #tpu.memory_space<vmem>>, vector<1x1x32xf32>
    %134 = vector.shape_cast %133 : vector<1x1x32xf32> to vector<1x32xf32>
    %135 = vector.broadcast %134 : vector<1x32xf32> to vector<32x32xf32>
    %136 = arith.addf %132, %135 : vector<32x32xf32>
    %137 = vector.extract_strided_slice %120 {offsets = [0, 0], sizes = [8, 32], strides = [1, 1]} : vector<16x32xf32> to vector<8x32xf32>
    %138 = vector.shape_cast %137 : vector<8x32xf32> to vector<8x4x8xf32>
    %139 = tpu.transpose %138, [1, 0, 2] : vector<8x4x8xf32> -> vector<4x8x8xf32>
    %140 = vector.extract_strided_slice %120 {offsets = [8, 0], sizes = [8, 32], strides = [1, 1]} : vector<16x32xf32> to vector<8x32xf32>
    %141 = vector.shape_cast %140 : vector<8x32xf32> to vector<8x4x8xf32>
    %142 = tpu.transpose %141, [1, 0, 2] : vector<8x4x8xf32> -> vector<4x8x8xf32>
    %143 = tpu.concatenate %139, %142 in 0 : vector<4x8x8xf32>, vector<4x8x8xf32> -> vector<8x8x8xf32>
    %144 = arith.truncf %143 : vector<8x8x8xf32> to vector<8x8x8xbf16>
    %145 = vector.extract_strided_slice %128 {offsets = [0, 0], sizes = [16, 32], strides = [1, 1]} : vector<32x32xf32> to vector<16x32xf32>
    %146 = vector.shape_cast %145 : vector<16x32xf32> to vector<16x4x8xf32>
    %147 = tpu.transpose %146, [1, 0, 2] : vector<16x4x8xf32> -> vector<4x16x8xf32>
    %148 = vector.extract_strided_slice %128 {offsets = [16, 0], sizes = [16, 32], strides = [1, 1]} : vector<32x32xf32> to vector<16x32xf32>
    %149 = vector.shape_cast %148 : vector<16x32xf32> to vector<16x4x8xf32>
    %150 = tpu.transpose %149, [1, 0, 2] : vector<16x4x8xf32> -> vector<4x16x8xf32>
    %151 = tpu.concatenate %147, %150 in 0 : vector<4x16x8xf32>, vector<4x16x8xf32> -> vector<8x16x8xf32>
    %152 = arith.truncf %151 : vector<8x16x8xf32> to vector<8x16x8xbf16>
    %153 = vector.extract_strided_slice %136 {offsets = [0, 0], sizes = [16, 32], strides = [1, 1]} : vector<32x32xf32> to vector<16x32xf32>
    %154 = vector.shape_cast %153 : vector<16x32xf32> to vector<16x4x8xf32>
    %155 = tpu.transpose %154, [1, 0, 2] : vector<16x4x8xf32> -> vector<4x16x8xf32>
    %156 = vector.extract_strided_slice %136 {offsets = [16, 0], sizes = [16, 32], strides = [1, 1]} : vector<32x32xf32> to vector<16x32xf32>
    %157 = vector.shape_cast %156 : vector<16x32xf32> to vector<16x4x8xf32>
    %158 = tpu.transpose %157, [1, 0, 2] : vector<16x4x8xf32> -> vector<4x16x8xf32>
    %159 = tpu.concatenate %155, %158 in 0 : vector<4x16x8xf32>, vector<4x16x8xf32> -> vector<8x16x8xf32>
    %160 = arith.truncf %159 : vector<8x16x8xf32> to vector<8x16x8xbf16>
    "tpu.trace_start"() <{level = 10 : i32, message = "bqd,bkd->bqk"}> : () -> ()
    %cst_67 = arith.constant dense<0.000000e+00> : vector<8x8x16xf32>
    %161 = tpu.matmul %144, %152, %cst_67 {dimension_numbers = #tpu.dot_dimension_numbers<[2], [2], [1], [1], [0, 0, 0, 1, 1, 1], [0], [0]>} : vector<8x8x8xbf16>, vector<8x16x8xbf16>, vector<8x8x16xf32> -> vector<8x8x16xf32>
    "tpu.trace_stop"() : () -> ()
    %cst_68 = arith.constant dense<0xFF800000> : vector<8x8xf32>
    %162 = vector.multi_reduction <maximumf>, %161, %cst_68 [2] : vector<8x8x16xf32> to vector<8x8xf32>
    %163 = vector.shape_cast %162 : vector<8x8xf32> to vector<8x8x1xf32>
    %164 = vector.broadcast %163 : vector<8x8x1xf32> to vector<8x8x16xf32>
    %165 = arith.subf %161, %164 : vector<8x8x16xf32>
    %166 = math.exp %165 : vector<8x8x16xf32>
    %cst_69 = arith.constant dense<0.000000e+00> : vector<8x8xf32>
    %167 = vector.multi_reduction <add>, %166, %cst_69 [2] : vector<8x8x16xf32> to vector<8x8xf32>
    %168 = vector.shape_cast %167 : vector<8x8xf32> to vector<8x8x1xf32>
    %169 = vector.broadcast %168 : vector<8x8x1xf32> to vector<8x8x16xf32>
    %170 = arith.divf %166, %169 : vector<8x8x16xf32>
    %171 = arith.truncf %170 : vector<8x8x16xf32> to vector<8x8x16xbf16>
    "tpu.trace_start"() <{level = 10 : i32, message = "bqk,bkd->bqd"}> : () -> ()
    %cst_70 = arith.constant dense<0.000000e+00> : vector<8x8x8xf32>
    %172 = tpu.matmul %171, %160, %cst_70 {dimension_numbers = #tpu.dot_dimension_numbers<[2], [1], [1], [2], [0, 0, 0, 1, 1, 2], [0], [0]>} : vector<8x8x16xbf16>, vector<8x16x8xbf16>, vector<8x8x8xf32> -> vector<8x8x8xf32>
    "tpu.trace_stop"() : () -> ()
    %173 = vector.extract_strided_slice %172 {offsets = [0, 0, 0], sizes = [4, 8, 8], strides = [1, 1, 1]} : vector<8x8x8xf32> to vector<4x8x8xf32>
    %174 = tpu.transpose %173, [1, 0, 2] : vector<4x8x8xf32> -> vector<8x4x8xf32>
    %175 = vector.shape_cast %174 : vector<8x4x8xf32> to vector<8x32xf32>
    %176 = vector.extract_strided_slice %172 {offsets = [4, 0, 0], sizes = [4, 8, 8], strides = [1, 1, 1]} : vector<8x8x8xf32> to vector<4x8x8xf32>
    %177 = tpu.transpose %176, [1, 0, 2] : vector<4x8x8xf32> -> vector<8x4x8xf32>
    %178 = vector.shape_cast %177 : vector<8x4x8xf32> to vector<8x32xf32>
    %179 = tpu.concatenate %175, %178 in 0 : vector<8x32xf32>, vector<8x32xf32> -> vector<16x32xf32>
    %c0_71 = arith.constant 0 : index
    %c0_72 = arith.constant 0 : index
    %c0_73 = arith.constant 0 : index
    %180 = vector.load %arg13[%c0_71, %c0_72, %c0_73] : memref<1x32x32xbf16, #tpu.memory_space<vmem>>, vector<1x32x32xbf16>
    %181 = vector.shape_cast %180 : vector<1x32x32xbf16> to vector<32x32xbf16>
    %182 = arith.truncf %179 : vector<16x32xf32> to vector<16x32xbf16>
    %cst_74 = arith.constant dense<0.000000e+00> : vector<16x32xf32>
    %183 = tpu.matmul %182, %181, %cst_74 {dimension_numbers = #tpu.dot_dimension_numbers<[1], [0], [0], [1], [0, 0, 1, 1], [], []>} : vector<16x32xbf16>, vector<32x32xbf16>, vector<16x32xf32> -> vector<16x32xf32>
    %184 = arith.addf %111, %183 : vector<16x32xf32>
    %c0_75 = arith.constant 0 : index
    %c7 = arith.constant 7 : index
    %c0_76 = arith.constant 0 : index
    %185 = vector.load %arg16[%c0_75, %c7, %c0_76] : memref<1x16x32xf32, #tpu.memory_space<vmem>>, vector<1x1x32xf32>
    %186 = vector.shape_cast %185 : vector<1x1x32xf32> to vector<1x32xf32>
    %187 = vector.broadcast %186 : vector<1x32xf32> to vector<16x32xf32>
    %188 = arith.addf %184, %187 : vector<16x32xf32>
    %c0_77 = arith.constant 0 : index
    %c10 = arith.constant 10 : index
    %c0_78 = arith.constant 0 : index
    %189 = vector.load %arg16[%c0_77, %c10, %c0_78] : memref<1x16x32xf32, #tpu.memory_space<vmem>>, vector<1x1x32xf32>
    %190 = vector.shape_cast %189 : vector<1x1x32xf32> to vector<1x32xf32>
    %c0_79 = arith.constant 0 : index
    %c11 = arith.constant 11 : index
    %c0_80 = arith.constant 0 : index
    %191 = vector.load %arg16[%c0_79, %c11, %c0_80] : memref<1x16x32xf32, #tpu.memory_space<vmem>>, vector<1x1x32xf32>
    %192 = vector.shape_cast %191 : vector<1x1x32xf32> to vector<1x32xf32>
    %cst_81 = arith.constant dense<0.000000e+00> : vector<16xf32>
    %193 = vector.multi_reduction <add>, %188, %cst_81 [1] : vector<16x32xf32> to vector<16xf32>
    %194 = vector.shape_cast %193 : vector<16xf32> to vector<16x1xf32>
    %cst_82 = arith.constant 3.200000e+01 : f32
    %195 = vector.broadcast %cst_82 : f32 to vector<16x1xf32>
    %196 = arith.divf %194, %195 : vector<16x1xf32>
    %197 = vector.broadcast %196 : vector<16x1xf32> to vector<16x32xf32>
    %198 = arith.subf %188, %197 : vector<16x32xf32>
    %199 = arith.mulf %198, %198 : vector<16x32xf32>
    %cst_83 = arith.constant dense<0.000000e+00> : vector<16xf32>
    %200 = vector.multi_reduction <add>, %199, %cst_83 [1] : vector<16x32xf32> to vector<16xf32>
    %201 = vector.shape_cast %200 : vector<16xf32> to vector<16x1xf32>
    %cst_84 = arith.constant 3.200000e+01 : f32
    %202 = vector.broadcast %cst_84 : f32 to vector<16x1xf32>
    %203 = arith.divf %201, %202 : vector<16x1xf32>
    %cst_85 = arith.constant 9.99999974E-6 : f32
    %204 = vector.broadcast %cst_85 : f32 to vector<16x1xf32>
    %205 = arith.addf %203, %204 : vector<16x1xf32>
    %206 = math.rsqrt %205 : vector<16x1xf32>
    %207 = vector.broadcast %206 : vector<16x1xf32> to vector<16x32xf32>
    %208 = arith.mulf %198, %207 : vector<16x32xf32>
    %209 = vector.broadcast %190 : vector<1x32xf32> to vector<16x32xf32>
    %210 = arith.mulf %208, %209 : vector<16x32xf32>
    %211 = vector.broadcast %192 : vector<1x32xf32> to vector<16x32xf32>
    %212 = arith.addf %210, %211 : vector<16x32xf32>
    %c0_86 = arith.constant 0 : index
    %c0_87 = arith.constant 0 : index
    %c0_88 = arith.constant 0 : index
    %213 = vector.load %arg14[%c0_86, %c0_87, %c0_88] : memref<1x32x64xbf16, #tpu.memory_space<vmem>>, vector<1x32x64xbf16>
    %214 = vector.shape_cast %213 : vector<1x32x64xbf16> to vector<32x64xbf16>
    %215 = arith.truncf %212 : vector<16x32xf32> to vector<16x32xbf16>
    %cst_89 = arith.constant dense<0.000000e+00> : vector<16x64xf32>
    %216 = tpu.matmul %215, %214, %cst_89 {dimension_numbers = #tpu.dot_dimension_numbers<[1], [0], [0], [1], [0, 0, 1, 1], [], []>} : vector<16x32xbf16>, vector<32x64xbf16>, vector<16x64xf32> -> vector<16x64xf32>
    %c0_90 = arith.constant 0 : index
    %c0_91 = arith.constant 0 : index
    %c0_92 = arith.constant 0 : index
    %217 = vector.load %arg17[%c0_90, %c0_91, %c0_92] : memref<1x1x64xf32, #tpu.memory_space<vmem>>, vector<1x1x64xf32>
    %218 = vector.shape_cast %217 : vector<1x1x64xf32> to vector<1x64xf32>
    %219 = vector.broadcast %218 : vector<1x64xf32> to vector<16x64xf32>
    %220 = arith.addf %216, %219 : vector<16x64xf32>
    %cst_93 = arith.constant 0.000000e+00 : f32
    %221 = vector.broadcast %cst_93 : f32 to vector<16x64xf32>
    %222 = arith.maximumf %220, %221 : vector<16x64xf32>
    %c0_94 = arith.constant 0 : index
    %c0_95 = arith.constant 0 : index
    %c0_96 = arith.constant 0 : index
    %223 = vector.load %arg15[%c0_94, %c0_95, %c0_96] : memref<1x64x32xbf16, #tpu.memory_space<vmem>>, vector<1x64x32xbf16>
    %224 = vector.shape_cast %223 : vector<1x64x32xbf16> to vector<64x32xbf16>
    %225 = arith.truncf %222 : vector<16x64xf32> to vector<16x64xbf16>
    %cst_97 = arith.constant dense<0.000000e+00> : vector<16x32xf32>
    %226 = tpu.matmul %225, %224, %cst_97 {dimension_numbers = #tpu.dot_dimension_numbers<[1], [0], [0], [1], [0, 0, 1, 1], [], []>} : vector<16x64xbf16>, vector<64x32xbf16>, vector<16x32xf32> -> vector<16x32xf32>
    %227 = arith.addf %212, %226 : vector<16x32xf32>
    %c0_98 = arith.constant 0 : index
    %c14 = arith.constant 14 : index
    %c0_99 = arith.constant 0 : index
    %228 = vector.load %arg16[%c0_98, %c14, %c0_99] : memref<1x16x32xf32, #tpu.memory_space<vmem>>, vector<1x1x32xf32>
    %229 = vector.shape_cast %228 : vector<1x1x32xf32> to vector<1x32xf32>
    %230 = vector.broadcast %229 : vector<1x32xf32> to vector<16x32xf32>
    %231 = arith.addf %227, %230 : vector<16x32xf32>
    %c0_100 = arith.constant 0 : index
    %c12 = arith.constant 12 : index
    %c0_101 = arith.constant 0 : index
    %232 = vector.load %arg16[%c0_100, %c12, %c0_101] : memref<1x16x32xf32, #tpu.memory_space<vmem>>, vector<1x1x32xf32>
    %233 = vector.shape_cast %232 : vector<1x1x32xf32> to vector<1x32xf32>
    %c0_102 = arith.constant 0 : index
    %c13 = arith.constant 13 : index
    %c0_103 = arith.constant 0 : index
    %234 = vector.load %arg16[%c0_102, %c13, %c0_103] : memref<1x16x32xf32, #tpu.memory_space<vmem>>, vector<1x1x32xf32>
    %235 = vector.shape_cast %234 : vector<1x1x32xf32> to vector<1x32xf32>
    %cst_104 = arith.constant dense<0.000000e+00> : vector<16xf32>
    %236 = vector.multi_reduction <add>, %231, %cst_104 [1] : vector<16x32xf32> to vector<16xf32>
    %237 = vector.shape_cast %236 : vector<16xf32> to vector<16x1xf32>
    %cst_105 = arith.constant 3.200000e+01 : f32
    %238 = vector.broadcast %cst_105 : f32 to vector<16x1xf32>
    %239 = arith.divf %237, %238 : vector<16x1xf32>
    %240 = vector.broadcast %239 : vector<16x1xf32> to vector<16x32xf32>
    %241 = arith.subf %231, %240 : vector<16x32xf32>
    %242 = arith.mulf %241, %241 : vector<16x32xf32>
    %cst_106 = arith.constant dense<0.000000e+00> : vector<16xf32>
    %243 = vector.multi_reduction <add>, %242, %cst_106 [1] : vector<16x32xf32> to vector<16xf32>
    %244 = vector.shape_cast %243 : vector<16xf32> to vector<16x1xf32>
    %cst_107 = arith.constant 3.200000e+01 : f32
    %245 = vector.broadcast %cst_107 : f32 to vector<16x1xf32>
    %246 = arith.divf %244, %245 : vector<16x1xf32>
    %cst_108 = arith.constant 9.99999974E-6 : f32
    %247 = vector.broadcast %cst_108 : f32 to vector<16x1xf32>
    %248 = arith.addf %246, %247 : vector<16x1xf32>
    %249 = math.rsqrt %248 : vector<16x1xf32>
    %250 = vector.broadcast %249 : vector<16x1xf32> to vector<16x32xf32>
    %251 = arith.mulf %241, %250 : vector<16x32xf32>
    %252 = vector.broadcast %233 : vector<1x32xf32> to vector<16x32xf32>
    %253 = arith.mulf %251, %252 : vector<16x32xf32>
    %254 = vector.broadcast %235 : vector<1x32xf32> to vector<16x32xf32>
    %255 = arith.addf %253, %254 : vector<16x32xf32>
    %256 = vector.shape_cast %255 : vector<16x32xf32> to vector<2x8x32xf32>
    %c0_109 = arith.constant 0 : index
    %c0_110 = arith.constant 0 : index
    %c0_111 = arith.constant 0 : index
    %257 = vector.load %arg19[%c0_109, %c0_110, %c0_111] : memref<2x8x32xf32, #tpu.memory_space<vmem>>, vector<2x8x32xf32>
    tpu.vector_store %arg19[%c0_109, %c0_110, %c0_111], %256 {strides = array<i32>} : memref<2x8x32xf32, #tpu.memory_space<vmem>>, vector<2x8x32xf32>,
    %c1_i32 = arith.constant 1 : i32
    %258 = arith.cmpi eq, %arg1, %c1_i32 : i32
    %259 = arith.extui %258 : i1 to i32
    %c0_i32_112 = arith.constant 0 : i32
    %260 = arith.cmpi ne, %259, %c0_i32_112 : i32
    scf.if %260 {
      %c0_113 = arith.constant 0 : index
      %c0_114 = arith.constant 0 : index
      %c0_115 = arith.constant 0 : index
      %261 = vector.load %arg19[%c0_113, %c0_114, %c0_115] : memref<2x8x32xf32, #tpu.memory_space<vmem>>, vector<2x8x32xf32>
      %262 = vector.shape_cast %261 : vector<2x8x32xf32> to vector<16x32xf32>
      %c0_116 = arith.constant 0 : index
      %c0_117 = arith.constant 0 : index
      %263 = vector.load %arg18[%c0_116, %c0_117] : memref<2x32xf32, #tpu.memory_space<vmem>>, vector<1x32xf32>
      %c1_118 = arith.constant 1 : index
      %c0_119 = arith.constant 0 : index
      %264 = vector.load %arg18[%c1_118, %c0_119] : memref<2x32xf32, #tpu.memory_space<vmem>>, vector<1x32xf32>
      %cst_120 = arith.constant dense<0.000000e+00> : vector<16xf32>
      %265 = vector.multi_reduction <add>, %262, %cst_120 [1] : vector<16x32xf32> to vector<16xf32>
      %266 = vector.shape_cast %265 : vector<16xf32> to vector<16x1xf32>
      %cst_121 = arith.constant 3.200000e+01 : f32
      %267 = vector.broadcast %cst_121 : f32 to vector<16x1xf32>
      %268 = arith.divf %266, %267 : vector<16x1xf32>
      %269 = vector.broadcast %268 : vector<16x1xf32> to vector<16x32xf32>
      %270 = arith.subf %262, %269 : vector<16x32xf32>
      %271 = arith.mulf %270, %270 : vector<16x32xf32>
      %cst_122 = arith.constant dense<0.000000e+00> : vector<16xf32>
      %272 = vector.multi_reduction <add>, %271, %cst_122 [1] : vector<16x32xf32> to vector<16xf32>
      %273 = vector.shape_cast %272 : vector<16xf32> to vector<16x1xf32>
      %cst_123 = arith.constant 3.200000e+01 : f32
      %274 = vector.broadcast %cst_123 : f32 to vector<16x1xf32>
      %275 = arith.divf %273, %274 : vector<16x1xf32>
      %cst_124 = arith.constant 9.99999974E-6 : f32
      %276 = vector.broadcast %cst_124 : f32 to vector<16x1xf32>
      %277 = arith.addf %275, %276 : vector<16x1xf32>
      %278 = math.rsqrt %277 : vector<16x1xf32>
      %279 = vector.broadcast %278 : vector<16x1xf32> to vector<16x32xf32>
      %280 = arith.mulf %270, %279 : vector<16x32xf32>
      %281 = vector.broadcast %263 : vector<1x32xf32> to vector<16x32xf32>
      %282 = arith.mulf %280, %281 : vector<16x32xf32>
      %283 = vector.broadcast %264 : vector<1x32xf32> to vector<16x32xf32>
      %284 = arith.addf %282, %283 : vector<16x32xf32>
      %285 = vector.shape_cast %284 : vector<16x32xf32> to vector<2x8x32xf32>
      %c0_125 = arith.constant 0 : index
      %c0_126 = arith.constant 0 : index
      %c0_127 = arith.constant 0 : index
      %286 = vector.load %arg19[%c0_125, %c0_126, %c0_127] : memref<2x8x32xf32, #tpu.memory_space<vmem>>, vector<2x8x32xf32>
      tpu.vector_store %arg19[%c0_125, %c0_126, %c0_127], %285 {strides = array<i32>} : memref<2x8x32xf32, #tpu.memory_space<vmem>>, vector<2x8x32xf32>,
    } else {
    }
    return
  }
  func.func @transform_0(%arg0: i32, %arg1: i32) -> (i32, i32, i32) {
    %c0_i32 = arith.constant 0 : i32
    %c0_i32_0 = arith.constant 0 : i32
    %c0_i32_1 = arith.constant 0 : i32
    return %arg0, %c0_i32, %c0_i32_0 : i32, i32, i32
  }
  func.func @transform_1(%arg0: i32, %arg1: i32) -> (i32, i32, i32) {
    %c0_i32 = arith.constant 0 : i32
    %c0_i32_0 = arith.constant 0 : i32
    %c0_i32_1 = arith.constant 0 : i32
    return %arg0, %c0_i32, %c0_i32_0 : i32, i32, i32
  }
  func.func @transform_2(%arg0: i32, %arg1: i32) -> (i32, i32, i32) {
    %c0_i32 = arith.constant 0 : i32
    %c0_i32_0 = arith.constant 0 : i32
    %c0_i32_1 = arith.constant 0 : i32
    return %arg0, %c0_i32, %c0_i32_0 : i32, i32, i32
  }
  func.func @transform_3(%arg0: i32, %arg1: i32) -> (i32, i32, i32) {
    %c0_i32 = arith.constant 0 : i32
    %c0_i32_0 = arith.constant 0 : i32
    %c0_i32_1 = arith.constant 0 : i32
    return %arg0, %c0_i32, %c0_i32_0 : i32, i32, i32
  }
  func.func @transform_4(%arg0: i32, %arg1: i32) -> (i32, i32, i32) {
    %c0_i32 = arith.constant 0 : i32
    %c0_i32_0 = arith.constant 0 : i32
    %c0_i32_1 = arith.constant 0 : i32
    return %arg1, %c0_i32, %c0_i32_0 : i32, i32, i32
  }
  func.func @transform_5(%arg0: i32, %arg1: i32) -> (i32, i32, i32) {
    %c0_i32 = arith.constant 0 : i32
    %c0_i32_0 = arith.constant 0 : i32
    %c0_i32_1 = arith.constant 0 : i32
    return %arg1, %c0_i32, %c0_i32_0 : i32, i32, i32
  }
  func.func @transform_6(%arg0: i32, %arg1: i32) -> (i32, i32, i32) {
    %c0_i32 = arith.constant 0 : i32
    %c0_i32_0 = arith.constant 0 : i32
    %c0_i32_1 = arith.constant 0 : i32
    return %arg1, %c0_i32, %c0_i32_0 : i32, i32, i32
  }
  func.func @transform_7(%arg0: i32, %arg1: i32) -> (i32, i32, i32) {
    %c0_i32 = arith.constant 0 : i32
    %c0_i32_0 = arith.constant 0 : i32
    %c0_i32_1 = arith.constant 0 : i32
    return %arg1, %c0_i32, %c0_i32_0 : i32, i32, i32
  }
  func.func @transform_8(%arg0: i32, %arg1: i32) -> (i32, i32, i32) {
    %c0_i32 = arith.constant 0 : i32
    %c0_i32_0 = arith.constant 0 : i32
    %c0_i32_1 = arith.constant 0 : i32
    return %arg1, %c0_i32, %c0_i32_0 : i32, i32, i32
  }
  func.func @transform_9(%arg0: i32, %arg1: i32) -> (i32, i32, i32) {
    %c0_i32 = arith.constant 0 : i32
    %c0_i32_0 = arith.constant 0 : i32
    %c0_i32_1 = arith.constant 0 : i32
    return %arg1, %c0_i32, %c0_i32_0 : i32, i32, i32
  }
  func.func @transform_10(%arg0: i32, %arg1: i32) -> (i32, i32, i32) {
    %c0_i32 = arith.constant 0 : i32
    %c0_i32_0 = arith.constant 0 : i32
    %c0_i32_1 = arith.constant 0 : i32
    return %arg1, %c0_i32, %c0_i32_0 : i32, i32, i32
  }
  func.func @transform_11(%arg0: i32, %arg1: i32) -> (i32, i32, i32) {
    %c0_i32 = arith.constant 0 : i32
    %c0_i32_0 = arith.constant 0 : i32
    %c0_i32_1 = arith.constant 0 : i32
    return %arg1, %c0_i32, %c0_i32_0 : i32, i32, i32
  }
  func.func @transform_12(%arg0: i32, %arg1: i32) -> (i32, i32, i32) {
    %c0_i32 = arith.constant 0 : i32
    %c0_i32_0 = arith.constant 0 : i32
    %c0_i32_1 = arith.constant 0 : i32
    return %arg1, %c0_i32, %c0_i32_0 : i32, i32, i32
  }
  func.func @transform_13(%arg0: i32, %arg1: i32) -> (i32, i32, i32) {
    %c0_i32 = arith.constant 0 : i32
    %c0_i32_0 = arith.constant 0 : i32
    %c0_i32_1 = arith.constant 0 : i32
    return %arg1, %c0_i32, %c0_i32_0 : i32, i32, i32
  }
  func.func @transform_14(%arg0: i32, %arg1: i32) -> (i32, i32, i32) {
    %c0_i32 = arith.constant 0 : i32
    %c0_i32_0 = arith.constant 0 : i32
    %c0_i32_1 = arith.constant 0 : i32
    return %arg1, %c0_i32, %c0_i32_0 : i32, i32, i32
  }
  func.func @transform_15(%arg0: i32, %arg1: i32) -> (i32, i32, i32) {
    %c0_i32 = arith.constant 0 : i32
    %c0_i32_0 = arith.constant 0 : i32
    %c0_i32_1 = arith.constant 0 : i32
    return %arg1, %c0_i32, %c0_i32_0 : i32, i32, i32
  }
  func.func @transform_16(%arg0: i32, %arg1: i32) -> (i32, i32) {
    %c0_i32 = arith.constant 0 : i32
    %c0_i32_0 = arith.constant 0 : i32
    %c0_i32_1 = arith.constant 0 : i32
    return %c0_i32, %c0_i32_0 : i32, i32
  }
  func.func @transform_17(%arg0: i32, %arg1: i32) -> (i32, i32, i32) {
    %c0_i32 = arith.constant 0 : i32
    %c0_i32_0 = arith.constant 0 : i32
    %c0_i32_1 = arith.constant 0 : i32
    return %arg0, %c0_i32, %c0_i32_0 : i32, i32, i32
  }
}

</mosaic_0001>

<bundles_post_ra>
// kernel: tpu_custom_call.1
= control target key start
LH: loop header
LB: loop body
LE: loop exit
PB: predicated region body
PF: predicated region fallthrough
CT: control target
= control target key end

     0   :  { %s8538_s0 = inlined_call_operand.hbm [shape: f32[2,8,32], index: 0, kind: input, shape index: {}]   ;;  %s8539_s1 = inlined_call_operand.vmem [shape: f32[2,16,32], index: 1, kind: input, shape index: {}]   ;;  %s8540_s2 = inlined_call_operand.hbm [shape: f32[2,8,32], index: 2, kind: input, shape index: {}]   ;;  %s8541_s3 = inlined_call_operand.vmem [shape: f32[2,16,32], index: 3, kind: input, shape index: {}]   ;;  %s8542_s4 = inlined_call_operand.vmem [shape: bf16[2,32,32], index: 4, kind: input, shape index: {}]   ;;  %s8543_s5 = inlined_call_operand.hbm [shape: bf16[2,32,32], index: 5, kind: input, shape index: {}]   ;;  %s8544_s6 = inlined_call_operand.hbm [shape: bf16[2,32,32], index: 6, kind: input, shape index: {}]   ;;  %s8545_s7 = inlined_call_operand.hbm [shape: bf16[2,32,32], index: 7, kind: input, shape index: {}]   ;;  %s8546_s8 = inlined_call_operand.hbm [shape: bf16[2,32,32], index: 8, kind: input, shape index: {}]   ;;  %s8547_s9 = inlined_call_operand.hbm [shape: bf16[2,32,32], index: 9, kind: input, shape index: {}]   ;;  %s8548_s10 = inlined_call_operand.hbm [shape: bf16[2,32,32], index: 10, kind: input, shape index: {}]   ;;  %s8549_s11 = inlined_call_operand.hbm [shape: bf16[2,32,32], index: 11, kind: input, shape index: {}]   ;;  %s8550_s12 = inlined_call_operand.hbm [shape: bf16[2,32,64], index: 12, kind: input, shape index: {}]   ;;  %s8551_s13 = inlined_call_operand.vmem [shape: bf16[2,64,32], index: 13, kind: input, shape index: {}]   ;;  %s8552_s14 = inlined_call_operand.hbm [shape: f32[2,16,32], index: 14, kind: input, shape index: {}]   ;;  %s8553_s15 = inlined_call_operand.vmem [shape: f32[2,1,64], index: 15, kind: input, shape index: {}]   ;;  %s8554_s16 = inlined_call_operand.vmem [shape: f32[2,32], index: 16, kind: input, shape index: {}]   ;;  %s8555_s17 = inlined_call_operand.hbm [shape: f32[2,8,32], index: 17, kind: output, shape index: {}]  }
   0x1   :  { %8566 = sst [smem:[#allocation25_spill]] %s8538_s0 }
   0x2   :  { %8567 = sst [smem:[#allocation26_spill]] %s8539_s1 }
   0x3   :  { %8568 = sst [smem:[#allocation27_spill]] %s8540_s2 }
   0x4   :  { %8569 = sst [smem:[#allocation28_spill]] %s8541_s3 }
   0x5   :  { %8570 = sst [smem:[#allocation29_spill]] %s8542_s4 }
   0x6   :  { %8571 = sst [smem:[#allocation30_spill]] %s8543_s5 }
   0x7   :  { %8572 = sst [smem:[#allocation31_spill]] %s8544_s6 }
   0x8   :  { %8573 = sst [smem:[#allocation32_spill]] %s8545_s7 }
   0x9   :  { %8574 = sst [smem:[#allocation33_spill]] %s8546_s8 }
   0xa   :  { %8575 = sst [smem:[#allocation34_spill]] %s8547_s9 }
   0xb   :  { %8576 = sst [smem:[#allocation35_spill]] %s8548_s10 }
   0xc   :  { %8577 = sst [smem:[#allocation36_spill]] %s8549_s11 }
   0xd   :  { %8578 = sst [smem:[#allocation37_spill]] %s8551_s13 }
   0xe   :  { %8579 = sst [smem:[#allocation38_spill]] %s8553_s15 }
   0xf   :  { %8580 = sst [smem:[#allocation39_spill]] %s8554_s16 }
  0x10   :  { %8581 = sst [smem:[#allocation40_spill]] %s8555_s17 }
  0x11   :  { %22 = vsyncpa [#allocation3], 0 }
  0x12   :  { %23 = vsyncpa [#allocation6], 0 }
  0x13   :  { %24 = vsyncpa [#allocation4], 0  ;;  %s6682_s24 = smov 0   ;;  %s6684_s25 = smov 0  }
  0x14   :  { %s6686_s26 = smov 0   ;;  %s6688_s27 = smov 0  }
  0x15   :  { %s6690_s28 = smov 0   ;;  %s6692_s29 = smov 0  }
  0x16 LB: > { %8582 = sst [smem:[#allocation21_spill]] %s6561_s26  ;;  %s6711_s0 = sadd.s32 4294967295, %s6573_s29   ;;  %s6573_s29 = sphi %s6692_s29, %s30_s29   ;;  %s6569_s28 = sphi %s6690_s28, %s8624_s28   ;;  %s6565_s27 = sphi %s6688_s27, %s8623_s27   ;;  %s6561_s26 = sphi %s6686_s26, %s8622_s26   ;;  %s6557_s25 = sphi %s6684_s25, %s8626_s25   ;;  %s6553_s24 = sphi %s6682_s24, %s8625_s24  }
  0x17   : > { %8583 = sst [smem:[#allocation22_spill]] %s6569_s28  ;;  %s39_s30 = sadd.s32 1, %s6569_s28 }
  0x18   : > { %p40_p0 = scmp.ge.s32.totalorder %s39_s30, 2  ;;  %s179_s18 = sadd.s32 1, %s6561_s26 }
  0x19   : > { %p186_p1 = scmp.ne.s32.totalorder %s6561_s26, %s6557_s25  ;;  %p187_p2 = scmp.eq.s32.totalorder %s6573_s29, 0 }
  0x1a   : > { %s8628_s30 = smov (%p40_p0, %s39_s30), 0  ;;  %p192_p4 = scmp.ne.s32.totalorder %s6557_s25, %s6553_s24 }
  0x1b   : > { %8584 = sst [smem:[#allocation23_spill]] %s8628_s30  ;;  %p6720_p3 = por %p187_p2, %p186_p1 }
  0x1c   : > { %s176_s1 = ssub.s32 %s6569_s28, %s8628_s30  ;;  %p193_p5 = scmp.eq.s32.totalorder %s6711_s0, 0 }
  0x1d   : > { %p177_p6 = scmp.eq.s32.totalorder %s176_s1, 0  ;;  %p5582_p7 = scmp.ge.s32.totalorder %s6573_s29, 1 }
  0x1e   : > { %p6731_p8 = por %p193_p5, %p192_p4  ;;  %p510_p9 = scmp.lt.s32.totalorder %s6573_s29, 3 }
  0x1f   : > { %s6737_s21 = scalar_select %p177_p6, %s6561_s26, %s179_s18  }
  0x20   : > { %p6739_p10 = pnand %p5582_p7, %p510_p9  ;;  %s8589_s30 = sld [smem:[#allocation25_spill]] }
  0x21   : > { %8587 = sst [smem:[#allocation24_spill]] %s6737_s21  ;;  %s6575_s17 = smov [#allocation2]  }
  0x22   : > { %p5832_p11 = pneg %p6739_p10  ;;  %s526_s16 = sshll.u32 %s6575_s17, 4  ;;  %s527_s16 = int_to_ptr.vmem [resolvable:$true] %s526_s16 }
  0x23   : > { %p5869_p13 = scmp.lt.s32.totalorder %s6573_s29, 2  ;;  %s8560_s21 = smov 128  }
  0x24   : > { %p6750_p12 = pnand %p5832_p11, %p193_p5  ;;  %s8562_s3 = smov 8  }
  0x25   : > { %p6763_p0 = pnand %p5869_p13, %p6720_p3  ;;  %s588_s24 = sand.u32 1, %s6573_s29  }
  0x26   : > { %s524_s1 = sshll.u32 %s8589_s30, 4  ;;  %s590_s30 = sand.u32 1, %s6561_s26   ;;  %s525_s1 = int_to_ptr.hbm [resolvable:$true] %s524_s1 }
  0x27   : > { %5835 = dma.hbm_to_vmem [thread:$0]  (!%p6750_p12), %s525_s1, 256, %s527_s16, [#allocation3], %s8560_s21, %s8560_s21, %s8562_s3  }
  0x28   : > { %s6767_s17 = sshll.u32 %s590_s30, 4  ;;  %s6771_s15 = sshll.u32 %s6569_s28, 4 }
  0x29   : > { %s8592_s5 = sld [smem:[#allocation30_spill]]  ;;  %s592_s19 = scalar_lea.vmem [#allocation7], %s6767_s17 }
  0x2a   : > { %s600_s1 = sshll.u32 %s592_s19, 4  ;;  %s6778_s30 = scalar_lea.sflag [#allocation3], %s588_s24  ;;  %s601_s1 = int_to_ptr.vmem [resolvable:$true] %s600_s1 }
  0x2b   : > { %s6578_s3 = smov 64   ;;  %s6579_s28 = smov 4  }
  0x2c   : > { %s8593_s6 = sld [smem:[#allocation31_spill]]  ;;  %s614_s19 = scalar_lea.vmem [#allocation8], %s6767_s17 }
  0x2d   : > { %s622_s24 = sshll.u32 %s614_s19, 4  ;;  %s8594_s7 = sld [smem:[#allocation32_spill]]  ;;  %s623_s24 = int_to_ptr.vmem [resolvable:$true] %s622_s24 }
  0x2e   : > { %s636_s4 = scalar_lea.vmem [#allocation9], %s6767_s17  ;;  %s8595_s8 = sld [smem:[#allocation33_spill]] }
  0x2f   : > { %s597_s16 = scalar_lea.hbm %s8592_s5, %s6771_s15  ;;  %s644_s13 = sshll.u32 %s636_s4, 4  ;;  %s645_s13 = int_to_ptr.vmem [resolvable:$true] %s644_s13 }
  0x30   : > { %s598_s21 = sshll.u32 %s597_s16, 4  ;;  %s658_s19 = scalar_lea.vmem [#allocation10], %s6767_s17  ;;  %s599_s21 = int_to_ptr.hbm [resolvable:$true] %s598_s21 }
  0x31   : > { %5842 = dma.hbm_to_vmem [thread:$0]  (!%p6763_p0), %s599_s21, 256, %s601_s1, %s6778_s30, %s6578_s3, %s6578_s3, %s6579_s28  }
  0x32   : > { %s619_s16 = scalar_lea.hbm %s8593_s6, %s6771_s15  ;;  %s8596_s9 = sld [smem:[#allocation34_spill]] }
  0x33   : > { %s620_s5 = sshll.u32 %s619_s16, 4  ;;  %s641_s1 = scalar_lea.hbm %s8594_s7, %s6771_s15  ;;  %s621_s5 = int_to_ptr.hbm [resolvable:$true] %s620_s5 }
  0x34   : > { %5845 = dma.hbm_to_vmem [thread:$0]  (!%p6763_p0), %s621_s5, 256, %s623_s24, %s6778_s30, %s6578_s3, %s6578_s3, %s6579_s28  }
  0x35   : > { %s642_s6 = sshll.u32 %s641_s1, 4  ;;  %s663_s26 = scalar_lea.hbm %s8595_s8, %s6771_s15  ;;  %s643_s6 = int_to_ptr.hbm [resolvable:$true] %s642_s6 }
  0x36   : > { %5848 = dma.hbm_to_vmem [thread:$0]  (!%p6763_p0), %s643_s6, 256, %s645_s13, %s6778_s30, %s6578_s3, %s6578_s3, %s6579_s28  }
  0x37   : > { %s666_s24 = sshll.u32 %s658_s19, 4  ;;  %s664_s21 = sshll.u32 %s663_s26, 4  ;;  %s667_s24 = int_to_ptr.vmem [resolvable:$true] %s666_s24  ;;  %s665_s21 = int_to_ptr.hbm [resolvable:$true] %s664_s21 }
  0x38   : > { %5851 = dma.hbm_to_vmem [thread:$0]  (!%p6763_p0), %s665_s21, 256, %s667_s24, %s6778_s30, %s6578_s3, %s6578_s3, %s6579_s28  }
  0x39   : > { %s685_s4 = scalar_lea.hbm %s8596_s9, %s6771_s15  ;;  %s680_s13 = scalar_lea.vmem [#allocation11], %s6767_s17 }
  0x3a   : > { %s688_s16 = sshll.u32 %s680_s13, 4  ;;  %s686_s5 = sshll.u32 %s685_s4, 4  ;;  %s689_s16 = int_to_ptr.vmem [resolvable:$true] %s688_s16  ;;  %s687_s5 = int_to_ptr.hbm [resolvable:$true] %s686_s5 }
  0x3b   : > { %5854 = dma.hbm_to_vmem [thread:$0]  (!%p6763_p0), %s687_s5, 256, %s689_s16, %s6778_s30, %s6578_s3, %s6578_s3, %s6579_s28  }
  0x3c   : > { %s8597_s10 = sld [smem:[#allocation35_spill]]  ;;  %s702_s21 = scalar_lea.vmem [#allocation12], %s6767_s17 }
  0x3d   : > { %s710_s1 = sshll.u32 %s702_s21, 4  ;;  %s8598_s11 = sld [smem:[#allocation36_spill]]  ;;  %s711_s1 = int_to_ptr.vmem [resolvable:$true] %s710_s1 }
  0x3e   : > { %s724_s5 = scalar_lea.vmem [#allocation13], %s6767_s17  ;;  %s8599_s2 = sld [smem:[#allocation27_spill]] }
  0x3f   : > { %s732_s26 = sshll.u32 %s724_s5, 4  ;;  %s8601_s8 = smov 128   ;;  %s733_s26 = int_to_ptr.vmem [resolvable:$true] %s732_s26 }
  0x40   : > { %s776_s5 = scalar_lea.vmem [#allocation15], %s6767_s17 }
  0x42   : > { %s707_s24 = scalar_lea.hbm %s8597_s10, %s6771_s15 }
  0x43   : > { %s708_s6 = sshll.u32 %s707_s24, 4  ;;  %s729_s16 = scalar_lea.hbm %s8598_s11, %s6771_s15  ;;  %s709_s6 = int_to_ptr.hbm [resolvable:$true] %s708_s6 }
  0x44   : > { %5857 = dma.hbm_to_vmem [thread:$0]  (!%p6763_p0), %s709_s6, 256, %s711_s1, %s6778_s30, %s6578_s3, %s6578_s3, %s6579_s28  }
  0x45   : > { %s730_s19 = sshll.u32 %s729_s16, 4  ;;  %s751_s1 = scalar_lea.hbm %s8550_s12, %s6771_s15  ;;  %s731_s19 = int_to_ptr.hbm [resolvable:$true] %s730_s19 }
  0x46   : > { %5860 = dma.hbm_to_vmem [thread:$0]  (!%p6763_p0), %s731_s19, 256, %s733_s26, %s6778_s30, %s6578_s3, %s6578_s3, %s6579_s28  }
  0x47   : > { %s746_s6 = scalar_lea.vmem [#allocation14], %s6767_s17  ;;  %s752_s13 = sshll.u32 %s751_s1, 4  ;;  %s753_s13 = int_to_ptr.hbm [resolvable:$true] %s752_s13 }
  0x48   : > { %s754_s4 = sshll.u32 %s746_s6, 4  ;;  %s551_s7 = sshll.u32 %s8599_s2, 4  ;;  %s755_s4 = int_to_ptr.vmem [resolvable:$true] %s754_s4  ;;  %s552_s7 = int_to_ptr.hbm [resolvable:$true] %s551_s7 }
  0x49   : > { %5863 = dma.hbm_to_vmem [thread:$0]  (!%p6763_p0), %s753_s13, 256, %s755_s4, %s6778_s30, %s6578_s3, %s6578_s3, %s6579_s28  }
  0x4a   : > { %s6580_s26 = smov [#allocation5]   ;;  %s781_s1 = scalar_lea.hbm %s8552_s14, %s6771_s15 }
  0x4b   : > { %s553_s19 = sshll.u32 %s6580_s26, 4  ;;  %s8600_s6 = smov 8   ;;  %s554_s19 = int_to_ptr.vmem [resolvable:$true] %s553_s19 }
  0x4c   : > { %5838 = dma.hbm_to_vmem [thread:$0]  (!%p6750_p12), %s552_s7, 256, %s554_s19, [#allocation6], %s8601_s8, %s8601_s8, %s8600_s6  }
  0x4d   : > { %s782_s16 = sshll.u32 %s781_s1, 4  ;;  %s784_s2 = sshll.u32 %s776_s5, 4  ;;  %s783_s16 = int_to_ptr.hbm [resolvable:$true] %s782_s16  ;;  %s785_s2 = int_to_ptr.vmem [resolvable:$true] %s784_s2 }
  0x4e   : > { %5866 = dma.hbm_to_vmem [thread:$0]  (!%p6763_p0), %s783_s16, 256, %s785_s2, %s6778_s30, %s8601_s8, %s8601_s8, %s8600_s6  }
  0x4f   : > { %802 = sbr.rel (%p6739_p10) target bundleno = 3839 (0xeff), region = 88 }
  0x54   : > { %6536 = dma.done.wait (%p193_p5), [#allocation3], 256  }
  0x55   : > { %6538 = vsyncadd (%p193_p5), [#allocation3], 4294967040 }
  0x56   : > { %6540 = dma.done.wait (%p193_p5), [#allocation6], 256  }
  0x57   : > { %6542 = vsyncadd (%p193_p5), [#allocation6], 4294967040  ;;  %s814_s3 = sand.u32 1, %s6711_s0   ;;  %s816_s2 = sand.u32 1, %s6557_s25  }
  0x58   : > { %s6894_s7 = sshll.u32 %s816_s2, 4  ;;  %s815_s8 = scalar_lea.sflag [#allocation3], %s814_s3 }
  0x59   : > { %s818_s15 = scalar_lea.vmem [#allocation7], %s6894_s7 }
  0x5a   : > { %6544 = dma.done.wait (%p6731_p8), %s815_s8, 2304  }
  0x5b   : > { %6546 = vsyncadd (%p6731_p8), %s815_s8, 4294964992  ;;  %p1026_p1 = scmp.lt.s32.totalorder %s6565_s27, 1  ;;  %s8602_s17 = sld [smem:[#allocation29_spill]] }
  0x5c   : > { %s8603_s26 = sld [smem:[#allocation37_spill]]  ;;  %s828_s16 = scalar_lea.vmem [#allocation8], %s6894_s7 }
  0x5d   : > { %s6903_s28 = scalar_select %p1026_p1, %s6565_s27, 1 }
  0x5e   : > { %s8604_s1 = sld [smem:[#allocation38_spill]]  ;;  %s838_s5 = scalar_lea.vmem [#allocation9], %s6894_s7 }
  0x5f   : > { %s5778_s22 = sshll.u32 %s6903_s28, 4  ;;  %s5779_s18 = sshll.u32 %s6903_s28, 5 }
  0x60   : > { %s848_s3 = scalar_lea.vmem [#allocation10], %s6894_s7  ;;  %s858_s2 = scalar_lea.vmem [#allocation11], %s6894_s7 }
  0x61   : > { %s1030_s30 = scalar_lea.vmem %s8602_s17, %s5778_s22  ;;  %s868_s8 = scalar_lea.vmem [#allocation12], %s6894_s7 }
  0x62   : > { %s6913_s19 = scalar_lea.vmem %s8603_s26, %s5779_s18  ;;  %s878_s9 = scalar_lea.vmem [#allocation13], %s6894_s7 }
  0x63   : > { %s888_s10 = scalar_lea.vmem [#allocation14], %s6894_s7  ;;  %s6927_s11 = scalar_lea.vmem [#allocation15], %s6894_s7 }
  0x64   : > { %s1038_s6 = scalar_lea.vmem %s8604_s1, %s6903_s28  ;;  %p5631_p2 = scmp.ne.s32.totalorder %s6565_s27, 0 }
  0x66   : > { %1044 = sbr.rel (%p5631_p2) target bundleno = 110 (0x6e), region = 136 }
  0x6b   : > { %v1045_v0 = vld [vmem:[#allocation2] sm:$0xff]  ;;  %vm1047_vm0 = vcmask 261120   ;;  %v1046_v1 = vld [vmem:[#allocation2 + $0x8] sm:$0xff] }
  0x6c   : > { %1048 = vst.msk [vmem:[#allocation16] sm:$0xff] %vm1047_vm0, %v1045_v0 }
  0x6d   : > { %1049 = vst.msk [vmem:[#allocation16 + $0x8] sm:$0xff] %vm1047_vm0, %v1046_v1 }
  0x6e PF: > { %v5781_v2 = vld [vmem:[%s1030_s30 + $0x8] sm:$0xff]  ;;  %v5780_v4 = vld [vmem:[%s1030_s30] sm:$0xff]  ;;  %v1060_v8 = vld [vmem:[#allocation5] sm:$0xff]  ;;  %vm1083_vm1 = vcmask 261120   ;;  %s6582_s22 = smov 120   ;;  %s6583_s18 = smov 112  }
  0x6f   : > { %v5783_v3 = vld [vmem:[%s818_s15 + $0x8] sm:$0xff]  ;;  %v5782_v5 = vld [vmem:[%s818_s15] sm:$0xff]  ;;  %1093 = vmatpush.bf16.msra.mxu0 %v5781_v2  ;;  %s6581_s15 = smov 104   ;;  %v6584_v28 = vmov 1983009808   ;;  %vm1180_vm2 = vcmask 1047556  }
  0x70   : > { %1125 = vmatpush.bf16.msra.mxu1 %v5783_v3  ;;  %v1061_v9 = vld [vmem:[#allocation5 + $0x8] sm:$0xff]  ;;  %v6049_v13 = vld [vmem:[%s6927_s11] ss:$0 sm:$0xff]  ;;  %v6050_v14 = vld [vmem:[%s6927_s11 + $0x1] ss:$0 sm:$0xff]  ;;  %v1185_v29 = vunpack.c.l.s4 %v6584_v28  ;;  %vm1914_vm3 = vcmask 64512  }
  0x71   : > { %v5785_v25 = vld [vmem:[%s828_s16 + $0x8] sm:$0xff]  ;;  %v5784_v26 = vld [vmem:[%s828_s16] sm:$0xff]  ;;  %v6585_v38 = vmov 1934713408   ;;  %vm2270_vm4 = vcmask 1043456   ;;  %s6586_s20 = smov 24  }
  0x72   : > { %1161 = vmatpush.bf16.msra.mxu2 %v5785_v25  ;;  %v6972_v34 = vunpack.c.0.s8 %v1185_v29  ;;  %v1209_v39 = vunpack.c.l.s4 %v6585_v38  ;;  %s6587_s23 = smov 16   ;;  %s6588_s17 = smov 8  }
  0x73   : > { %v1050_v6 = vld [vmem:[#allocation16] sm:$0xff]  ;;  %1094 = vmatpush.bf16.msra.mxu0 %v5780_v4  ;;  %s8605_s13 = sld [smem:[#allocation28_spill]]  ;;  %p5764_p3 = scmp.ne.s32.totalorder %s6565_s27, 1 }
  0x74   : > { %v1051_v7 = vld [vmem:[#allocation16 + $0x8] sm:$0xff]  ;;  %v1062_v10 = vadd.f32 %v1060_v8, %v1050_v6  ;;  %1126 = vmatpush.bf16.msra.mxu1 %v5782_v5  ;;  %v6984_v51 = vunpack.c.0.s8 %v1209_v39  ;;  %s8606_s30 = sld [smem:[#allocation26_spill]] }
  0x75   : > { %v1063_v11 = vadd.f32 %v1061_v9, %v1051_v7  ;;  %v1137_v31 = vpack.c.bf16 %v1051_v7, %v1050_v6  ;;  %s8618_s28 = sld [smem:[#allocation39_spill]] (!%p5764_p3) }
  0x76   : > { %1162 = vmatpush.bf16.msra.mxu2 %v5784_v26 }
  0x77   : > { %v1068_v12 = vpack.c.bf16 %v1063_v11, %v1062_v10 }
  0x79   : > { %5640 = vmatmul.msk.bf16.vlgmr.msra.gmra.mxu0 %vm1083_vm1, %v1068_v12  ;;  %5649 = vmatmul.msk.bf16.vlgmr.msra.gmra.mxu1 %vm1083_vm1, %v1068_v12 }
  0x7a   : > { %5658 = vmatmul.msk.bf16.vlgmr.msra.gmra.mxu2 %vm1083_vm1, %v1137_v31 }
  0xf6   : > { %v1096_v15 = vpop.f32.mrf.mxu0  ;;  %v1128_v16 = vpop.f32.mrf.mxu1 }
  0xf7   : > { %v6934_v17 = vadd.f32 %v6049_v13, %v1096_v15  ;;  %v6936_v18 = vadd.f32 %v6050_v14, %v1128_v16 }
  0xf9   : > { %1425 = vrot.lane.b32.xlu1 %v6936_v18, %s6581_s15  ;;  %1176 = vrot.lane.b32.xlu2 %v6934_v17, %s6581_s15  ;;  %v5939_v19 = vpack.i.bf16 %v6934_v17, %v6936_v18  ;;  %v1182_v44 = vrot.slane %v6934_v17, 4  ;;  %v1430_v49 = vrot.slane %v6936_v18, 4 }
  0xfb   : > { %5940 = vrot.lane.b32.xlu0 %v5939_v19, %s6582_s22 }
  0xfe   : > { %v1130_v20 = vpop.f32.mrf.mxu1  ;;  %v1098_v22 = vpop.f32.mrf.mxu0 }
  0xff   : > { %v6945_v21 = vadd.f32 %v6050_v14, %v1130_v20  ;;  %v6953_v23 = vadd.f32 %v6049_v13, %v1098_v22 }
 0x101   : > { %1539 = vrot.lane.b32.xlu2 %v6945_v21, %s6582_s22  ;;  %1173 = vrot.lane.b32.xlu1 %v6934_v17, %s6583_s18  ;;  %v1550_v53 = vrot.slane %v6945_v21, 4  ;;  %v1302_v54 = vrot.slane %v6953_v23, 4 }
 0x103   : > { %1422 = vrot.lane.b32.xlu0 %v6936_v18, %s6583_s18 }
 0x109   : > { %1291 = vrot.lane.b32.xlu2 %v6953_v23, %s6582_s22  ;;  %1545 = vrot.lane.b32.xlu1 %v6945_v21, %s6581_s15 }
 0x10b   : > { %1542 = vrot.lane.b32.xlu0 %v6945_v21, %s6583_s18 }
 0x111   : > { %1297 = vrot.lane.b32.xlu1 %v6953_v23, %s6581_s15 }
 0x113   : > { %1294 = vrot.lane.b32.xlu0 %v6953_v23, %s6583_s18 }
 0x153   : > { %v1177_v24 = vpop.permute.xlu2 %1176 }
 0x154   : > { %v1192_v33 = vrot.slane %v1177_v24, 4 }
 0x15b   : > { %v6969_v27 = vpop.permute.xlu2 %1539 }
 0x15c   : > { %v1562_v59 = vrot.slane %v6969_v27, 4 }
 0x163   : > { %v6977_v45 = vpop.permute.xlu2 %1291 }
 0x164   : > { %v1314_v60 = vrot.slane %v6977_v45, 4 }
 0x16b   : > { %v1426_v30 = vpop.permute.xlu1 %1425 }
 0x16c   : > { %v1440_v37 = vrot.slane %v1426_v30, 4 }
 0x16d   : > { %v5941_v32 = vpop.permute.xlu0 %5940 }
 0x16e   : > { %v5943_v35 = vunpack.i.h.bf16 %v5941_v32  ;;  %v5942_v36 = vunpack.i.l.bf16 %v5941_v32 }
 0x170   : > { %v1193_v40 = vsel %vm1180_vm2, %v1192_v33, %v5943_v35  ;;  %v1194_v41 = vrot.slane %v5943_v35, 4  ;;  %v1442_v42 = vrot.slane %v5942_v36, 4  ;;  %v1441_v43 = vsel %vm1180_vm2, %v1440_v37, %v5942_v36 }
 0x171   : > { %v1199_v47 = vperm.slane %v1193_v40, %v6972_v34  ;;  %v1447_v55 = vperm.slane %v1441_v43, %v6972_v34 }
 0x172   : > { %v1195_v46 = vsel %vm1180_vm2, %v1177_v24, %v1194_v41  ;;  %v1443_v48 = vsel %vm1180_vm2, %v1426_v30, %v1442_v42 }
 0x173   : > { %v1203_v50 = vperm.slane %v1195_v46, %v6972_v34  ;;  %v1174_v52 = vpop.permute.xlu1 %1173  ;;  %v1451_v56 = vperm.slane %v1443_v48, %v6972_v34  ;;  %v1204_v0 = vrot.slane %v1199_v47, 4  ;;  %v1452_v8 = vrot.slane %v1447_v55, 4 }
 0x174   : > { %v1179_v57 = vrot.slane %v1174_v52, 4  ;;  %v1183_v58 = vsel %vm1180_vm2, %v1174_v52, %v1182_v44 }
 0x175   : > { %v1216_v61 = vrot.slane %v1203_v50, 4  ;;  %v1191_v62 = vperm.slane %v1183_v58, %v6972_v34  ;;  %v1423_v63 = vpop.permute.xlu0 %1422  ;;  %v1464_v9 = vrot.slane %v1451_v56, 4 }
 0x176   : > { %v1181_v1 = vsel %vm1180_vm2, %v1179_v57, %v6934_v17  ;;  %v1428_v2 = vrot.slane %v1423_v63, 4  ;;  %v1431_v3 = vsel %vm1180_vm2, %v1423_v63, %v1430_v49 }
 0x177   : > { %v1187_v4 = vperm.slane %v1181_v1, %v6972_v34  ;;  %v1217_v5 = vsel %vm1180_vm2, %v1216_v61, %v1191_v62  ;;  %v1218_v6 = vrot.slane %v1191_v62, 4  ;;  %v1439_v7 = vperm.slane %v1431_v3, %v6972_v34 }
 0x178   : > { %v1223_v10 = vperm.slane %v1217_v5, %v6984_v51  ;;  %v1429_v11 = vsel %vm1180_vm2, %v1428_v2, %v6936_v18 }
 0x179   : > { %v1205_v12 = vsel %vm1180_vm2, %v1204_v0, %v1187_v4  ;;  %v1206_v13 = vrot.slane %v1187_v4, 4  ;;  %v1219_v14 = vsel %vm1180_vm2, %v1203_v50, %v1218_v6  ;;  %v1435_v15 = vperm.slane %v1429_v11, %v6972_v34 }
 0x17a   : > { %v1211_v16 = vperm.slane %v1205_v12, %v6984_v51  ;;  %v1227_v17 = vperm.slane %v1219_v14, %v6984_v51  ;;  %v1232_v19 = vrot.slane %v1223_v10, 4  ;;  %v1465_v20 = vsel %vm1180_vm2, %v1464_v9, %v1439_v7 }
 0x17b   : > { %v1207_v22 = vsel %vm1180_vm2, %v1199_v47, %v1206_v13  ;;  %v1453_v24 = vsel %vm1180_vm2, %v1452_v8, %v1435_v15  ;;  %v1454_v25 = vrot.slane %v1435_v15, 4  ;;  %v1466_v18 = vrot.slane %v1439_v7, 4  ;;  %v1546_v26 = vpop.permute.xlu1 %1545 }
 0x17c   : > { %v1215_v28 = vperm.slane %v1207_v22, %v6984_v51  ;;  %v1228_v29 = vrot.slane %v1211_v16, 4  ;;  %v1233_v30 = vsel %vm1180_vm2, 0.0, %v1232_v19  ;;  %v1234_v31 = vrot.slane %v1227_v17, 4 }
 0x17d   : > { %v1455_v32 = vsel %vm1180_vm2, %v1447_v55, %v1454_v25  ;;  %v7015_v33 = vperm.slane %v1453_v24, %v6984_v51  ;;  %v1467_v35 = vsel %vm1180_vm2, %v1451_v56, %v1466_v18  ;;  %v1471_v36 = vperm.slane %v1465_v20, %v6984_v51  ;;  %v1543_v37 = vpop.permute.xlu0 %1542 }
 0x17e   : > { %v7020_v38 = vsel %vm1180_vm2, 0.0, %v1228_v29  ;;  %v1230_v39 = vrot.slane %v1215_v28, 4  ;;  %v1235_v40 = vsel %vm1180_vm2, 0.0, %v1234_v31  ;;  %v1247_v41 = vsel %vm1180_vm2, %v1234_v31, %v1223_v10 }
 0x17f   : > { %v7025_v42 = vperm.slane %v1247_v41, %v6972_v34  ;;  %v1252_v43 = vrot.slane %v1235_v40, 4  ;;  %v1463_v44 = vperm.slane %v1455_v32, %v6984_v51  ;;  %v1475_v46 = vperm.slane %v1467_v35, %v6984_v51 }
 0x180   : > { %v7030_v47 = vsel %vm1180_vm2, 0.0, %v1230_v39  ;;  %v1236_v48 = vsel %vm1180_vm2, %v1230_v39, %v1211_v16  ;;  %v1476_v49 = vrot.slane %v7015_v33, 4  ;;  %v1480_v50 = vrot.slane %v1471_v36, 4 }
 0x181   : > { %v7035_v52 = vperm.slane %v1236_v48, %v6972_v34  ;;  %v1241_v55 = vrot.slane %v7030_v47, 4  ;;  %v1253_v56 = vsel %vm1180_vm2, %v1252_v43, %v1233_v30  ;;  %v1272_v57 = vrot.slane %v7025_v42, 4 }
 0x182   : > { %v7041_v58 = vperm.slane %v1253_v56, %v6972_v34  ;;  %v1478_v61 = vrot.slane %v1463_v44, 4  ;;  %v1481_v62 = vsel %vm1180_vm2, 0.0, %v1480_v50  ;;  %v1482_v63 = vrot.slane %v1475_v46, 4 }
 0x183   : > { %v1560_v0 = vrot.slane %v1546_v26, 4  ;;  %v1563_v1 = vsel %vm1180_vm2, %v1546_v26, %v1562_v59  ;;  %v1548_v2 = vrot.slane %v1543_v37, 4  ;;  %v1551_v3 = vsel %vm1180_vm2, %v1543_v37, %v1550_v53  ;;  %v1298_v8 = vpop.permute.xlu1 %1297 }
 0x184   : > { %v7049_v4 = vsel %vm1180_vm2, 0.0, %v1478_v61  ;;  %v1483_v5 = vsel %vm1180_vm2, 0.0, %v1482_v63  ;;  %v1495_v6 = vsel %vm1180_vm2, %v1482_v63, %v1471_v36  ;;  %v1571_v7 = vperm.slane %v1563_v1, %v6972_v34 }
 0x185   : > { %v1489_v9 = vrot.slane %v7049_v4, 4  ;;  %v7056_v10 = vperm.slane %v1495_v6, %v6972_v34  ;;  %v1500_v59 = vrot.slane %v1483_v5, 4  ;;  %v1561_v11 = vsel %vm1180_vm2, %v1560_v0, %v6969_v27  ;;  %v1295_v15 = vpop.permute.xlu0 %1294 }
 0x186   : > { %v1567_v53 = vperm.slane %v1561_v11, %v6972_v34  ;;  %v1584_v12 = vrot.slane %v1571_v7, 4  ;;  %v1549_v13 = vsel %vm1180_vm2, %v1548_v2, %v6945_v21  ;;  %v1559_v14 = vperm.slane %v1551_v3, %v6972_v34 }
 0x187   : > { %v1501_v16 = vsel %vm1180_vm2, %v1500_v59, %v1481_v62  ;;  %v1555_v17 = vperm.slane %v1549_v13, %v6972_v34  ;;  %v1312_v19 = vrot.slane %v1298_v8, 4  ;;  %v1315_v20 = vsel %vm1180_vm2, %v1298_v8, %v1314_v60 }
 0x188   : > { %v1572_v22 = vrot.slane %v1567_v53, 4  ;;  %v1585_v27 = vsel %vm1180_vm2, %v1584_v12, %v1559_v14  ;;  %v1586_v24 = vrot.slane %v1559_v14, 4  ;;  %v1323_v25 = vperm.slane %v1315_v20, %v6972_v34 }
 0x189   : > { %v1574_v18 = vrot.slane %v1555_v17, 4  ;;  %v1591_v21 = vperm.slane %v1585_v27, %v6984_v51  ;;  %v1313_v26 = vsel %vm1180_vm2, %v1312_v19, %v6977_v45  ;;  %v1300_v28 = vrot.slane %v1295_v15, 4 }
 0x18a   : > { %v1573_v29 = vsel %vm1180_vm2, %v1572_v22, %v1555_v17  ;;  %v1587_v30 = vsel %vm1180_vm2, %v1571_v7, %v1586_v24  ;;  %v1319_v31 = vperm.slane %v1313_v26, %v6972_v34  ;;  %v1336_v60 = vrot.slane %v1323_v25, 4 }
 0x18b   : > { %v1575_v32 = vsel %vm1180_vm2, %v1567_v53, %v1574_v18  ;;  %v1579_v35 = vperm.slane %v1573_v29, %v6984_v51  ;;  %v1595_v36 = vperm.slane %v1587_v30, %v6984_v51  ;;  %v1600_v37 = vrot.slane %v1591_v21, 4 }
 0x18c   : > { %v1583_v39 = vperm.slane %v1575_v32, %v6984_v51  ;;  %v1324_v40 = vrot.slane %v1319_v31, 4  ;;  %v1301_v45 = vsel %vm1180_vm2, %v1300_v28, %v6953_v23  ;;  %v1303_v41 = vsel %vm1180_vm2, %v1295_v15, %v1302_v54 }
 0x18d   : > { %v1596_v43 = vrot.slane %v1579_v35, 4  ;;  %v1601_v44 = vsel %vm1180_vm2, 0.0, %v1600_v37  ;;  %v1602_v46 = vrot.slane %v1595_v36, 4  ;;  %v1307_v48 = vperm.slane %v1301_v45, %v6972_v34 }
 0x18e   : > { %v1598_v50 = vrot.slane %v1583_v39, 4  ;;  %v1311_v56 = vperm.slane %v1303_v41, %v6972_v34  ;;  %v1477_v62 = vsel %vm1180_vm2, 0.0, %v1476_v49  ;;  %v1484_v63 = vsel %vm1180_vm2, %v1478_v61, %v7015_v33 }
 0x18f   : > { %v7093_v0 = vsel %vm1180_vm2, 0.0, %v1596_v43  ;;  %v1603_v23 = vsel %vm1180_vm2, 0.0, %v1602_v46  ;;  %v1615_v54 = vsel %vm1180_vm2, %v1602_v46, %v1591_v21  ;;  %v1325_v1 = vsel %vm1180_vm2, %v1324_v40, %v1307_v48 }
 0x190   : > { %v7099_v2 = vsel %vm1180_vm2, 0.0, %v1598_v50  ;;  %v7102_v3 = vsel %vm1180_vm2, %v1598_v50, %v1579_v35  ;;  %v7105_v49 = vperm.slane %v1615_v54, %v6972_v34  ;;  %v1620_v5 = vrot.slane %v1603_v23, 4 }
 0x191   : > { %v1609_v33 = vrot.slane %v7099_v2, 4  ;;  %v1326_v61 = vrot.slane %v1307_v48, 4  ;;  %v1331_v6 = vperm.slane %v1325_v1, %v6984_v51  ;;  %v1337_v7 = vsel %vm1180_vm2, %v1336_v60, %v1311_v56 }
 0x192   : > { %v1621_v8 = vsel %vm1180_vm2, %v1620_v5, %v1601_v44  ;;  %v1640_v59 = vrot.slane %v7105_v49, 4  ;;  %v1338_v11 = vrot.slane %v1311_v56, 4  ;;  %v1343_v53 = vperm.slane %v1337_v7, %v6984_v51 }
 0x193   : > { %v7114_v12 = vperm.slane %v1621_v8, %v6972_v34  ;;  %v1327_v13 = vsel %vm1180_vm2, %v1319_v31, %v1326_v61  ;;  %v1348_v14 = vrot.slane %v1331_v6, 4  ;;  %v1488_v15 = vperm.slane %v1484_v63, %v6972_v34 }
 0x194   : > { %v1335_v17 = vperm.slane %v1327_v13, %v6984_v51  ;;  %v1339_v19 = vsel %vm1180_vm2, %v1323_v25, %v1338_v11  ;;  %v1352_v20 = vrot.slane %v1343_v53, 4  ;;  %v1490_v22 = vsel %vm1180_vm2, %v1489_v9, %v1477_v62 }
 0x195   : > { %v1347_v27 = vperm.slane %v1339_v19, %v6984_v51  ;;  %v1349_v24 = vsel %vm1180_vm2, 0.0, %v1348_v14  ;;  %v1494_v18 = vperm.slane %v1490_v22, %v6972_v34  ;;  %v1505_v21 = vperm.slane %v1501_v16, %v6972_v34 }
 0x196   : > { %v1350_v26 = vrot.slane %v1335_v17, 4  ;;  %v1353_v28 = vsel %vm1180_vm2, 0.0, %v1352_v20  ;;  %v1508_v29 = vrot.slane %v1488_v15, 4  ;;  %v1520_v30 = vrot.slane %v7056_v10, 4 }
 0x197   : > { %v1354_v25 = vrot.slane %v1347_v27, 4  ;;  %v1506_v31 = vrot.slane %v1494_v18, 4  ;;  %v1518_v4 = vrot.slane %v1505_v21, 4  ;;  %v1260_v7 = vrot.slane %v7035_v52, 4 }
 0x198   : > { %v1351_v9 = vsel %vm1180_vm2, 0.0, %v1350_v26  ;;  %v1356_v60 = vsel %vm1180_vm2, %v1350_v26, %v1331_v6  ;;  %v1509_v32 = vsel %vm1180_vm2, %v1494_v18, %v1508_v29  ;;  %v1521_v35 = vsel %vm1180_vm2, %v1505_v21, %v1520_v30 }
 0x199   : > { %v1355_v16 = vsel %vm1180_vm2, 0.0, %v1354_v25  ;;  %v7135_v36 = vperm.slane %v1356_v60, %v6972_v34  ;;  %v1361_v37 = vrot.slane %v1351_v9, 4  ;;  %v1367_v39 = vsel %vm1180_vm2, %v1354_v25, %v1343_v53 }
 0x19a   : > { %v7139_v40 = vperm.slane %v1367_v39, %v6972_v34  ;;  %v1372_v45 = vrot.slane %v1355_v16, 4  ;;  %v1517_v41 = vperm.slane %v1509_v32, %v6984_v51  ;;  %v1529_v43 = vperm.slane %v1521_v35, %v6984_v51 }
 0x19b   : > { %v1362_v44 = vsel %vm1180_vm2, %v1361_v37, %v1349_v24  ;;  %v1380_v46 = vrot.slane %v7135_v36, 4  ;;  %v1507_v48 = vsel %vm1180_vm2, %v1506_v31, %v1488_v15  ;;  %v1519_v50 = vsel %vm1180_vm2, %v1518_v4, %v7056_v10 }
 0x19c   : > { %v7149_v56 = vperm.slane %v1362_v44, %v6972_v34  ;;  %v1373_v62 = vsel %vm1180_vm2, %v1372_v45, %v1353_v28  ;;  %v1392_v63 = vrot.slane %v7139_v40, 4  ;;  %v1534_v23 = vrot.slane %v1529_v43, 4 }
 0x19d   : > { %v7154_v54 = vperm.slane %v1373_v62, %v6972_v34  ;;  %v1513_v1 = vperm.slane %v1507_v48, %v6984_v51  ;;  %v1525_v5 = vperm.slane %v1519_v50, %v6984_v51  ;;  %v1536_v61 = vrot.slane %v1517_v41, 4 }
 0x19e   : > { %v1535_v6 = vsel %vm1180_vm2, %v1534_v23, %v1517_v41  ;;  %v1242_v10 = vsel %vm1180_vm2, %v1241_v55, %v7020_v38  ;;  %v1273_v8 = vsel %vm1180_vm2, %v7041_v58, %v1272_v57  ;;  %v1608_v20 = vperm.slane %v7102_v3, %v6972_v34 }
 0x19f   : > { %v1390_v11 = vrot.slane %v7154_v54, 4  ;;  %v1660_v53 = vpack.c.bf16 %v1535_v6, %v1535_v6  ;;  %v1530_v13 = vrot.slane %v1525_v5, 4  ;;  %v1537_v14 = vsel %vm1180_vm2, %v1529_v43, %v1536_v61 }
 0x1a0   : > { %v1661_v15 = vpack.c.bf16 %v1537_v14, %v1537_v14  ;;  %v1532_v17 = vrot.slane %v1513_v1, 4  ;;  %v1246_v19 = vperm.slane %v1242_v10, %v6972_v34  ;;  %v1281_v47 = vperm.slane %v1273_v8, %v6984_v51 }
 0x1a1   : > { %v1957_v38 = vsel %vm1914_vm3, %v1660_v53, 0  ;;  %v1531_v55 = vsel %vm1180_vm2, %v1530_v13, %v1513_v1  ;;  %v1610_v57 = vsel %vm1180_vm2, %v1609_v33, %v7093_v0  ;;  %v1628_v2 = vrot.slane %v1608_v20, 4 }
 0x1a2   : > { %1966 = vmatpush.bf16.xpose.msrb.mxu1 %v1957_v38  ;;  %v1658_v22 = vpack.c.bf16 %v1531_v55, %v1531_v55  ;;  %v1976_v27 = vsel %vm1914_vm3, %v1661_v15, 0  ;;  %v1533_v24 = vsel %vm1180_vm2, %v1525_v5, %v1532_v17  ;;  %v1261_v18 = vsel %vm1180_vm2, %v1246_v19, %v1260_v7 }
 0x1a3   : > { %1985 = vmatpush.bf16.xpose.msrb.mxu2 %v1976_v27  ;;  %v1659_v21 = vpack.c.bf16 %v1533_v24, %v1533_v24  ;;  %v1269_v26 = vperm.slane %v1261_v18, %v6984_v51  ;;  %v1286_v28 = vrot.slane %v1281_v47, 4  ;;  %v1614_v3 = vperm.slane %v1610_v57, %v6972_v34 }
 0x1a4   : > { %v1919_v29 = vsel %vm1914_vm3, %v1658_v22, 0  ;;  %v1641_v0 = vsel %vm1180_vm2, %v7114_v12, %v1640_v59  ;;  %v1258_v33 = vrot.slane %v1246_v19, 4  ;;  %v1270_v4 = vrot.slane %v7041_v58, 4 }
 0x1a5   : > { %1928 = vmatpush.bf16.xpose.msra.mxu3 %v1919_v29  ;;  %v1938_v30 = vsel %vm1914_vm3, %v1659_v21, 0  ;;  %v1287_v25 = vsel %vm1180_vm2, %v1286_v28, %v1269_v26  ;;  %v1649_v31 = vperm.slane %v1641_v0, %v6984_v51  ;;  %v1629_v60 = vsel %vm1180_vm2, %v1614_v3, %v1628_v2 }
 0x1a6   : > { %1947 = vmatpush.bf16.xpose.msrb.mxu0 %v1938_v30  ;;  %v1412_v9 = vpack.c.bf16 %v1287_v25, %v1287_v25  ;;  %v1259_v32 = vsel %vm1180_vm2, %v1258_v33, %v7035_v52  ;;  %v1288_v35 = vrot.slane %v1269_v26, 4  ;;  %v1637_v59 = vperm.slane %v1629_v60, %v6984_v51  ;;  %v1164_v25 = vpop.f32.mrf.mxu2 }
 0x1a7   : > { %v1654_v16 = vrot.slane %v1649_v31, 4  ;;  %v1265_v37 = vperm.slane %v1259_v32, %v6984_v51  ;;  %v1271_v39 = vsel %vm1180_vm2, %v1270_v4, %v7025_v42  ;;  %v1626_v41 = vrot.slane %v1614_v3, 4 }
 0x1a8   : > { %v1277_v45 = vperm.slane %v1271_v39, %v6984_v51  ;;  %v1289_v58 = vsel %vm1180_vm2, %v1281_v47, %v1288_v35  ;;  %v1638_v43 = vrot.slane %v7114_v12, 4  ;;  %v1656_v50 = vrot.slane %v1637_v59, 4 }
 0x1a9   : > { %5661 = vmatmul.msk.bf16.vlgmr.msrb.gmra.mxu1 %vm1914_vm3, %v1412_v9  ;;  %v1655_v52 = vsel %vm1180_vm2, %v1654_v16, %v1637_v59  ;;  %v1284_v44 = vrot.slane %v1265_v37, 4  ;;  %v1413_v48 = vpack.c.bf16 %v1289_v58, %v1289_v58  ;;  %v1627_v1 = vsel %vm1180_vm2, %v1626_v41, %v1608_v20 }
 0x1aa   : > { %v1664_v62 = vpack.c.bf16 %v1655_v52, %v1655_v52  ;;  %v1282_v23 = vrot.slane %v1277_v45, 4  ;;  %v1639_v42 = vsel %vm1180_vm2, %v1638_v43, %v7105_v49  ;;  %v1633_v5 = vperm.slane %v1627_v1, %v6984_v51 }
 0x1ab   : > { %5662 = vmatmul.msk.bf16.vlgmr.msrb.gmra.mxu2 %vm1914_vm3, %v1413_v48  ;;  %v1645_v12 = vperm.slane %v1639_v42, %v6984_v51  ;;  %v1657_v61 = vsel %vm1180_vm2, %v1649_v31, %v1656_v50  ;;  %v1285_v6 = vsel %vm1180_vm2, %v1277_v45, %v1284_v44  ;;  %v1381_v15 = vsel %vm1180_vm2, %v7149_v56, %v1380_v46 }
 0x1ac   : > { %v2033_v10 = vsel %vm1914_vm3, %v1664_v62, 0  ;;  %v1283_v7 = vsel %vm1180_vm2, %v1282_v23, %v1265_v37  ;;  %v1665_v8 = vpack.c.bf16 %v1657_v61, %v1657_v61  ;;  %v1411_v53 = vpack.c.bf16 %v1285_v6, %v1285_v6  ;;  %v6051_v61 = vld [vmem:[%s6927_s11 + $0x2] ss:$0 sm:$0xff] }
 0x1ad   : > { %2042 = vmatpush.bf16.xpose.msra.mxu1 %v2033_v10  ;;  %v1410_v13 = vpack.c.bf16 %v1283_v7, %v1283_v7  ;;  %v1650_v14 = vrot.slane %v1645_v12, 4  ;;  %v1652_v49 = vrot.slane %v1633_v5, 4  ;;  %v1389_v19 = vperm.slane %v1381_v15, %v6984_v51 }
 0x1ae   : > { %v2052_v17 = vsel %vm1914_vm3, %v1665_v8, 0  ;;  %5660 = vmatmul.msk.bf16.vlgmr.msrb.gmra.mxu0 %vm1914_vm3, %v1411_v53  ;;  %v1393_v47 = vsel %vm1180_vm2, %v7154_v54, %v1392_v63  ;;  %v1378_v38 = vrot.slane %v7149_v56, 4  ;;  %v1391_v63 = vsel %vm1180_vm2, %v1390_v11, %v7139_v40  ;;  %v1166_v31 = vpop.f32.mrf.mxu2 }
 0x1af   : > { %5659 = vmatmul.msk.bf16.vlgmr.msra.gmra.mxu3 %vm1914_vm3, %v1410_v13  ;;  %v1651_v55 = vsel %vm1180_vm2, %v1650_v14, %v1633_v5  ;;  %2061 = vmatpush.bf16.xpose.msra.mxu2 %v2052_v17  ;;  %v1653_v46 = vsel %vm1180_vm2, %v1645_v12, %v1652_v49  ;;  %v1401_v20 = vperm.slane %v1393_v47, %v6984_v51  ;;  %v1408_v28 = vrot.slane %v1389_v19, 4 }
 0x1b0   : > { %v1662_v57 = vpack.c.bf16 %v1651_v55, %v1651_v55  ;;  %v1663_v22 = vpack.c.bf16 %v1653_v46, %v1653_v46  ;;  %v1379_v27 = vsel %vm1180_vm2, %v1378_v38, %v7135_v36  ;;  %v1397_v26 = vperm.slane %v1391_v63, %v6984_v51 }
 0x1b1   : > { %v1406_v56 = vrot.slane %v1401_v20, 4  ;;  %v1385_v24 = vperm.slane %v1379_v27, %v6984_v51  ;;  %v1409_v54 = vsel %vm1180_vm2, %v1401_v20, %v1408_v28  ;;  %v7262_v10 = vadd.f32 %v6051_v61, %v1164_v25 }
 0x1b2   : > { %v1995_v18 = vsel %vm1914_vm3, %v1662_v57, 0  ;;  %v2014_v21 = vsel %vm1914_vm3, %v1663_v22, 0  ;;  %v1402_v29 = vrot.slane %v1397_v26, 4  ;;  %v1417_v40 = vpack.c.bf16 %v1409_v54, %v1409_v54 }
 0x1b3   : > { %2004 = vmatpush.bf16.xpose.msrb.mxu3 %v1995_v18  ;;  %2023 = vmatpush.bf16.xpose.msra.mxu0 %v2014_v21  ;;  %v1407_v3 = vsel %vm1180_vm2, %v1406_v56, %v1389_v19  ;;  %v1404_v36 = vrot.slane %v1385_v24, 4  ;;  %v7264_v7 = vadd.f32 %v6051_v61, %v1166_v31 }
 0x1b4   : > { %v1416_v2 = vpack.c.bf16 %v1407_v3, %v1407_v3  ;;  %v1403_v0 = vsel %vm1180_vm2, %v1402_v29, %v1385_v24 }
 0x1b5   : > { %v1405_v11 = vsel %vm1180_vm2, %v1397_v26, %v1404_v36  ;;  %v1414_v30 = vpack.c.bf16 %v1403_v0, %v1403_v0  ;;  %v5949_v8 = vpack.i.bf16 %v7264_v7, %v7262_v10 }
 0x1b6   : > { %v1415_v33 = vpack.c.bf16 %v1405_v11, %v1405_v11 }
 0x1b9   : > { %5665 = vmatmul.msk.bf16.vlgmr.msra.gmra.mxu1 %vm1914_vm3, %v1416_v2 }
 0x1bb   : > { %5666 = vmatmul.msk.bf16.vlgmr.msra.gmra.mxu2 %vm1914_vm3, %v1417_v40 }
 0x1be   : > { %5664 = vmatmul.msk.bf16.vlgmr.msra.gmra.mxu0 %vm1914_vm3, %v1415_v33 }
 0x1bf   : > { %5663 = vmatmul.msk.bf16.vlgmr.msrb.gmra.mxu3 %vm1914_vm3, %v1414_v30 }
 0x226   : > { %v1968_v4 = vpop.f32.mrf.mxu1 }
 0x227   : > { %v2073_v9 = vsel %vm1914_vm3, %v1968_v4, -inf }
 0x228   : > { %2074 = vmax.xlane.f32.xlu1 %v2073_v9 }
 0x22b   : > { %v1949_v60 = vpop.f32.mrf.mxu0 }
 0x22c   : > { %v2070_v32 = vsel %vm1914_vm3, %v1949_v60, -inf }
 0x22d   : > { %2071 = vmax.xlane.f32.xlu2 %v2070_v32 }
 0x22e   : > { %v1970_v35 = vpop.f32.mrf.mxu1  ;;  %v1987_v59 = vpop.f32.mrf.mxu2 }
 0x22f   : > { %v2076_v16 = vsel %vm1914_vm3, %v1987_v59, -inf }
 0x230   : > { %2077 = vmax.xlane.f32.xlu0 %v2076_v16 }
 0x232   : > { %v1930_v37 = vpop.f32.mrf.mxu3 }
 0x233   : > { %v1951_v39 = vpop.f32.mrf.mxu0  ;;  %v2067_v45 = vsel %vm1914_vm3, %v1930_v37, -inf }
 0x235   : > { %2068 = vmax.xlane.f32.xlu2 %v2067_v45 }
 0x236   : > { %v1989_v58 = vpop.f32.mrf.mxu2  ;;  %v2044_v41 = vpop.f32.mrf.mxu1 }
 0x237   : > { %v2085_v43 = vsel %vm1914_vm3, %v2044_v41, -inf }
 0x238   : > { %2086 = vmax.xlane.f32.xlu1 %v2085_v43 }
 0x23a   : > { %v1932_v52 = vpop.f32.mrf.mxu3 }
 0x23b   : > { %v7255_v44 = vpop.f32.mrf.mxu0 }
 0x23c   : > { %v2082_v48 = vsel %vm1914_vm3, %v7255_v44, -inf }
 0x23d   : > { %2083 = vmax.xlane.f32.xlu2 %v2082_v48 }
 0x23e   : > { %v2046_v50 = vpop.f32.mrf.mxu1  ;;  %v2063_v62 = vpop.f32.mrf.mxu2 }
 0x23f   : > { %v2088_v23 = vsel %vm1914_vm3, %v2063_v62, -inf }
 0x240   : > { %2089 = vmax.xlane.f32.xlu0 %v2088_v23 }
 0x242   : > { %v2006_v1 = vpop.f32.mrf.mxu3 }
 0x243   : > { %v2027_v42 = vpop.f32.mrf.mxu0  ;;  %v2079_v5 = vsel %vm1914_vm3, %v2006_v1, -inf }
 0x245   : > { %2080 = vmax.xlane.f32.xlu2 %v2079_v5 }
 0x246   : > { %v2065_v12 = vpop.f32.mrf.mxu2 }
 0x24a   : > { %v2008_v6 = vpop.f32.mrf.mxu3 }
 0x251   : > { %5950 = vrot.lane.b32.xlu1 %v5949_v8, %s6583_s18 }
 0x254   : > { %5945 = vrot.lane.b32.xlu0 %v5949_v8, %s6582_s22 }
 0x25d   : > { %5955 = vrot.lane.b32.xlu2 %v5949_v8, %s6581_s15 }
 0x29b   : > { %v2075_v53 = vpop.xlane.xlu1 %2074 }
 0x29c   : > { %v2093_v13 = vsub.f32 %v1968_v4, %v2075_v53 }
 0x29e   : > { %v2103_v14 = vmul.f32 1.442695, %v2093_v13 }
 0x2a0   : > { %6065 = vpow2.f32 %v2103_v14  ;;  %v2072_v49 = vpop.xlane.xlu2 %2071 }
 0x2a1   : > { %v2092_v20 = vsub.f32 %v1949_v60, %v2072_v49  ;;  %v1678_v60 = vrot.slane %v7262_v10, 4 }
 0x2a3   : > { %v2078_v15 = vpop.xlane.xlu0 %2077  ;;  %v2101_v24 = vmul.f32 1.442695, %v2092_v20 }
 0x2a4   : > { %v2094_v17 = vsub.f32 %v1987_v59, %v2078_v15  ;;  %v1798_v59 = vrot.slane %v7264_v7, 4 }
 0x2a6   : > { %v7271_v19 = vpop.eup %6065  ;;  %v2105_v47 = vmul.f32 1.442695, %v2094_v17 }
 0x2a7   : > { %v2121_v38 = vsel %vm1914_vm3, %v7271_v19, 0.0 }
 0x2a8   : > { %6067 = vpow2.f32 %v2105_v47  ;;  %v2069_v55 = vpop.xlane.xlu2 %2068  ;;  %2122 = vadd.xlane.f32.xlu2 %v2121_v38 }
 0x2a9   : > { %v2091_v46 = vsub.f32 %v1930_v37, %v2069_v55 }
 0x2ab   : > { %v2099_v57 = vmul.f32 1.442695, %v2091_v46  ;;  %v2087_v22 = vpop.xlane.xlu1 %2086 }
 0x2ac   : > { %v2097_v27 = vsub.f32 %v2044_v41, %v2087_v22 }
 0x2ad   : > { %6069 = vpow2.f32 %v2099_v57 }
 0x2ae   : > { %v7275_v63 = vpop.eup %6067  ;;  %v2111_v56 = vmul.f32 1.442695, %v2097_v27 }
 0x2af   : > { %v2124_v18 = vsel %vm1914_vm3, %v7275_v63, 0.0 }
 0x2b0   : > { %6071 = vpow2.f32 %v2111_v56  ;;  %v2084_v21 = vpop.xlane.xlu2 %2083  ;;  %2125 = vadd.xlane.f32.xlu1 %v2124_v18 }
 0x2b1   : > { %6073 = vpow2.f32 %v2101_v24  ;;  %v2096_v33 = vsub.f32 %v7255_v44, %v2084_v21 }
 0x2b3   : > { %v7279_v26 = vpop.eup %6069  ;;  %v2090_v28 = vpop.xlane.xlu0 %2089  ;;  %v2109_v31 = vmul.f32 1.442695, %v2096_v33 }
 0x2b4   : > { %v2098_v3 = vsub.f32 %v2063_v62, %v2090_v28  ;;  %v2115_v36 = vsel %vm1914_vm3, %v7279_v26, 0.0 }
 0x2b5   : > { %2116 = vadd.xlane.f32.xlu0 %v2115_v36 }
 0x2b6   : > { %v7283_v29 = vpop.eup %6071  ;;  %v2113_v54 = vmul.f32 1.442695, %v2098_v3 }
 0x2b7   : > { %v2133_v2 = vsel %vm1914_vm3, %v7283_v29, 0.0  ;;  %v7287_v11 = vpop.eup %6073 }
 0x2b8   : > { %v2081_v40 = vpop.xlane.xlu2 %2080  ;;  %2134 = vadd.xlane.f32.xlu2 %v2133_v2  ;;  %6075 = vpow2.f32 %v2113_v54  ;;  %v2118_v25 = vsel %vm1914_vm3, %v7287_v11, 0.0 }
 0x2b9   : > { %v2095_v0 = vsub.f32 %v2006_v1, %v2081_v40 }
 0x2bb   : > { %v2107_v30 = vmul.f32 1.442695, %v2095_v0 }
 0x2bd   : > { %6077 = vpow2.f32 %v2107_v30  ;;  %2119 = vadd.xlane.f32.xlu0 %v2118_v25 }
 0x2be   : > { %v7292_v4 = vpop.eup %6075  ;;  %6079 = vpow2.f32 %v2109_v31 }
 0x2bf   : > { %v2136_v37 = vsel %vm1914_vm3, %v7292_v4, 0.0 }
 0x2c0   : > { %v5956_v9 = vpop.permute.xlu2 %5955 }
 0x2c1   : > { %v5958_v35 = vunpack.i.h.bf16 %v5956_v9  ;;  %v5957_v39 = vunpack.i.l.bf16 %v5956_v9 }
 0x2c3   : > { %v7295_v32 = vpop.eup %6077  ;;  %v5951_v16 = vpop.permute.xlu1 %5950  ;;  %v1808_v62 = vrot.slane %v5958_v35, 4  ;;  %v1688_v42 = vrot.slane %v5957_v39, 4 }
 0x2c4   : > { %v5953_v45 = vunpack.i.h.bf16 %v5951_v16  ;;  %v5952_v58 = vunpack.i.l.bf16 %v5951_v16  ;;  %v2127_v41 = vsel %vm1914_vm3, %v7295_v32, 0.0  ;;  %v7309_v6 = vpop.eup %6079 }
 0x2c5   : > { %2137 = vadd.xlane.f32.xlu0 %v2136_v37  ;;  %2128 = vadd.xlane.f32.xlu1 %v2127_v41  ;;  %v2130_v57 = vsel %vm1914_vm3, %v7309_v6, 0.0 }
 0x2c6   : > { %v1796_v43 = vrot.slane %v5953_v45, 4  ;;  %v1799_v52 = vsel %vm1180_vm2, %v5953_v45, %v1798_v59  ;;  %v1676_v44 = vrot.slane %v5952_v58, 4  ;;  %v1679_v48 = vsel %vm1180_vm2, %v5952_v58, %v1678_v60  ;;  %v5946_v50 = vpop.permute.xlu0 %5945 }
 0x2c7   : > { %v5948_v23 = vunpack.i.h.bf16 %v5946_v50  ;;  %v5947_v1 = vunpack.i.l.bf16 %v5946_v50  ;;  %v1687_v61 = vperm.slane %v1679_v48, %v6972_v34  ;;  %v1807_v53 = vperm.slane %v1799_v52, %v6972_v34 }
 0x2c8   : > { %v1797_v5 = vsel %vm1180_vm2, %v1796_v43, %v7264_v7  ;;  %v1677_v12 = vsel %vm1180_vm2, %v1676_v44, %v7262_v10 }
 0x2c9   : > { %v1803_v8 = vperm.slane %v1797_v5, %v6972_v34  ;;  %v1683_v13 = vperm.slane %v1677_v12, %v6972_v34  ;;  %v1810_v14 = vrot.slane %v5948_v23, 4  ;;  %v1689_v49 = vsel %vm1180_vm2, %v1688_v42, %v5947_v1 }
 0x2ca   : > { %v1690_v15 = vrot.slane %v5947_v1, 4  ;;  %v1809_v17 = vsel %vm1180_vm2, %v1808_v62, %v5948_v23  ;;  %v1695_v10 = vperm.slane %v1689_v49, %v6972_v34  ;;  %v1714_v55 = vrot.slane %v1687_v61, 4 }
 0x2cb   : > { %v1822_v7 = vrot.slane %v1803_v8, 4  ;;  %v1702_v47 = vrot.slane %v1683_v13, 4  ;;  %v1815_v38 = vperm.slane %v1809_v17, %v6972_v34  ;;  %v1811_v20 = vsel %vm1180_vm2, %v5958_v35, %v1810_v14 }
 0x2cc   : > { %v1691_v46 = vsel %vm1180_vm2, %v5957_v39, %v1690_v15  ;;  %v1700_v27 = vrot.slane %v1695_v10, 4  ;;  %v1819_v24 = vperm.slane %v1811_v20, %v6972_v34  ;;  %v1834_v18 = vrot.slane %v1807_v53, 4 }
 0x2cd   : > { %v1699_v22 = vperm.slane %v1691_v46, %v6972_v34  ;;  %v1703_v56 = vsel %vm1180_vm2, %v1695_v10, %v1702_v47  ;;  %2131 = vadd.xlane.f32.xlu1 %v2130_v57  ;;  %v1820_v28 = vrot.slane %v1815_v38, 4  ;;  %v1823_v3 = vsel %vm1180_vm2, %v1815_v38, %v1822_v7 }
 0x2ce   : > { %v1711_v21 = vperm.slane %v1703_v56, %v6984_v51  ;;  %v1701_v36 = vsel %vm1180_vm2, %v1700_v27, %v1683_v13  ;;  %v1831_v40 = vperm.slane %v1823_v3, %v6984_v51  ;;  %v1832_v60 = vrot.slane %v1819_v24, 4 }
 0x2cf   : > { %v1712_v54 = vrot.slane %v1699_v22, 4  ;;  %v1715_v2 = vsel %vm1180_vm2, %v1699_v22, %v1714_v55  ;;  %v1707_v0 = vperm.slane %v1701_v36, %v6984_v51  ;;  %v1821_v25 = vsel %vm1180_vm2, %v1820_v28, %v1803_v8 }
 0x2d0   : > { %v1723_v33 = vperm.slane %v1715_v2, %v6984_v51  ;;  %v1726_v30 = vrot.slane %v1711_v21, 4  ;;  %v1827_v9 = vperm.slane %v1821_v25, %v6984_v51  ;;  %v1835_v35 = vsel %vm1180_vm2, %v1819_v24, %v1834_v18 }
 0x2d1   : > { %v1713_v31 = vsel %vm1180_vm2, %v1712_v54, %v1687_v61  ;;  %v1724_v16 = vrot.slane %v1707_v0, 4  ;;  %v1833_v41 = vsel %vm1180_vm2, %v1832_v60, %v1807_v53  ;;  %v1843_v43 = vperm.slane %v1835_v35, %v6984_v51 }
 0x2d2   : > { %v1719_v59 = vperm.slane %v1713_v31, %v6984_v51  ;;  %v1727_v37 = vsel %vm1180_vm2, 0.0, %v1726_v30  ;;  %v1730_v39 = vrot.slane %v1723_v33, 4  ;;  %v1732_v45 = vsel %vm1180_vm2, %v1726_v30, %v1707_v0 }
 0x2d3   : > { %v1737_v58 = vrot.slane %v1727_v37, 4  ;;  %v1725_v52 = vsel %vm1180_vm2, 0.0, %v1724_v16  ;;  %v1736_v50 = vperm.slane %v1732_v45, %v6972_v34  ;;  %v1839_v23 = vperm.slane %v1833_v41, %v6984_v51 }
 0x2d4   : > { %v1728_v44 = vrot.slane %v1719_v59, 4  ;;  %v1731_v48 = vsel %vm1180_vm2, 0.0, %v1730_v39  ;;  %v1844_v1 = vrot.slane %v1827_v9, 4  ;;  %v1846_v42 = vrot.slane %v1831_v40, 4 }
 0x2d5   : > { %v1748_v62 = vrot.slane %v1731_v48, 4  ;;  %v1850_v5 = vrot.slane %v1843_v43, 4  ;;  %v1738_v61 = vsel %vm1180_vm2, %v1737_v58, %v1725_v52  ;;  %v1743_v8 = vsel %vm1180_vm2, %v1730_v39, %v1719_v59 }
 0x2d6   : > { %v1729_v12 = vsel %vm1180_vm2, 0.0, %v1728_v44  ;;  %v1845_v53 = vsel %vm1180_vm2, 0.0, %v1844_v1  ;;  %v1847_v13 = vsel %vm1180_vm2, 0.0, %v1846_v42  ;;  %v1848_v14 = vrot.slane %v1839_v23, 4 }
 0x2d7   : > { %v1852_v49 = vsel %vm1180_vm2, %v1846_v42, %v1827_v9  ;;  %v1851_v15 = vsel %vm1180_vm2, 0.0, %v1850_v5  ;;  %v1857_v7 = vrot.slane %v1847_v13, 4  ;;  %v1742_v47 = vperm.slane %v1738_v61, %v6972_v34 }
 0x2d8   : > { %v1856_v17 = vperm.slane %v1852_v49, %v6972_v34  ;;  %v1868_v10 = vrot.slane %v1851_v15, 4  ;;  %v1747_v38 = vperm.slane %v1743_v8, %v6972_v34  ;;  %v1749_v55 = vsel %vm1180_vm2, %v1748_v62, %v1729_v12 }
 0x2d9   : > { %v1756_v46 = vrot.slane %v1736_v50, 4  ;;  %v1753_v20 = vperm.slane %v1749_v55, %v6972_v34  ;;  %v1849_v57 = vsel %vm1180_vm2, 0.0, %v1848_v14  ;;  %v1858_v22 = vsel %vm1180_vm2, %v1857_v7, %v1845_v53 }
 0x2da   : > { %v1863_v27 = vsel %vm1180_vm2, %v1850_v5, %v1839_v23  ;;  %v1768_v24 = vrot.slane %v1747_v38, 4  ;;  %v1862_v18 = vperm.slane %v1858_v22, %v6972_v34  ;;  %v1869_v3 = vsel %vm1180_vm2, %v1868_v10, %v1849_v57 }
 0x2db   : > { %v1757_v56 = vsel %vm1180_vm2, %v1742_v47, %v1756_v46  ;;  %v1867_v21 = vperm.slane %v1863_v27, %v6972_v34  ;;  %v1876_v36 = vrot.slane %v1856_v17, 4  ;;  %v1754_v54 = vrot.slane %v1742_v47, 4 }
 0x2dc   : > { %v1765_v28 = vperm.slane %v1757_v56, %v6984_v51  ;;  %v1769_v2 = vsel %vm1180_vm2, %v1753_v20, %v1768_v24  ;;  %v1873_v40 = vperm.slane %v1869_v3, %v6972_v34  ;;  %v1766_v33 = vrot.slane %v1753_v20, 4 }
 0x2dd   : > { %v1888_v0 = vrot.slane %v1867_v21, 4  ;;  %v1777_v30 = vperm.slane %v1769_v2, %v6984_v51  ;;  %v1877_v31 = vsel %vm1180_vm2, %v1862_v18, %v1876_v36  ;;  %v1755_v9 = vsel %vm1180_vm2, %v1754_v54, %v1736_v50 }
 0x2de   : > { %v1784_v25 = vrot.slane %v1765_v28, 4  ;;  %v1885_v60 = vperm.slane %v1877_v31, %v6984_v51  ;;  %v1761_v59 = vperm.slane %v1755_v9, %v6984_v51  ;;  %v1767_v16 = vsel %vm1180_vm2, %v1766_v33, %v1747_v38 }
 0x2df   : > { %v1889_v35 = vsel %vm1180_vm2, %v1873_v40, %v1888_v0  ;;  %v1782_v39 = vrot.slane %v1777_v30, 4  ;;  %v1773_v58 = vperm.slane %v1767_v16, %v6984_v51  ;;  %v1874_v44 = vrot.slane %v1862_v18, 4 }
 0x2e0   : > { %v1785_v37 = vsel %vm1180_vm2, %v1777_v30, %v1784_v25  ;;  %v1897_v45 = vperm.slane %v1889_v35, %v6984_v51  ;;  %v1904_v43 = vrot.slane %v1885_v60, 4  ;;  %v1780_v52 = vrot.slane %v1761_v59, 4 }
 0x2e1   : > { %v1909_v41 = vpack.c.bf16 %v1785_v37, %v1785_v37  ;;  %v1783_v48 = vsel %vm1180_vm2, %v1782_v39, %v1765_v28  ;;  %v1778_v62 = vrot.slane %v1773_v58, 4  ;;  %v1886_v23 = vrot.slane %v1873_v40, 4 }
 0x2e2   : > { %v1902_v50 = vrot.slane %v1897_v45, 4  ;;  %v1908_v42 = vpack.c.bf16 %v1783_v48, %v1783_v48  ;;  %v1905_v5 = vsel %vm1180_vm2, %v1897_v45, %v1904_v43  ;;  %v1781_v12 = vsel %vm1180_vm2, %v1773_v58, %v1780_v52 }
 0x2e3   : > { %v2329_v1 = vsel %vm2270_vm4, %v1909_v41, 0  ;;  %v1913_v61 = vpack.c.bf16 %v1905_v5, %v1905_v5  ;;  %v1907_v8 = vpack.c.bf16 %v1781_v12, %v1781_v12  ;;  %v1779_v13 = vsel %vm1180_vm2, %v1778_v62, %v1761_v59 }
 0x2e4   : > { %2338 = vmatpush.bf16.msrb.mxu2 %v2329_v1  ;;  %v1903_v53 = vsel %vm1180_vm2, %v1902_v50, %v1885_v60  ;;  %v2310_v14 = vsel %vm2270_vm4, %v1908_v42, 0  ;;  %v1906_v15 = vpack.c.bf16 %v1779_v13, %v1779_v13  ;;  %v1875_v7 = vsel %vm1180_vm2, %v1874_v44, %v1856_v17 }
 0x2e5   : > { %v1912_v49 = vpack.c.bf16 %v1903_v53, %v1903_v53  ;;  %2319 = vmatpush.bf16.msrb.mxu1 %v2310_v14  ;;  %v2405_v47 = vsel %vm2270_vm4, %v1913_v61, 0  ;;  %v2291_v10 = vsel %vm2270_vm4, %v1907_v8, 0  ;;  %v1881_v38 = vperm.slane %v1875_v7, %v6984_v51 }
 0x2e6   : > { %v1887_v55 = vsel %vm1180_vm2, %v1886_v23, %v1867_v21  ;;  %2300 = vmatpush.bf16.msrb.mxu0 %v2291_v10  ;;  %v2272_v20 = vsel %vm2270_vm4, %v1906_v15, 0 }
 0x2e7   : > { %v2386_v46 = vsel %vm2270_vm4, %v1912_v49, 0  ;;  %v1893_v57 = vperm.slane %v1887_v55, %v6984_v51  ;;  %2281 = vmatpush.bf16.msra.mxu3 %v2272_v20  ;;  %v1900_v17 = vrot.slane %v1881_v38, 4 }
 0x2e8   : > { %2414 = vmatpush.bf16.msra.mxu2 %v2405_v47 }
 0x2e9   : > { %2395 = vmatpush.bf16.msra.mxu1 %v2386_v46  ;;  %v1898_v22 = vrot.slane %v1893_v57, 4  ;;  %v1901_v27 = vsel %vm1180_vm2, %v1893_v57, %v1900_v17 }
 0x2ea   : > { %v1911_v56 = vpack.c.bf16 %v1901_v27, %v1901_v27 }
 0x2eb   : > { %v1899_v24 = vsel %vm1180_vm2, %v1898_v22, %v1881_v38 }
 0x2ec   : > { %v1910_v18 = vpack.c.bf16 %v1899_v24, %v1899_v24  ;;  %v2367_v21 = vsel %vm2270_vm4, %v1911_v56, 0 }
 0x2ed   : > { %2376 = vmatpush.bf16.msra.mxu0 %v2367_v21 }
 0x2ee   : > { %v2348_v28 = vsel %vm2270_vm4, %v1910_v18, 0 }
 0x2ef   : > { %2357 = vmatpush.bf16.msrb.mxu3 %v2348_v28 }
 0x31b   : > { %v2123_v3 = vpop.xlane.xlu2 %2122 }
 0x31c   : > { %6081 = vrcp.f32 %v2123_v3  ;;  %v2180_v0 = vand.u32 2147483648, %v2123_v3  ;;  %v2178_v30 = vand.u32 2147483647, %v2123_v3  ;;  %vm2174_vm6 = vweird.f32 %v2123_v3 }
 0x31e   : > { %v2181_v60 = vor.u32 1.1754944e-38, %v2180_v0  ;;  %vm2179_vm8 = vcmp.eq.f32.partialorder %v2178_v30, 8.507059e+37 }
 0x322   : > { %v6082_v36 = vpop.eup %6081 }
 0x323   : > { %v2170_v54 = vmul.f32 %v6082_v36, %v2123_v3  ;;  %v2126_v2 = vpop.xlane.xlu1 %2125  ;;  %vm2175_vm5 = vweird.f32 %v6082_v36 }
 0x324   : > { %6083 = vrcp.f32 %v2126_v2  ;;  %vm2176_vm7 = vmor %vm2174_vm6, %vm2175_vm5  ;;  %v2195_v58 = vand.u32 2147483648, %v2126_v2  ;;  %v2193_v52 = vand.u32 2147483647, %v2126_v2  ;;  %vm2189_vm10 = vweird.f32 %v2126_v2 }
 0x325   : > { %v2171_v40 = vsub.f32 1.0, %v2170_v54 }
 0x326   : > { %v2196_v1 = vor.u32 1.1754944e-38, %v2195_v58  ;;  %vm2194_vm12 = vcmp.eq.f32.partialorder %v2193_v52, 8.507059e+37 }
 0x327   : > { %v2172_v33 = vmul.f32 %v6082_v36, %v2171_v40 }
 0x328   : > { %v2117_v25 = vpop.xlane.xlu0 %2116 }
 0x329   : > { %v2173_v31 = vadd.f32 %v6082_v36, %v2172_v33  ;;  %6085 = vrcp.f32 %v2117_v25  ;;  %v2150_v5 = vand.u32 2147483648, %v2117_v25  ;;  %v2148_v53 = vand.u32 2147483647, %v2117_v25 }
 0x32a   : > { %v6084_v9 = vpop.eup %6083  ;;  %vm2144_vm14 = vweird.f32 %v2117_v25 }
 0x32b   : > { %v2177_v35 = vsel %vm2176_vm7, %v6082_v36, %v2173_v31  ;;  %v2185_v59 = vmul.f32 %v6084_v9, %v2126_v2  ;;  %v2135_v16 = vpop.xlane.xlu2 %2134  ;;  %vm2190_vm9 = vweird.f32 %v6084_v9  ;;  %v2151_v15 = vor.u32 1.1754944e-38, %v2150_v5 }
 0x32c   : > { %v2182_v37 = vsel %vm2179_vm8, %v2181_v60, %v2177_v35  ;;  %6087 = vrcp.f32 %v2135_v16  ;;  %vm2191_vm11 = vmor %vm2189_vm10, %vm2190_vm9  ;;  %v2240_v7 = vand.u32 2147483648, %v2135_v16  ;;  %v2238_v38 = vand.u32 2147483647, %v2135_v16 }
 0x32d   : > { %v2183_v39 = vmul.f32 %v7271_v19, %v2182_v37  ;;  %v2186_v45 = vsub.f32 1.0, %v2185_v59  ;;  %vm2149_vm4 = vcmp.eq.f32.partialorder %v2148_v53, 8.507059e+37  ;;  %vm2234_vm5 = vweird.f32 %v2135_v16 }
 0x32e   : > { %v2241_v56 = vor.u32 1.1754944e-38, %v2240_v7  ;;  %vm2239_vm7 = vcmp.eq.f32.partialorder %v2238_v38, 8.507059e+37 }
 0x32f   : > { %v6086_v41 = vpop.eup %6085  ;;  %v2187_v43 = vmul.f32 %v6084_v9, %v2186_v45  ;;  %v2261_v44 = vpack.c.bf16 %v2183_v39, %v2183_v39 }
 0x330   : > { %v2140_v48 = vmul.f32 %v6086_v41, %v2117_v25  ;;  %v2120_v50 = vpop.xlane.xlu0 %2119  ;;  %vm2145_vm13 = vweird.f32 %v6086_v41 }
 0x331   : > { %v2188_v62 = vadd.f32 %v6084_v9, %v2187_v43  ;;  %6089 = vrcp.f32 %v2120_v50  ;;  %5669 = vmatmul.msk.bf16.vlgmr.msrb.gmra.mxu1 %vm1914_vm3, %v2261_v44  ;;  %vm2146_vm15 = vmor %vm2144_vm14, %vm2145_vm13  ;;  %v2165_v21 = vand.u32 2147483648, %v2120_v50  ;;  %v2163_v36 = vand.u32 2147483647, %v2120_v50 }
 0x332   : > { %v6088_v23 = vpop.eup %6087  ;;  %v2141_v42 = vsub.f32 1.0, %v2140_v48  ;;  %vm2159_vm9 = vweird.f32 %v2120_v50 }
 0x333   : > { %v2192_v19 = vsel %vm2191_vm11, %v6084_v9, %v2188_v62  ;;  %v2230_v12 = vmul.f32 %v6088_v23, %v2135_v16  ;;  %vm2235_vm0 = vweird.f32 %v6088_v23  ;;  %vm2164_vm11 = vcmp.eq.f32.partialorder %v2163_v36, 8.507059e+37 }
 0x334   : > { %v2197_v61 = vsel %vm2194_vm12, %v2196_v1, %v2192_v19  ;;  %v2142_v8 = vmul.f32 %v6086_v41, %v2141_v42  ;;  %vm2236_vm6 = vmor %vm2234_vm5, %vm2235_vm0 }
 0x335   : > { %v2198_v13 = vmul.f32 %v7275_v63, %v2197_v61  ;;  %v2231_v14 = vsub.f32 1.0, %v2230_v12 }
 0x336   : > { %v2143_v49 = vadd.f32 %v6086_v41, %v2142_v8 }
 0x337   : > { %v6090_v47 = vpop.eup %6089  ;;  %v2232_v10 = vmul.f32 %v6088_v23, %v2231_v14  ;;  %v2262_v55 = vpack.c.bf16 %v2198_v13, %v2198_v13 }
 0x338   : > { %v2147_v46 = vsel %vm2146_vm15, %v6086_v41, %v2143_v49  ;;  %v2155_v20 = vmul.f32 %v6090_v47, %v2120_v50  ;;  %v2138_v57 = vpop.xlane.xlu0 %2137  ;;  %v7399_v17 = vpop.xlane.xlu1 %2128  ;;  %vm2160_vm8 = vweird.f32 %v6090_v47 }
 0x339   : > { %v2152_v22 = vsel %vm2149_vm4, %v2151_v15, %v2147_v46  ;;  %v2233_v27 = vadd.f32 %v6088_v23, %v2232_v10  ;;  %6091 = vrcp.f32 %v2138_v57  ;;  %5670 = vmatmul.msk.bf16.vlgmr.msrb.gmra.mxu2 %vm1914_vm3, %v2262_v55  ;;  %vm2161_vm10 = vmor %vm2159_vm9, %vm2160_vm8  ;;  %v2253_v16 = vand.u32 2147483647, %v2138_v57 }
 0x33a   : > { %v2153_v63 = vmul.f32 %v7279_v26, %v2152_v22  ;;  %v2156_v24 = vsub.f32 1.0, %v2155_v20  ;;  %6093 = vrcp.f32 %v7399_v17  ;;  %v2166_v26 = vor.u32 1.1754944e-38, %v2165_v21 }
 0x33b   : > { %v2237_v18 = vsel %vm2236_vm6, %v6088_v23, %v2233_v27  ;;  %v2255_v37 = vand.u32 2147483648, %v2138_v57  ;;  %vm2249_vm13 = vweird.f32 %v2138_v57  ;;  %v2210_v41 = vand.u32 2147483648, %v7399_v17 }
 0x33c   : > { %v2242_v28 = vsel %vm2239_vm7, %v2241_v56, %v2237_v18  ;;  %v2157_v3 = vmul.f32 %v6090_v47, %v2156_v24  ;;  %v2259_v2 = vpack.c.bf16 %v2153_v63, %v2153_v63  ;;  %v2208_v44 = vand.u32 2147483647, %v7399_v17 }
 0x33d   : > { %v2243_v54 = vmul.f32 %v7283_v29, %v2242_v28  ;;  %v2256_v48 = vor.u32 1.1754944e-38, %v2255_v37  ;;  %vm2204_vm0 = vweird.f32 %v7399_v17  ;;  %vm2254_vm4 = vcmp.eq.f32.partialorder %v2253_v16, 8.507059e+37 }
 0x33e   : > { %v2158_v40 = vadd.f32 %v6090_v47, %v2157_v3  ;;  %5667 = vmatmul.msk.bf16.vlgmr.msra.gmra.mxu3 %vm1914_vm3, %v2259_v2  ;;  %v2211_v42 = vor.u32 1.1754944e-38, %v2210_v41  ;;  %vm2209_vm6 = vcmp.eq.f32.partialorder %v2208_v44, 8.507059e+37 }
 0x33f   : > { %v6092_v0 = vpop.eup %6091  ;;  %v2265_v33 = vpack.c.bf16 %v2243_v54, %v2243_v54 }
 0x340   : > { %v2162_v30 = vsel %vm2161_vm10, %v6090_v47, %v2158_v40  ;;  %v2245_v25 = vmul.f32 %v6092_v0, %v2138_v57  ;;  %v2132_v31 = vpop.xlane.xlu1 %2131  ;;  %v6094_v9 = vpop.eup %6093  ;;  %vm2250_vm12 = vweird.f32 %v6092_v0 }
 0x341   : > { %v2167_v60 = vsel %vm2164_vm11, %v2166_v26, %v2162_v30  ;;  %6095 = vrcp.f32 %v2132_v31  ;;  %5673 = vmatmul.msk.bf16.vlgmr.msra.gmra.mxu1 %vm1914_vm3, %v2265_v33  ;;  %v2200_v59 = vmul.f32 %v6094_v9, %v7399_v17  ;;  %vm2205_vm14 = vweird.f32 %v6094_v9  ;;  %vm2251_vm15 = vmor %vm2249_vm13, %vm2250_vm12 }
 0x342   : > { %v2168_v29 = vmul.f32 %v7287_v11, %v2167_v60  ;;  %v2246_v35 = vsub.f32 1.0, %v2245_v25  ;;  %vm2206_vm5 = vmor %vm2204_vm0, %vm2205_vm14  ;;  %v2223_v8 = vand.u32 2147483647, %v2132_v31  ;;  %v2225_v53 = vand.u32 2147483648, %v2132_v31 }
 0x343   : > { %v2201_v45 = vsub.f32 1.0, %v2200_v59  ;;  %vm2219_vm8 = vweird.f32 %v2132_v31  ;;  %vm2543_vm11 = vcmask 130048   ;;  %vm2545_vm12 = vcmask 195584  }
 0x344   : > { %v2247_v39 = vmul.f32 %v6092_v0, %v2246_v35  ;;  %v2260_v58 = vpack.c.bf16 %v2168_v29, %v2168_v29  ;;  %v2226_v47 = vor.u32 1.1754944e-38, %v2225_v53  ;;  %vm2224_vm10 = vcmp.eq.f32.partialorder %v2223_v8, 8.507059e+37 }
 0x345   : > { %v2202_v52 = vmul.f32 %v6094_v9, %v2201_v45 }
 0x346   : > { %v2248_v43 = vadd.f32 %v6092_v0, %v2247_v39  ;;  %5668 = vmatmul.msk.bf16.vlgmr.msrb.gmra.mxu0 %vm1914_vm3, %v2260_v58 }
 0x347   : > { %v6096_v11 = vpop.eup %6095  ;;  %v2203_v62 = vadd.f32 %v6094_v9, %v2202_v52 }
 0x348   : > { %v2252_v50 = vsel %vm2251_vm15, %v6092_v0, %v2248_v43  ;;  %v2215_v23 = vmul.f32 %v6096_v11, %v2132_v31  ;;  %vm2220_vm7 = vweird.f32 %v6096_v11 }
 0x349   : > { %v2257_v1 = vsel %vm2254_vm4, %v2256_v48, %v2252_v50  ;;  %v2207_v19 = vsel %vm2206_vm5, %v6094_v9, %v2203_v62  ;;  %vm2221_vm9 = vmor %vm2219_vm8, %vm2220_vm7 }
 0x34a   : > { %v2258_v5 = vmul.f32 %v7292_v4, %v2257_v1  ;;  %v2216_v12 = vsub.f32 1.0, %v2215_v23  ;;  %v2212_v61 = vsel %vm2209_vm6, %v2211_v42, %v2207_v19 }
 0x34b   : > { %v2213_v13 = vmul.f32 %v7295_v32, %v2212_v61 }
 0x34c   : > { %v2217_v14 = vmul.f32 %v6096_v11, %v2216_v12  ;;  %v2266_v49 = vpack.c.bf16 %v2258_v5, %v2258_v5 }
 0x34d   : > { %v2263_v7 = vpack.c.bf16 %v2213_v13, %v2213_v13 }
 0x34e   : > { %v2218_v15 = vadd.f32 %v6096_v11, %v2217_v14  ;;  %5674 = vmatmul.msk.bf16.vlgmr.msra.gmra.mxu2 %vm1914_vm3, %v2266_v49 }
 0x34f   : > { %5671 = vmatmul.msk.bf16.vlgmr.msrb.gmra.mxu3 %vm1914_vm3, %v2263_v7 }
 0x350   : > { %v2222_v10 = vsel %vm2221_vm9, %v6096_v11, %v2218_v15 }
 0x351   : > { %v2227_v4 = vsel %vm2224_vm10, %v2226_v47, %v2222_v10 }
 0x352   : > { %v2228_v38 = vmul.f32 %v7309_v6, %v2227_v4 }
 0x354   : > { %v2264_v55 = vpack.c.bf16 %v2228_v38, %v2228_v38 }
 0x356   : > { %5672 = vmatmul.msk.bf16.vlgmr.msra.gmra.mxu0 %vm1914_vm3, %v2264_v55 }
 0x3ae   : > { %v2321_v32 = vpop.f32.mrf.mxu1 }
 0x3af   : > { %v2420_v17 = vrot.slane %v2321_v32, 4 }
 0x3b6   : > { %v2323_v46 = vpop.f32.mrf.mxu1 }
 0x3bc   : > { %v2340_v20 = vpop.f32.mrf.mxu2 }
 0x3bd   : > { %v2432_v22 = vrot.slane %v2340_v20, 4 }
 0x3be   : > { %v2397_v57 = vpop.f32.mrf.mxu1 }
 0x3bf   : > { %v2547_v19 = vrot.slane %v2397_v57, 4 }
 0x3c1   : > { %v2283_v27 = vpop.f32.mrf.mxu3 }
 0x3c2   : > { %v2421_v63 = vsel %vm1180_vm2, %v2420_v17, %v2283_v27  ;;  %v2422_v56 = vrot.slane %v2283_v27, 4 }
 0x3c3   : > { %v2302_v24 = vpop.f32.mrf.mxu0  ;;  %v2427_v18 = vperm.slane %v2421_v63, %v6972_v34 }
 0x3c4   : > { %v2433_v21 = vsel %vm1180_vm2, %v2432_v22, %v2302_v24  ;;  %v2434_v28 = vrot.slane %v2302_v24, 4  ;;  %v2342_v6 = vpop.f32.mrf.mxu2  ;;  %v2423_v3 = vsel %vm1180_vm2, %v2321_v32, %v2422_v56 }
 0x3c5   : > { %v2439_v36 = vperm.slane %v2433_v21, %v6972_v34  ;;  %v2431_v54 = vperm.slane %v2423_v3, %v6972_v34  ;;  %v2446_v2 = vrot.slane %v2427_v18, 4 }
 0x3c6   : > { %v2435_v40 = vsel %vm1180_vm2, %v2340_v20, %v2434_v28  ;;  %v2399_v0 = vpop.f32.mrf.mxu1 }
 0x3c7   : > { %v2443_v26 = vperm.slane %v2435_v40, %v6972_v34  ;;  %v2444_v33 = vrot.slane %v2439_v36, 4  ;;  %v2458_v30 = vrot.slane %v2431_v54, 4  ;;  %v2447_v25 = vsel %vm1180_vm2, %v2439_v36, %v2446_v2 }
 0x3c8   : > { %v2455_v9 = vperm.slane %v2447_v25, %v6984_v51 }
 0x3c9   : > { %v2445_v31 = vsel %vm1180_vm2, %v2444_v33, %v2427_v18  ;;  %v2456_v60 = vrot.slane %v2443_v26, 4  ;;  %v2459_v35 = vsel %vm1180_vm2, %v2443_v26, %v2458_v30  ;;  %v2285_v59 = vpop.f32.mrf.mxu3 }
 0x3ca   : > { %v2451_v29 = vperm.slane %v2445_v31, %v6984_v51  ;;  %v2467_v37 = vperm.slane %v2459_v35, %v6984_v51  ;;  %v2470_v39 = vrot.slane %v2455_v9, 4 }
 0x3cb   : > { %v2457_v16 = vsel %vm1180_vm2, %v2456_v60, %v2431_v54  ;;  %v2304_v45 = vpop.f32.mrf.mxu0 }
 0x3cc   : > { %v2463_v58 = vperm.slane %v2457_v16, %v6984_v51  ;;  %v2468_v41 = vrot.slane %v2451_v29, 4  ;;  %v2471_v43 = vsel %vm1180_vm2, 0.0, %v2470_v39  ;;  %v2474_v52 = vrot.slane %v2467_v37, 4 }
 0x3cd   : > { %v2481_v48 = vrot.slane %v2471_v43, 4  ;;  %v2476_v62 = vsel %vm1180_vm2, %v2470_v39, %v2451_v29 }
 0x3ce   : > { %v2469_v44 = vsel %vm1180_vm2, 0.0, %v2468_v41  ;;  %v2472_v11 = vrot.slane %v2463_v58, 4  ;;  %v2475_v50 = vsel %vm1180_vm2, 0.0, %v2474_v52  ;;  %v2487_v1 = vsel %vm1180_vm2, %v2474_v52, %v2463_v58 }
 0x3cf   : > { %v2482_v23 = vsel %vm1180_vm2, %v2481_v48, %v2469_v44  ;;  %v2492_v42 = vrot.slane %v2475_v50, 4  ;;  %v2480_v61 = vperm.slane %v2476_v62, %v6972_v34  ;;  %v2491_v15 = vperm.slane %v2487_v1, %v6972_v34 }
 0x3d0   : > { %v2473_v5 = vsel %vm1180_vm2, 0.0, %v2472_v11  ;;  %v2486_v8 = vperm.slane %v2482_v23, %v6972_v34 }
 0x3d1   : > { %v2416_v12 = vpop.f32.mrf.mxu2  ;;  %v2493_v13 = vsel %vm1180_vm2, %v2492_v42, %v2473_v5  ;;  %v2500_v46 = vrot.slane %v2480_v61, 4  ;;  %v2512_v18 = vrot.slane %v2491_v15, 4 }
 0x3d2   : > { %v2559_v53 = vrot.slane %v2416_v12, 4  ;;  %v2359_v14 = vpop.f32.mrf.mxu3  ;;  %v2497_v7 = vperm.slane %v2493_v13, %v6972_v34  ;;  %v2498_v22 = vrot.slane %v2486_v8, 4 }
 0x3d3   : > { %v2378_v49 = vpop.f32.mrf.mxu0  ;;  %v2548_v47 = vsel %vm1180_vm2, %v2547_v19, %v2359_v14  ;;  %v2549_v10 = vrot.slane %v2359_v14, 4  ;;  %v2501_v40 = vsel %vm1180_vm2, %v2486_v8, %v2500_v46 }
 0x3d4   : > { %v2560_v4 = vsel %vm1180_vm2, %v2559_v53, %v2378_v49  ;;  %v2561_v38 = vrot.slane %v2378_v49, 4  ;;  %v2554_v55 = vperm.slane %v2548_v47, %v6972_v34  ;;  %v2510_v21 = vrot.slane %v2497_v7, 4 }
 0x3d5   : > { %v2566_v32 = vperm.slane %v2560_v4, %v6972_v34  ;;  %v2550_v20 = vsel %vm1180_vm2, %v2397_v57, %v2549_v10  ;;  %v2499_v25 = vsel %vm1180_vm2, %v2498_v22, %v2480_v61  ;;  %v2509_v59 = vperm.slane %v2501_v40, %v6984_v51 }
 0x3d6   : > { %v2562_v17 = vsel %vm1180_vm2, %v2416_v12, %v2561_v38  ;;  %v2558_v27 = vperm.slane %v2550_v20, %v6972_v34  ;;  %v2573_v63 = vrot.slane %v2554_v55, 4  ;;  %v2511_v31 = vsel %vm1180_vm2, %v2510_v21, %v2491_v15 }
 0x3d7   : > { %v2570_v56 = vperm.slane %v2562_v17, %v6972_v34  ;;  %v2571_v24 = vrot.slane %v2566_v32, 4  ;;  %v2513_v16 = vsel %vm1180_vm2, %v2497_v7, %v2512_v18  ;;  %v2517_v37 = vperm.slane %v2511_v31, %v6984_v51 }
 0x3d8   : > { %v2585_v28 = vrot.slane %v2558_v27, 4  ;;  %v2574_v3 = vsel %vm1180_vm2, %v2566_v32, %v2573_v63  ;;  %v2505_v44 = vperm.slane %v2499_v25, %v6984_v51  ;;  %v2521_v8 = vperm.slane %v2513_v16, %v6984_v51 }
 0x3d9   : > { %v2572_v6 = vsel %vm1180_vm2, %v2571_v24, %v2554_v55  ;;  %v2583_v36 = vrot.slane %v2570_v56, 4  ;;  %v2418_v54 = vpop.f32.mrf.mxu2  ;;  %v2582_v2 = vperm.slane %v2574_v3, %v6984_v51  ;;  %v2522_v11 = vrot.slane %v2517_v37, 4 }
 0x3da   : > { %v2578_v57 = vperm.slane %v2572_v6, %v6984_v51  ;;  %v2586_v26 = vsel %vm1180_vm2, %v2570_v56, %v2585_v28  ;;  %v2361_v33 = vpop.f32.mrf.mxu3  ;;  %v2528_v14 = vrot.slane %v2509_v59, 4  ;;  %v2526_v4 = vrot.slane %v2521_v8, 4 }
 0x3db   : > { %v2584_v0 = vsel %vm1180_vm2, %v2583_v36, %v2558_v27  ;;  %v2380_v30 = vpop.f32.mrf.mxu0  ;;  %v2594_v60 = vperm.slane %v2586_v26, %v6984_v51  ;;  %v2597_v35 = vrot.slane %v2582_v2, 4  ;;  %v2523_v19 = vsel %vm1180_vm2, %v2522_v11, %v2505_v44  ;;  %v5786_v26 = vld [vmem:[%s838_s5] sm:$0xff] }
 0x3dc   : > { %v2590_v9 = vperm.slane %v2584_v0, %v6984_v51  ;;  %v2595_v29 = vrot.slane %v2578_v57, 4  ;;  %v2524_v20 = vrot.slane %v2505_v44, 4  ;;  %v2529_v22 = vsel %vm1180_vm2, %v2521_v8, %v2528_v14  ;;  %v5787_v0 = vld [vmem:[%s838_s5 + $0x8] sm:$0xff]  ;;  %v5790_v44 = vld [vmem:[%s858_s2] sm:$0xff] }
 0x3dd   : > { %v2598_v45 = vsel %vm1180_vm2, 0.0, %v2597_v35  ;;  %v2601_v41 = vrot.slane %v2594_v60, 4  ;;  %v2603_v43 = vsel %vm1180_vm2, %v2597_v35, %v2578_v57  ;;  %v2527_v28 = vsel %vm1180_vm2, %v2526_v4, %v2509_v59  ;;  %2698 = vmatpush.bf16.msra.mxu3 %v5787_v0  ;;  %v1056_v11 = vld [vmem:[%s8605_s13] sm:$0xff]  ;;  %v1059_v0 = vld [vmem:[%s8605_s13 + $0x18] sm:$0xff] }
 0x3de   : > { %v2596_v39 = vsel %vm1180_vm2, 0.0, %v2595_v29  ;;  %v2599_v58 = vrot.slane %v2590_v9, 4  ;;  %v2608_v52 = vrot.slane %v2598_v45, 4  ;;  %v2607_v50 = vperm.slane %v2603_v43, %v6972_v34 }
 0x3df   : > { %v2602_v48 = vsel %vm1180_vm2, 0.0, %v2601_v41  ;;  %v2614_v62 = vsel %vm1180_vm2, %v2601_v41, %v2590_v9  ;;  %v2525_v3 = vsel %vm1180_vm2, %v2517_v37, %v2524_v20  ;;  %v6589_v14 = vmov 32.0  }
 0x3e0   : > { %v2600_v23 = vsel %vm1180_vm2, 0.0, %v2599_v58  ;;  %v2609_v1 = vsel %vm1180_vm2, %v2608_v52, %v2596_v39  ;;  %v2619_v42 = vrot.slane %v2602_v48, 4  ;;  %v2618_v5 = vperm.slane %v2614_v62, %v6972_v34  ;;  %v5791_v52 = vld [vmem:[%s858_s2 + $0x8] sm:$0xff]  ;;  %v6052_v62 = vld [vmem:[%s6927_s11 + $0x3] ss:$0 sm:$0xff] }
 0x3e1   : > { %v2613_v12 = vperm.slane %v2609_v1, %v6972_v34  ;;  %v2627_v61 = vrot.slane %v2607_v50, 4  ;;  %2699 = vmatpush.bf16.msra.mxu3 %v5786_v26  ;;  %2841 = vmatpush.bf16.msrb.mxu1 %v5791_v52  ;;  %v1057_v48 = vld [vmem:[%s8605_s13 + $0x8] sm:$0xff]  ;;  %v6143_v1 = vld [vmem:[#allocation16] sm:$0xff]  ;;  %6097 = vrcp.f32 %v6589_v14 }
 0x3e2   : > { %v2620_v53 = vsel %vm1180_vm2, %v2619_v42, %v2600_v23  ;;  %v2639_v13 = vrot.slane %v2618_v5, 4  ;;  %v5788_v26 = vld [vmem:[%s848_s3] sm:$0xff] }
 0x3e3   : > { %v2624_v49 = vperm.slane %v2620_v53, %v6972_v34  ;;  %v2628_v15 = vsel %vm1180_vm2, %v2613_v12, %v2627_v61  ;;  %v2625_v7 = vrot.slane %v2613_v12, 4  ;;  %v6144_v61 = vld [vmem:[#allocation16 + $0x8] sm:$0xff] }
 0x3e4   : > { %v2636_v47 = vperm.slane %v2628_v15, %v6984_v51 }
 0x3e5   : > { %v2640_v10 = vsel %vm1180_vm2, %v2624_v49, %v2639_v13  ;;  %v2626_v38 = vsel %vm1180_vm2, %v2625_v7, %v2607_v50  ;;  %v2637_v55 = vrot.slane %v2624_v49, 4  ;;  %v2813_v50 = vpack.c.bf16 %v1057_v48, %v1056_v11  ;;  %2842 = vmatpush.bf16.msrb.mxu1 %v5790_v44  ;;  %v6054_v48 = vld [vmem:[%s6927_s11 + $0x9] ss:$0 sm:$0xff] }
 0x3e6   : > { %v2648_v32 = vperm.slane %v2640_v10, %v6984_v51  ;;  %v2655_v46 = vrot.slane %v2636_v47, 4  ;;  %v2632_v17 = vperm.slane %v2626_v38, %v6984_v51 }
 0x3e7   : > { %v2638_v27 = vsel %vm1180_vm2, %v2637_v55, %v2618_v5  ;;  %v6098_v49 = vpop.eup %6097 }
 0x3e8   : > { %v2656_v63 = vsel %vm1180_vm2, %v2648_v32, %v2655_v46  ;;  %v2653_v56 = vrot.slane %v2648_v32, 4  ;;  %v2644_v24 = vperm.slane %v2638_v27, %v6984_v51  ;;  %v2651_v18 = vrot.slane %v2632_v17, 4  ;;  %5701 = vmatmul.msk.bf16.vlgmr.msrb.gmra.mxu1 %vm1083_vm1, %v2813_v50 }
 0x3e9   : > { %v5969_v21 = vpack.i.bf16 %v2656_v63, %v2529_v22  ;;  %v2721_v15 = vmul.f32 32.0, %v6098_v49  ;;  %vm2725_vm13 = vweird.f32 %v6098_v49 }
 0x3ea   : > { %v2654_v6 = vsel %vm1180_vm2, %v2653_v56, %v2636_v47  ;;  %v2649_v36 = vrot.slane %v2644_v24, 4  ;;  %v2652_v54 = vsel %vm1180_vm2, %v2644_v24, %v2651_v18  ;;  %v7534_v18 = vld [vmem:[%s6927_s11 + $0x5] ss:$0 sm:$0xff] }
 0x3eb   : > { %5970 = vrot.lane.b32.xlu1 %v5969_v21, %s6586_s20  ;;  %v5964_v57 = vpack.i.bf16 %v2654_v6, %v2527_v28  ;;  %v5959_v2 = vpack.i.bf16 %v2652_v54, %v2525_v3  ;;  %v2722_v7 = vsub.f32 1.0, %v2721_v15 }
 0x3ec   : > { %v2650_v40 = vsel %vm1180_vm2, %v2649_v36, %v2632_v17 }
 0x3ed   : > { %5965 = vrot.lane.b32.xlu2 %v5964_v57, %s6587_s23  ;;  %5960 = vrot.lane.b32.xlu0 %v5959_v2, %s6588_s17  ;;  %v2723_v47 = vmul.f32 %v6098_v49, %v2722_v7  ;;  %v5789_v2 = vld [vmem:[%s848_s3 + $0x8] sm:$0xff] }
 0x3ee   : > { %2801 = vmatpush.bf16.msrb.mxu0 %v5789_v2 }
 0x3ef   : > { %v2724_v10 = vadd.f32 %v6098_v49, %v2723_v47 }
 0x3f1   : > { %v7527_v4 = vsel %vm2725_vm13, %v6098_v49, %v2724_v10 }
 0x3f2   : > { %2802 = vmatpush.bf16.msrb.mxu0 %v5788_v26 }
 0x447   : > { %v5966_v33 = vpop.permute.xlu2 %5965 }
 0x448   : > { %v5968_v60 = vunpack.i.h.bf16 %v5966_v33  ;;  %v5967_v29 = vunpack.i.l.bf16 %v5966_v33 }
 0x45d   : > { %v5971_v30 = vpop.permute.xlu1 %5970 }
 0x45e   : > { %v5973_v35 = vunpack.i.h.bf16 %v5971_v30  ;;  %v5972_v59 = vunpack.i.l.bf16 %v5971_v30 }
 0x45f   : > { %v5961_v25 = vpop.permute.xlu0 %5960 }
 0x460   : > { %v5963_v31 = vunpack.i.h.bf16 %v5961_v25  ;;  %v5962_v9 = vunpack.i.l.bf16 %v5961_v25 }
 0x462   : > { %v2542_v16 = vsel %vm1914_vm3, %v2523_v19, %v5962_v9  ;;  %v2669_v37 = vsel %vm1914_vm3, %v2650_v40, %v5963_v31  ;;  %v1058_v40 = vld [vmem:[%s8605_s13 + $0x10] sm:$0xff] }
 0x463   : > { %v2544_v39 = vsel %vm2543_vm11, %v2542_v16, %v5967_v29  ;;  %v2670_v45 = vsel %vm2543_vm11, %v2669_v37, %v5968_v60  ;;  %v2814_v33 = vpack.c.bf16 %v1059_v0, %v1058_v40 }
 0x464   : > { %v2546_v58 = vsel %vm2545_vm12, %v2544_v39, %v5972_v59  ;;  %v2671_v41 = vsel %vm2545_vm12, %v2670_v45, %v5973_v35 }
 0x465   : > { %v2676_v43 = vpack.c.bf16 %v2671_v41, %v2546_v58  ;;  %v2844_v24 = vpop.f32.mrf.mxu1  ;;  %5702 = vmatmul.msk.bf16.gmra.mxu1 %vm1083_vm1, %v2814_v33 }
 0x466   : > { %v7537_v28 = vadd.f32 %v7534_v18, %v2844_v24 }
 0x467   : > { %5683 = vmatmul.msk.bf16.vlgmr.msra.gmra.mxu3 %vm1083_vm1, %v2676_v43  ;;  %v6053_v43 = vld [vmem:[%s6927_s11 + $0x8] ss:$0 sm:$0xff] }
 0x468   : > { %v3169_v15 = vrot.slane %v7537_v28, 4 }
 0x46d   : > { %v2846_v21 = vpop.f32.mrf.mxu1 }
 0x46e   : > { %v7540_v6 = vadd.f32 %v7534_v18, %v2846_v21 }
 0x470   : > { %v5979_v3 = vpack.i.bf16 %v7540_v6, %v7537_v28  ;;  %v3225_v7 = vrot.slane %v7540_v6, 4 }
 0x4ea   : > { %v2701_v23 = vpop.f32.mrf.mxu3 }
 0x4eb   : > { %v2706_v42 = vadd.f32 %v6143_v1, %v2701_v23 }
 0x4ed   : > { %v2710_v5 = vadd.f32 %v6052_v62, %v2706_v42 }
 0x4ef   : > { %v2714_v19 = vsel %vm1083_vm1, %v2710_v5, 0.0 }
 0x4f0   : > { %2715 = vadd.xlane.f32.xlu0 %v2714_v19  ;;  %v6145_v19 = vld [vmem:[#allocation5] sm:$0xff] }
 0x4f2   : > { %v2703_v12 = vpop.f32.mrf.mxu3 }
 0x4f3   : > { %v2707_v8 = vadd.f32 %v6144_v61, %v2703_v12  ;;  %v6146_v61 = vld [vmem:[#allocation5 + $0x8] sm:$0xff] }
 0x4f5   : > { %v2711_v53 = vadd.f32 %v6052_v62, %v2707_v8 }
 0x4f7   : > { %v2717_v13 = vsel %vm1083_vm1, %v2711_v53, 0.0 }
 0x4f8   : > { %2718 = vadd.xlane.f32.xlu2 %v2717_v13 }
 0x510   : > { %5975 = vrot.lane.b32.xlu2 %v5979_v3, %s6582_s22 }
 0x563   : > { %v2716_v38 = vpop.xlane.xlu0 %2715 }
 0x564   : > { %v2727_v55 = vmul.f32 %v7527_v4, %v2716_v38 }
 0x566   : > { %v2729_v32 = vsub.f32 %v2710_v5, %v2727_v55 }
 0x568   : > { %v2731_v46 = vmul.f32 %v2729_v32, %v2729_v32 }
 0x56a   : > { %v2733_v20 = vsel %vm1083_vm1, %v2731_v46, 0.0 }
 0x56b   : > { %2734 = vadd.xlane.f32.xlu1 %v2733_v20  ;;  %v2719_v17 = vpop.xlane.xlu2 %2718 }
 0x56c   : > { %v2728_v22 = vmul.f32 %v7527_v4, %v2719_v17 }
 0x56e   : > { %v2730_v27 = vsub.f32 %v2711_v53, %v2728_v22 }
 0x570   : > { %v2732_v63 = vmul.f32 %v2730_v27, %v2730_v27 }
 0x572   : > { %v2736_v56 = vsel %vm1083_vm1, %v2732_v63, 0.0 }
 0x573   : > { %2737 = vadd.xlane.f32.xlu0 %v2736_v56  ;;  %v5976_v13 = vpop.permute.xlu2 %5975 }
 0x574   : > { %v5978_v14 = vunpack.i.h.bf16 %v5976_v13  ;;  %v5977_v49 = vunpack.i.l.bf16 %v5976_v13 }
 0x576   : > { %v3237_v55 = vrot.slane %v5978_v14, 4 }
 0x584   : > { %5985 = vrot.lane.b32.xlu1 %v5979_v3, %s6581_s15 }
 0x587   : > { %5980 = vrot.lane.b32.xlu0 %v5979_v3, %s6583_s18 }
 0x5de   : > { %v2735_v36 = vpop.xlane.xlu1 %2734 }
 0x5df   : > { %v2739_v54 = vmul.f32 %v2735_v36, %v7527_v4 }
 0x5e1   : > { %v2741_v57 = vadd.f32 1e-05, %v2739_v54 }
 0x5e3   : > { %6099 = vrsqrt.f32 %v2741_v57  ;;  %vm2749_vm15 = vweird.f32 %v2741_v57 }
 0x5e6   : > { %v2738_v30 = vpop.xlane.xlu0 %2737 }
 0x5e7   : > { %v2740_v25 = vmul.f32 %v2738_v30, %v7527_v4 }
 0x5e9   : > { %v6100_v31 = vpop.eup %6099  ;;  %v2742_v9 = vadd.f32 1e-05, %v2740_v25 }
 0x5ea   : > { %v2744_v60 = vmul.f32 %v6100_v31, %v2741_v57  ;;  %vm2750_vm14 = vweird.f32 %v6100_v31 }
 0x5eb   : > { %6101 = vrsqrt.f32 %v2742_v9  ;;  %vm2751_vm0 = vmor %vm2749_vm15, %vm2750_vm14  ;;  %vm2759_vm5 = vweird.f32 %v2742_v9 }
 0x5ec   : > { %v2745_v29 = vmul.f32 %v6100_v31, %v2744_v60 }
 0x5ee   : > { %v2746_v35 = vmul.f32 0.5, %v2745_v29 }
 0x5f0   : > { %v2747_v59 = vsub.f32 1.5, %v2746_v35 }
 0x5f1   : > { %v6102_v16 = vpop.eup %6101 }
 0x5f2   : > { %v2748_v37 = vmul.f32 %v6100_v31, %v2747_v59  ;;  %v2754_v39 = vmul.f32 %v6102_v16, %v2742_v9  ;;  %vm2760_vm4 = vweird.f32 %v6102_v16 }
 0x5f3   : > { %vm2761_vm6 = vmor %vm2759_vm5, %vm2760_vm4 }
 0x5f4   : > { %v2752_v45 = vsel %vm2751_vm0, %v6100_v31, %v2748_v37  ;;  %v2755_v58 = vmul.f32 %v6102_v16, %v2754_v39 }
 0x5f5   : > { %v2763_v52 = vmul.f32 %v2752_v45, %v2729_v32  ;;  %v3181_v32 = vrot.slane %v5977_v49, 4 }
 0x5f6   : > { %v2756_v41 = vmul.f32 0.5, %v2755_v58  ;;  %v5986_v46 = vpop.permute.xlu1 %5985 }
 0x5f7   : > { %v2766_v50 = vmul.f32 %v6053_v43, %v2763_v52  ;;  %v5988_v24 = vunpack.i.h.bf16 %v5986_v46  ;;  %v5987_v21 = vunpack.i.l.bf16 %v5986_v46 }
 0x5f8   : > { %v2757_v44 = vsub.f32 1.5, %v2756_v41 }
 0x5f9   : > { %v7562_v1 = vadd.f32 %v6054_v48, %v2766_v50  ;;  %v5981_v47 = vpop.permute.xlu0 %5980  ;;  %v3235_v0 = vrot.slane %v5988_v24, 4  ;;  %v3179_v26 = vrot.slane %v5987_v21, 4  ;;  %v3182_v33 = vsel %vm1180_vm2, %v5987_v21, %v3181_v32 }
 0x5fa   : > { %v2758_v11 = vmul.f32 %v6102_v16, %v2757_v44  ;;  %v5983_v10 = vunpack.i.h.bf16 %v5981_v47  ;;  %v5982_v38 = vunpack.i.l.bf16 %v5981_v47  ;;  %v3238_v30 = vsel %vm1180_vm2, %v5988_v24, %v3237_v55 }
 0x5fb   : > { %v2771_v12 = vadd.f32 %v6145_v19, %v7562_v1  ;;  %v3190_v31 = vperm.slane %v3182_v33, %v6972_v34  ;;  %v3236_v60 = vsel %vm1180_vm2, %v3235_v0, %v5978_v14 }
 0x5fc   : > { %v2762_v62 = vsel %vm2761_vm6, %v6102_v16, %v2758_v11  ;;  %v3223_v20 = vrot.slane %v5983_v10, 4  ;;  %v3226_v17 = vsel %vm1180_vm2, %v5983_v10, %v3225_v7  ;;  %v3167_v22 = vrot.slane %v5982_v38, 4 }
 0x5fd   : > { %v2764_v23 = vmul.f32 %v2762_v62, %v2730_v27  ;;  %v3170_v27 = vsel %vm1180_vm2, %v5982_v38, %v3169_v15  ;;  %v3234_v63 = vperm.slane %v3226_v17, %v6972_v34  ;;  %v3203_v35 = vrot.slane %v3190_v31, 4 }
 0x5fe   : > { %v3178_v56 = vperm.slane %v3170_v27, %v6972_v34  ;;  %v3224_v3 = vsel %vm1180_vm2, %v3223_v20, %v7540_v6  ;;  %v3168_v36 = vsel %vm1180_vm2, %v3167_v22, %v7537_v28  ;;  %v3246_v6 = vperm.slane %v3238_v30, %v6972_v34 }
 0x5ff   : > { %v2767_v42 = vmul.f32 %v6053_v43, %v2764_v23  ;;  %v3230_v54 = vperm.slane %v3224_v3, %v6972_v34  ;;  %v3261_v57 = vrot.slane %v3234_v63, 4  ;;  %v3174_v2 = vperm.slane %v3168_v36, %v6972_v34 }
 0x600   : > { %v3205_v40 = vrot.slane %v3178_v56, 4  ;;  %v3180_v28 = vsel %vm1180_vm2, %v3179_v26, %v5977_v49  ;;  %v3242_v16 = vperm.slane %v3236_v60, %v6972_v34  ;;  %v3259_v39 = vrot.slane %v3246_v6, 4 }
 0x601   : > { %v7564_v5 = vadd.f32 %v6054_v48, %v2767_v42  ;;  %v3193_v25 = vrot.slane %v3174_v2, 4  ;;  %v3249_v9 = vrot.slane %v3230_v54, 4  ;;  %v3186_v29 = vperm.slane %v3180_v28, %v6972_v34 }
 0x602   : > { %v3206_v59 = vsel %vm1180_vm2, %v3190_v31, %v3205_v40  ;;  %v3262_v45 = vsel %vm1180_vm2, %v3246_v6, %v3261_v57  ;;  %v3204_v43 = vsel %vm1180_vm2, %v3203_v35, %v3178_v56  ;;  %v3247_v52 = vrot.slane %v3242_v16, 4 }
 0x603   : > { %v2772_v8 = vadd.f32 %v6146_v61, %v7564_v5  ;;  %v3214_v37 = vperm.slane %v3206_v59, %v6984_v51  ;;  %v3191_v58 = vrot.slane %v3186_v29, 4  ;;  %v3194_v41 = vsel %vm1180_vm2, %v3186_v29, %v3193_v25 }
 0x604   : > { %v3202_v44 = vperm.slane %v3194_v41, %v6984_v51  ;;  %v3210_v11 = vperm.slane %v3204_v43, %v6984_v51  ;;  %v3250_v50 = vsel %vm1180_vm2, %v3242_v16, %v3249_v9  ;;  %v3248_v23 = vsel %vm1180_vm2, %v3247_v52, %v3230_v54 }
 0x605   : > { %v2777_v53 = vpack.c.bf16 %v2772_v8, %v2771_v12  ;;  %v3221_v48 = vrot.slane %v3214_v37, 4  ;;  %v3192_v62 = vsel %vm1180_vm2, %v3191_v58, %v3174_v2  ;;  %v3258_v42 = vperm.slane %v3250_v50, %v6984_v51 }
 0x606   : > { %v3260_v19 = vsel %vm1180_vm2, %v3259_v39, %v3234_v63  ;;  %v3198_v12 = vperm.slane %v3192_v62, %v6984_v51  ;;  %v3217_v61 = vrot.slane %v3202_v44, 4  ;;  %v3219_v8 = vrot.slane %v3210_v11, 4 }
 0x607   : > { %5692 = vmatmul.msk.bf16.vlgmr.msrb.gmra.mxu0 %vm1083_vm1, %v2777_v53  ;;  %v3222_v53 = vsel %vm1180_vm2, 0.0, %v3221_v48  ;;  %v3254_v13 = vperm.slane %v3248_v23, %v6984_v51  ;;  %v3266_v14 = vperm.slane %v3260_v19, %v6984_v51  ;;  %v3270_v49 = vperm.slane %v3262_v45, %v6984_v51 }
 0x608   : > { %v3273_v15 = vrot.slane %v3258_v42, 4  ;;  %v3215_v7 = vrot.slane %v3198_v12, 4  ;;  %v3218_v47 = vsel %vm1180_vm2, 0.0, %v3217_v61  ;;  %v3220_v10 = vsel %vm1180_vm2, 0.0, %v3219_v8 }
 0x609   : > { %v3290_v38 = vsel %vm1180_vm2, %v3221_v48, %v3210_v11  ;;  %v3271_v55 = vrot.slane %v3254_v13, 4  ;;  %v3275_v46 = vrot.slane %v3266_v14, 4  ;;  %v3277_v20 = vrot.slane %v3270_v49, 4 }
 0x60a   : > { %v3274_v32 = vsel %vm1180_vm2, 0.0, %v3273_v15  ;;  %v3216_v17 = vsel %vm1180_vm2, 0.0, %v3215_v7  ;;  %v3284_v22 = vrot.slane %v3218_v47, 4  ;;  %v3294_v27 = vperm.slane %v3290_v38, %v6972_v34 }
 0x60b   : > { %v3295_v63 = vrot.slane %v3222_v53, 4  ;;  %v3272_v56 = vsel %vm1180_vm2, 0.0, %v3271_v55  ;;  %v3276_v24 = vsel %vm1180_vm2, 0.0, %v3275_v46  ;;  %v3278_v21 = vsel %vm1180_vm2, 0.0, %v3277_v20 }
 0x60c   : > { %v3338_v3 = vrot.slane %v3274_v32, 4  ;;  %v3344_v54 = vsel %vm1180_vm2, %v3277_v20, %v3266_v14  ;;  %v3349_v57 = vrot.slane %v3278_v21, 4  ;;  %v3279_v2 = vsel %vm1180_vm2, %v3217_v61, %v3198_v12 }
 0x60d   : > { %v3296_v36 = vsel %vm1180_vm2, %v3295_v63, %v3220_v10  ;;  %v3348_v0 = vperm.slane %v3344_v54, %v6972_v34  ;;  %v3283_v26 = vperm.slane %v3279_v2, %v6972_v34  ;;  %v3285_v33 = vsel %vm1180_vm2, %v3284_v22, %v3216_v17 }
 0x60e   : > { %v3300_v40 = vperm.slane %v3296_v36, %v6972_v34  ;;  %v3350_v30 = vsel %vm1180_vm2, %v3349_v57, %v3276_v24  ;;  %v3289_v25 = vperm.slane %v3285_v33, %v6972_v34  ;;  %v3333_v31 = vsel %vm1180_vm2, %v3273_v15, %v3254_v13 }
 0x60f   : > { %v3339_v6 = vsel %vm1180_vm2, %v3338_v3, %v3272_v56  ;;  %v3354_v9 = vperm.slane %v3350_v30, %v6972_v34  ;;  %v3337_v60 = vperm.slane %v3333_v31, %v6972_v34  ;;  %v3303_v59 = vrot.slane %v3283_v26, 4 }
 0x610   : > { %v3313_v28 = vrot.slane %v3300_v40, 4  ;;  %v3343_v29 = vperm.slane %v3339_v6, %v6972_v34  ;;  %v3301_v35 = vrot.slane %v3289_v25, 4  ;;  %v3315_v16 = vrot.slane %v3294_v27, 4 }
 0x611   : > { %v3367_v45 = vrot.slane %v3354_v9, 4  ;;  %v3357_v58 = vrot.slane %v3337_v60, 4  ;;  %v3304_v52 = vsel %vm1180_vm2, %v3289_v25, %v3303_v59  ;;  %v3369_v53 = vrot.slane %v3348_v0, 4 }
 0x612   : > { %v3314_v37 = vsel %vm1180_vm2, %v3313_v28, %v3294_v27  ;;  %v3355_v39 = vrot.slane %v3343_v29, 4  ;;  %v3302_v41 = vsel %vm1180_vm2, %v3301_v35, %v3283_v26  ;;  %v3316_v44 = vsel %vm1180_vm2, %v3300_v40, %v3315_v16 }
 0x613   : > { %v3320_v43 = vperm.slane %v3314_v37, %v6984_v51  ;;  %v3308_v11 = vperm.slane %v3302_v41, %v6984_v51  ;;  %v3368_v50 = vsel %vm1180_vm2, %v3367_v45, %v3348_v0  ;;  %v3312_v62 = vperm.slane %v3304_v52, %v6984_v51  ;;  %v5793_v45 = vld [vmem:[%s868_s8 + $0x8] sm:$0xff]  ;;  %v5792_v41 = vld [vmem:[%s868_s8] sm:$0xff] }
 0x614   : > { %v3356_v48 = vsel %vm1180_vm2, %v3355_v39, %v3337_v60  ;;  %v3374_v19 = vperm.slane %v3368_v50, %v6984_v51  ;;  %v3324_v12 = vperm.slane %v3316_v44, %v6984_v51  ;;  %v3358_v8 = vsel %vm1180_vm2, %v3343_v29, %v3357_v58  ;;  %v2849_v58 = vpop.f32.mrf.mxu1  ;;  %2886 = vmatpush.bf16.msrb.mxu2 %v5793_v45  ;;  %v1053_v52 = vld [vmem:[%s8606_s30 + $0x8] sm:$0xff] }
 0x615   : > { %v3325_v23 = vrot.slane %v3320_v43, 4  ;;  %v3362_v42 = vperm.slane %v3356_v48, %v6984_v51  ;;  %v3327_v61 = vrot.slane %v3308_v11, 4  ;;  %v3331_v13 = vrot.slane %v3312_v62, 4 }
 0x616   : > { %v3379_v49 = vrot.slane %v3374_v19, 4  ;;  %v3329_v7 = vrot.slane %v3324_v12, 4  ;;  %v3366_v38 = vperm.slane %v3358_v8, %v6984_v51  ;;  %v3370_v55 = vsel %vm1180_vm2, %v3354_v9, %v3369_v53 }
 0x617   : > { %v3326_v14 = vsel %vm1180_vm2, %v3325_v23, %v3308_v11  ;;  %v3381_v15 = vrot.slane %v3362_v42, 4  ;;  %v3328_v10 = vsel %vm1180_vm2, %v3320_v43, %v3327_v61  ;;  %v3378_v56 = vperm.slane %v3370_v55, %v6984_v51  ;;  %v1052_v43 = vld [vmem:[%s8606_s30] sm:$0xff] }
 0x618   : > { %v3627_v47 = vpack.c.bf16 %v3326_v14, %v3326_v14  ;;  %v3380_v32 = vsel %vm1180_vm2, %v3379_v49, %v3362_v42  ;;  %v3629_v20 = vpack.c.bf16 %v3328_v10, %v3328_v10  ;;  %v3330_v17 = vsel %vm1180_vm2, %v3329_v7, %v3312_v62  ;;  %2887 = vmatpush.bf16.msrb.mxu2 %v5792_v41  ;;  %v6056_v11 = vld [vmem:[%s6927_s11 + $0x4] ss:$0 sm:$0xff] }
 0x619   : > { %v3382_v46 = vsel %vm1180_vm2, %v3374_v19, %v3381_v15  ;;  %v3628_v22 = vpack.c.bf16 %v3380_v32, %v3380_v32  ;;  %v3631_v21 = vpack.c.bf16 %v3330_v17, %v3330_v17  ;;  %v3332_v3 = vsel %vm1180_vm2, %v3324_v12, %v3331_v13 }
 0x61a   : > { %v4141_v27 = vunpack.c.l.b16 %v3627_v47  ;;  %v3630_v63 = vpack.c.bf16 %v3382_v46, %v3382_v46  ;;  %v4165_v24 = vunpack.c.l.b16 %v3629_v20  ;;  %v3385_v36 = vrot.slane %v3366_v38, 4 }
 0x61b   : > { %v4142_v54 = vunpack.c.l.b16 %v3628_v22  ;;  %v3383_v2 = vrot.slane %v3378_v56, 4  ;;  %v3633_v40 = vpack.c.bf16 %v3332_v3, %v3332_v3  ;;  %v4189_v6 = vunpack.c.l.b16 %v3631_v21 }
 0x61c   : > { %v4166_v57 = vunpack.c.l.b16 %v3630_v63  ;;  %v3386_v0 = vsel %vm1180_vm2, %v3378_v56, %v3385_v36  ;;  %v2858_v44 = vpack.c.bf16 %v1053_v52, %v1052_v43  ;;  %v2851_v50 = vpop.f32.mrf.mxu1  ;;  %v2850_v23 = vadd.f32 %v7534_v18, %v2849_v58 }
 0x61d   : > { %v4143_v26 = vpack.c.b16 %v4142_v54, %v4141_v27  ;;  %v3384_v30 = vsel %vm1180_vm2, %v3383_v2, %v3366_v38  ;;  %v3634_v25 = vpack.c.bf16 %v3386_v0, %v3386_v0  ;;  %v4213_v9 = vunpack.c.l.b16 %v3633_v40 }
 0x61e   : > { %v4167_v33 = vpack.c.b16 %v4166_v57, %v4165_v24  ;;  %v3632_v31 = vpack.c.bf16 %v3384_v30, %v3384_v30  ;;  %5711 = vmatmul.msk.bf16.vlgmr.msrb.gmra.mxu2 %vm1083_vm1, %v2858_v44  ;;  %v2852_v42 = vadd.f32 %v7534_v18, %v2851_v50  ;;  %v3409_v55 = vrot.slane %v2850_v23, 4 }
 0x61f   : > { %v4148_v28 = vsel %vm1914_vm3, %v4143_v26, 0  ;;  %v4214_v29 = vunpack.c.l.b16 %v3634_v25 }
 0x620   : > { %v4172_v60 = vsel %vm1914_vm3, %v4167_v33, 0  ;;  %4157 = vmatpush.bf16.xpose.msrb.mxu3 %v4148_v28  ;;  %v4190_v35 = vunpack.c.l.b16 %v3632_v31  ;;  %v5999_v19 = vpack.i.bf16 %v2852_v42, %v2850_v23  ;;  %v3465_v7 = vrot.slane %v2852_v42, 4 }
 0x621   : > { %4181 = vmatpush.bf16.xpose.msra.mxu0 %v4172_v60  ;;  %v4215_v59 = vpack.c.b16 %v4214_v29, %v4213_v9 }
 0x622   : > { %v4191_v16 = vpack.c.b16 %v4190_v35, %v4189_v6 }
 0x623   : > { %v4220_v37 = vsel %vm1914_vm3, %v4215_v59, 0 }
 0x624   : > { %v4196_v39 = vsel %vm1914_vm3, %v4191_v16, 0 }
 0x628   : > { %4205 = vmatpush.bf16.xpose.msra.mxu3 %v4196_v39 }
 0x629   : > { %4229 = vmatpush.bf16.xpose.msrb.mxu0 %v4220_v37 }
 0x684   : > { %v2804_v48 = vpop.f32.mrf.mxu0 }
 0x685   : > { %v2805_v62 = vadd.f32 %v6056_v11, %v2804_v48 }
 0x687   : > { %2906 = vrot.lane.b32.xlu1 %v2805_v62, %s6581_s15  ;;  %2903 = vrot.lane.b32.xlu2 %v2805_v62, %s6583_s18  ;;  %v2911_v49 = vrot.slane %v2805_v62, 4 }
 0x688   : > { %2900 = vrot.lane.b32.xlu0 %v2805_v62, %s6582_s22 }
 0x68c   : > { %v2806_v12 = vpop.f32.mrf.mxu0 }
 0x68d   : > { %v2807_v61 = vadd.f32 %v6056_v11, %v2806_v12 }
 0x68f   : > { %6000 = vrot.lane.b32.xlu1 %v5999_v19, %s6581_s15  ;;  %5995 = vrot.lane.b32.xlu2 %v5999_v19, %s6583_s18  ;;  %v3031_v22 = vrot.slane %v2807_v61, 4 }
 0x690   : > { %5990 = vrot.lane.b32.xlu0 %v5999_v19, %s6582_s22 }
 0x697   : > { %3026 = vrot.lane.b32.xlu1 %v2807_v61, %s6581_s15  ;;  %3023 = vrot.lane.b32.xlu2 %v2807_v61, %s6583_s18 }
 0x698   : > { %3020 = vrot.lane.b32.xlu0 %v2807_v61, %s6582_s22 }
 0x6e1   : > { %v2904_v8 = vpop.permute.xlu2 %2903 }
 0x6e2   : > { %v2909_v14 = vrot.slane %v2904_v8, 4  ;;  %v2912_v38 = vsel %vm1180_vm2, %v2904_v8, %v2911_v49 }
 0x6e3   : > { %v2920_v63 = vperm.slane %v2912_v38, %v6972_v34 }
 0x6e4   : > { %v2910_v10 = vsel %vm1180_vm2, %v2909_v14, %v2805_v62 }
 0x6e5   : > { %v2916_v27 = vperm.slane %v2910_v10, %v6972_v34  ;;  %v2947_v9 = vrot.slane %v2920_v63, 4 }
 0x6e7   : > { %v2935_v30 = vrot.slane %v2916_v27, 4 }
 0x6e9   : > { %v5996_v53 = vpop.permute.xlu2 %5995 }
 0x6ea   : > { %v5998_v18 = vunpack.i.h.bf16 %v5996_v53  ;;  %v5997_v13 = vunpack.i.l.bf16 %v5996_v53 }
 0x6ec   : > { %v3463_v15 = vrot.slane %v5998_v18, 4  ;;  %v3407_v47 = vrot.slane %v5997_v13, 4  ;;  %v3466_v32 = vsel %vm1180_vm2, %v5998_v18, %v3465_v7  ;;  %v3410_v17 = vsel %vm1180_vm2, %v5997_v13, %v3409_v55 }
 0x6ed   : > { %v7689_v21 = vperm.slane %v3466_v32, %v6972_v34  ;;  %v7696_v40 = vperm.slane %v3410_v17, %v6972_v34 }
 0x6ee   : > { %v3464_v20 = vsel %vm1180_vm2, %v3463_v15, %v2852_v42  ;;  %v3408_v56 = vsel %vm1180_vm2, %v3407_v47, %v2850_v23 }
 0x6ef   : > { %v7693_v2 = vperm.slane %v3464_v20, %v6972_v34  ;;  %v7699_v26 = vperm.slane %v3408_v56, %v6972_v34  ;;  %v3501_v28 = vrot.slane %v7689_v21, 4  ;;  %v3445_v59 = vrot.slane %v7696_v40, 4  ;;  %v1055_v56 = vld [vmem:[%s8606_s30 + $0x18] sm:$0xff] }
 0x6f1   : > { %v3024_v46 = vpop.permute.xlu2 %3023  ;;  %v3489_v35 = vrot.slane %v7693_v2, 4  ;;  %v3433_v39 = vrot.slane %v7699_v26, 4 }
 0x6f2   : > { %v3029_v3 = vrot.slane %v3024_v46, 4  ;;  %v3032_v36 = vsel %vm1180_vm2, %v3024_v46, %v3031_v22 }
 0x6f3   : > { %v7703_v25 = vperm.slane %v3032_v36, %v6972_v34 }
 0x6f4   : > { %v3030_v60 = vsel %vm1180_vm2, %v3029_v3, %v2807_v61 }
 0x6f5   : > { %v7717_v43 = vperm.slane %v3030_v60, %v6972_v34  ;;  %v3067_v52 = vrot.slane %v7703_v25, 4 }
 0x6f7   : > { %v3055_v38 = vrot.slane %v7717_v43, 4 }
 0x6f9   : > { %v2907_v24 = vpop.permute.xlu1 %2906 }
 0x6fa   : > { %v2921_v54 = vrot.slane %v2907_v24, 4  ;;  %v2901_v57 = vpop.permute.xlu0 %2900 }
 0x6fb   : > { %v2923_v0 = vrot.slane %v2901_v57, 4 }
 0x6fc   : > { %v2922_v33 = vsel %vm1180_vm2, %v2921_v54, %v2901_v57 }
 0x6fd   : > { %v2924_v31 = vsel %vm1180_vm2, %v2907_v24, %v2923_v0  ;;  %v2928_v6 = vperm.slane %v2922_v33, %v6972_v34 }
 0x6fe   : > { %v2932_v29 = vperm.slane %v2924_v31, %v6972_v34 }
 0x6ff   : > { %v2933_v16 = vrot.slane %v2928_v6, 4  ;;  %v2936_v37 = vsel %vm1180_vm2, %v2928_v6, %v2935_v30 }
 0x700   : > { %v2944_v45 = vperm.slane %v2936_v37, %v6984_v51  ;;  %v2945_v58 = vrot.slane %v2932_v29, 4  ;;  %v2948_v41 = vsel %vm1180_vm2, %v2932_v29, %v2947_v9 }
 0x701   : > { %v2934_v44 = vsel %vm1180_vm2, %v2933_v16, %v2916_v27  ;;  %v2956_v11 = vperm.slane %v2948_v41, %v6984_v51  ;;  %v6001_v48 = vpop.permute.xlu1 %6000 }
 0x702   : > { %v2940_v50 = vperm.slane %v2934_v44, %v6984_v51  ;;  %v2946_v62 = vsel %vm1180_vm2, %v2945_v58, %v2920_v63  ;;  %v2959_v23 = vrot.slane %v2944_v45, 4  ;;  %v6003_v42 = vunpack.i.h.bf16 %v6001_v48  ;;  %v5991_v19 = vpop.permute.xlu0 %5990  ;;  %v1054_v63 = vld [vmem:[%s8606_s30 + $0x10] sm:$0xff] }
 0x703   : > { %v2952_v12 = vperm.slane %v2946_v62, %v6984_v51  ;;  %v2963_v61 = vrot.slane %v2956_v11, 4  ;;  %v6002_v8 = vunpack.i.l.bf16 %v6001_v48  ;;  %v5993_v53 = vunpack.i.h.bf16 %v5991_v19 }
 0x704   : > { %v2957_v18 = vrot.slane %v2940_v50, 4  ;;  %v2960_v13 = vsel %vm1180_vm2, 0.0, %v2959_v23  ;;  %v2965_v14 = vsel %vm1180_vm2, %v2959_v23, %v2940_v50  ;;  %v3475_v49 = vrot.slane %v6003_v42, 4 }
 0x705   : > { %v2961_v15 = vrot.slane %v2952_v12, 4  ;;  %v2964_v7 = vsel %vm1180_vm2, 0.0, %v2963_v61  ;;  %v7729_v47 = vperm.slane %v2965_v14, %v6972_v34  ;;  %v2970_v10 = vrot.slane %v2960_v13, 4 }
 0x706   : > { %v2958_v55 = vsel %vm1180_vm2, 0.0, %v2957_v18  ;;  %v2976_v32 = vsel %vm1180_vm2, %v2963_v61, %v2952_v12  ;;  %v2981_v46 = vrot.slane %v2964_v7, 4  ;;  %v3419_v27 = vrot.slane %v6002_v8, 4 }
 0x707   : > { %v2962_v20 = vsel %vm1180_vm2, 0.0, %v2961_v15  ;;  %v2971_v17 = vsel %vm1180_vm2, %v2970_v10, %v2958_v55  ;;  %v7737_v22 = vperm.slane %v2976_v32, %v6972_v34  ;;  %v3476_v36 = vsel %vm1180_vm2, %v3475_v49, %v5993_v53 }
 0x708   : > { %v7746_v24 = vperm.slane %v2971_v17, %v6972_v34  ;;  %v2982_v3 = vsel %vm1180_vm2, %v2981_v46, %v2962_v20  ;;  %v3477_v54 = vrot.slane %v5993_v53, 4  ;;  %v2989_v0 = vrot.slane %v7729_v47, 4 }
 0x709   : > { %v7751_v57 = vperm.slane %v2982_v3, %v6972_v34  ;;  %v3482_v33 = vperm.slane %v3476_v36, %v6972_v34  ;;  %v5992_v30 = vunpack.i.l.bf16 %v5991_v19  ;;  %v7755_v31 = vpop.permute.xlu1 %3026  ;;  %v3001_v9 = vrot.slane %v7737_v22, 4 }
 0x70a   : > { %v2987_v6 = vrot.slane %v7746_v24, 4  ;;  %v3478_v60 = vsel %vm1180_vm2, %v6003_v42, %v3477_v54  ;;  %v2859_v29 = vpack.c.bf16 %v1055_v56, %v1054_v63  ;;  %v3041_v58 = vrot.slane %v7755_v31, 4  ;;  %v3021_v55 = vpop.permute.xlu0 %3020 }
 0x70b   : > { %v3486_v16 = vperm.slane %v3478_v60, %v6972_v34  ;;  %v3487_v37 = vrot.slane %v3482_v33, 4  ;;  %v3420_v45 = vsel %vm1180_vm2, %v3419_v27, %v5992_v30  ;;  %v2999_v41 = vrot.slane %v7751_v57, 4 }
 0x70c   : > { %v3421_v44 = vrot.slane %v5992_v30, 4  ;;  %v3426_v11 = vperm.slane %v3420_v45, %v6972_v34  ;;  %v3490_v48 = vsel %vm1180_vm2, %v3482_v33, %v3489_v35  ;;  %5712 = vmatmul.msk.bf16.gmra.mxu2 %vm1083_vm1, %v2859_v29 }
 0x70d   : > { %v3499_v50 = vrot.slane %v3486_v16, 4  ;;  %v3488_v62 = vsel %vm1180_vm2, %v3487_v37, %v7693_v2  ;;  %v3498_v23 = vperm.slane %v3490_v48, %v6984_v51  ;;  %v3502_v42 = vsel %vm1180_vm2, %v3486_v16, %v3501_v28 }
 0x70e   : > { %v3422_v19 = vsel %vm1180_vm2, %v6002_v8, %v3421_v44  ;;  %v3431_v12 = vrot.slane %v3426_v11, 4  ;;  %v3434_v61 = vsel %vm1180_vm2, %v3426_v11, %v3433_v39  ;;  %v3494_v35 = vperm.slane %v3488_v62, %v6984_v51 }
 0x70f   : > { %v3430_v53 = vperm.slane %v3422_v19, %v6972_v34  ;;  %v3442_v18 = vperm.slane %v3434_v61, %v6984_v51  ;;  %v3500_v2 = vsel %vm1180_vm2, %v3499_v50, %v7689_v21  ;;  %v3510_v13 = vperm.slane %v3502_v42, %v6984_v51 }
 0x710   : > { %v3432_v28 = vsel %vm1180_vm2, %v3431_v12, %v7699_v26  ;;  %v3506_v8 = vperm.slane %v3500_v2, %v6984_v51  ;;  %v3511_v14 = vrot.slane %v3494_v35, 4  ;;  %v3513_v49 = vrot.slane %v3498_v23, 4 }
 0x711   : > { %v3438_v39 = vperm.slane %v3432_v28, %v6984_v51  ;;  %v3443_v15 = vrot.slane %v3430_v53, 4  ;;  %v3446_v7 = vsel %vm1180_vm2, %v3430_v53, %v3445_v59  ;;  %v3457_v10 = vrot.slane %v3442_v18, 4 }
 0x712   : > { %v3454_v21 = vperm.slane %v3446_v7, %v6984_v51  ;;  %v7792_v32 = vsel %vm1180_vm2, 0.0, %v3511_v14  ;;  %v3515_v46 = vrot.slane %v3506_v8, 4  ;;  %v3042_v26 = vsel %vm1180_vm2, %v3041_v58, %v3021_v55 }
 0x713   : > { %v3444_v20 = vsel %vm1180_vm2, %v3443_v15, %v7696_v40  ;;  %v3455_v17 = vrot.slane %v3438_v39, 4  ;;  %v3458_v27 = vsel %vm1180_vm2, 0.0, %v3457_v10  ;;  %v3517_v63 = vrot.slane %v3510_v13, 4 }
 0x714   : > { %v3450_v56 = vperm.slane %v3444_v20, %v6984_v51  ;;  %v3461_v59 = vrot.slane %v3454_v21, 4  ;;  %v7800_v3 = vsel %vm1180_vm2, 0.0, %v3513_v49  ;;  %v3519_v36 = vsel %vm1180_vm2, %v3457_v10, %v3438_v39 }
 0x715   : > { %v3456_v54 = vsel %vm1180_vm2, 0.0, %v3455_v17  ;;  %v7805_v33 = vsel %vm1180_vm2, 0.0, %v3515_v46  ;;  %v7808_v30 = vsel %vm1180_vm2, 0.0, %v3517_v63  ;;  %v3524_v40 = vrot.slane %v3458_v27, 4 }
 0x716   : > { %v3459_v60 = vrot.slane %v3450_v56, 4  ;;  %v3462_v29 = vsel %vm1180_vm2, 0.0, %v3461_v59  ;;  %v3530_v16 = vsel %vm1180_vm2, %v3461_v59, %v3450_v56  ;;  %v3573_v37 = vsel %vm1180_vm2, %v3513_v49, %v3494_v35 }
 0x717   : > { %v7814_v45 = vperm.slane %v3519_v36, %v6972_v34  ;;  %v7817_v58 = vperm.slane %v3530_v16, %v6972_v34  ;;  %v3535_v44 = vrot.slane %v3462_v29, 4  ;;  %v7820_v11 = vperm.slane %v3573_v37, %v6972_v34 }
 0x718   : > { %v3460_v48 = vsel %vm1180_vm2, 0.0, %v3459_v60  ;;  %v3578_v50 = vrot.slane %v7800_v3, 4  ;;  %v3584_v62 = vsel %vm1180_vm2, %v3517_v63, %v3506_v8  ;;  %v3043_v23 = vrot.slane %v3021_v55, 4 }
 0x719   : > { %v3589_v42 = vrot.slane %v7808_v30, 4  ;;  %v3048_v19 = vperm.slane %v3042_v26, %v6972_v34  ;;  %v2988_v12 = vsel %vm1180_vm2, %v2987_v6, %v7729_v47  ;;  %v3000_v61 = vsel %vm1180_vm2, %v2999_v41, %v7737_v22 }
 0x71a   : > { %v3044_v35 = vsel %vm1180_vm2, %v7755_v31, %v3043_v23  ;;  %v2994_v53 = vperm.slane %v2988_v12, %v6984_v51  ;;  %v3006_v18 = vperm.slane %v3000_v61, %v6984_v51  ;;  %v3525_v2 = vsel %vm1180_vm2, %v3524_v40, %v3456_v54 }
 0x71b   : > { %v7839_v13 = vperm.slane %v3584_v62, %v6972_v34  ;;  %v3052_v28 = vperm.slane %v3044_v35, %v6972_v34  ;;  %v3053_v8 = vrot.slane %v3048_v19, 4  ;;  %v3056_v6 = vsel %vm1180_vm2, %v3048_v19, %v3055_v38 }
 0x71c   : > { %v3064_v41 = vperm.slane %v3056_v6, %v6984_v51  ;;  %v3011_v14 = vrot.slane %v3006_v18, 4  ;;  %v3013_v31 = vrot.slane %v2994_v53, 4  ;;  %v3529_v49 = vperm.slane %v3525_v2, %v6972_v34 }
 0x71d   : > { %v3054_v39 = vsel %vm1180_vm2, %v3053_v8, %v7717_v43  ;;  %v3065_v15 = vrot.slane %v3052_v28, 4  ;;  %v3068_v7 = vsel %vm1180_vm2, %v3052_v28, %v3067_v52  ;;  %v3536_v10 = vsel %vm1180_vm2, %v3535_v44, %v3460_v48 }
 0x71e   : > { %v3060_v55 = vperm.slane %v3054_v39, %v6984_v51  ;;  %v3076_v38 = vperm.slane %v3068_v7, %v6984_v51  ;;  %v3079_v21 = vrot.slane %v3064_v41, 4  ;;  %v3012_v46 = vsel %vm1180_vm2, %v3011_v14, %v2994_v53 }
 0x71f   : > { %v3066_v26 = vsel %vm1180_vm2, %v3065_v15, %v7703_v25  ;;  %v3139_v20 = vpack.c.bf16 %v3012_v46, %v3012_v46  ;;  %v3014_v43 = vsel %vm1180_vm2, %v3006_v18, %v3013_v31  ;;  %v3543_v17 = vrot.slane %v7814_v45, 4 }
 0x720   : > { %v3072_v27 = vperm.slane %v3066_v26, %v6984_v51  ;;  %v3077_v52 = vrot.slane %v3060_v55, 4  ;;  %v3080_v63 = vsel %vm1180_vm2, 0.0, %v3079_v21  ;;  %v3083_v56 = vrot.slane %v3076_v38, 4 }
 0x721   : > { %v3085_v59 = vsel %vm1180_vm2, %v3079_v21, %v3060_v55  ;;  %v3090_v3 = vrot.slane %v3080_v63, 4  ;;  %5713 = vmatmul.msk.bf16.vlgmr.msrb.gmra.mxu3 %vm1914_vm3, %v3139_v20  ;;  %v3140_v36 = vpack.c.bf16 %v3014_v43, %v3014_v43  ;;  %v3544_v54 = vsel %vm1180_vm2, %v3529_v49, %v3543_v17 }
 0x722   : > { %v3078_v25 = vsel %vm1180_vm2, 0.0, %v3077_v52  ;;  %v3081_v30 = vrot.slane %v3072_v27, 4  ;;  %v3084_v40 = vsel %vm1180_vm2, 0.0, %v3083_v56  ;;  %v7868_v60 = vperm.slane %v3085_v59, %v6972_v34 }
 0x723   : > { %v3091_v29 = vsel %vm1180_vm2, %v3090_v3, %v3078_v25  ;;  %v3096_v16 = vsel %vm1180_vm2, %v3083_v56, %v3072_v27  ;;  %v3101_v37 = vrot.slane %v3084_v40, 4  ;;  %5714 = vmatmul.msk.bf16.vlgmr.msra.gmra.mxu0 %vm1914_vm3, %v3140_v36  ;;  %v3540_v44 = vperm.slane %v3536_v10, %v6972_v34 }
 0x724   : > { %v3082_v48 = vsel %vm1180_vm2, 0.0, %v3081_v30  ;;  %v7876_v62 = vperm.slane %v3091_v29, %v6972_v34  ;;  %v7879_v23 = vperm.slane %v3096_v16, %v6972_v34  ;;  %v3552_v19 = vperm.slane %v3544_v54, %v6984_v51  ;;  %v2889_v16 = vpop.f32.mrf.mxu2 }
 0x725   : > { %v3102_v12 = vsel %vm1180_vm2, %v3101_v37, %v3082_v48  ;;  %v3555_v61 = vrot.slane %v7817_v58, 4  ;;  %v3579_v35 = vsel %vm1180_vm2, %v3578_v50, %v7792_v32  ;;  %v3590_v53 = vsel %vm1180_vm2, %v3589_v42, %v7805_v33 }
 0x726   : > { %v7889_v18 = vperm.slane %v3102_v12, %v6972_v34  ;;  %v3107_v2 = vrot.slane %v7876_v62, 4  ;;  %v3109_v28 = vrot.slane %v7868_v60, 4  ;;  %v3583_v8 = vperm.slane %v3579_v35, %v6972_v34 }
 0x727   : > { %v3556_v6 = vsel %vm1180_vm2, %v3540_v44, %v3555_v61  ;;  %v3594_v41 = vperm.slane %v3590_v53, %v6972_v34  ;;  %v3597_v14 = vrot.slane %v7820_v11, 4  ;;  %v3609_v32 = vrot.slane %v7839_v13, 4 }
 0x728   : > { %v3119_v50 = vrot.slane %v7889_v18, 4  ;;  %v3564_v33 = vperm.slane %v3556_v6, %v6984_v51  ;;  %v3571_v42 = vrot.slane %v3552_v19, 4  ;;  %v3541_v31 = vrot.slane %v3529_v49, 4 }
 0x729   : > { %v3598_v39 = vsel %vm1180_vm2, %v3583_v8, %v3597_v14  ;;  %v3610_v15 = vsel %vm1180_vm2, %v3594_v41, %v3609_v32  ;;  %v3553_v7 = vrot.slane %v3540_v44, 4  ;;  %v3595_v10 = vrot.slane %v3583_v8, 4 }
 0x72a   : > { %v3569_v55 = vrot.slane %v3564_v33, 4  ;;  %v3606_v38 = vperm.slane %v3598_v39, %v6984_v51  ;;  %v3618_v21 = vperm.slane %v3610_v15, %v6984_v51  ;;  %v3572_v46 = vsel %vm1180_vm2, %v3564_v33, %v3571_v42 }
 0x72b   : > { %v3641_v26 = vpack.c.bf16 %v3572_v46, %v3572_v46  ;;  %v3542_v20 = vsel %vm1180_vm2, %v3541_v31, %v7814_v45  ;;  %v3554_v49 = vsel %vm1180_vm2, %v3553_v7, %v7817_v58  ;;  %v3596_v43 = vsel %vm1180_vm2, %v3595_v10, %v7820_v11 }
 0x72c   : > { %v3570_v17 = vsel %vm1180_vm2, %v3569_v55, %v3552_v19  ;;  %v3623_v27 = vrot.slane %v3618_v21, 4  ;;  %v3625_v52 = vrot.slane %v3606_v38, 4  ;;  %v3548_v63 = vperm.slane %v3542_v20, %v6984_v51 }
 0x72d   : > { %v3639_v56 = vpack.c.bf16 %v3570_v17, %v3570_v17  ;;  %v4309_v59 = vunpack.c.l.b16 %v3641_v26  ;;  %v3560_v3 = vperm.slane %v3554_v49, %v6984_v51  ;;  %v3602_v36 = vperm.slane %v3596_v43, %v6984_v51 }
 0x72e   : > { %v3624_v45 = vsel %vm1180_vm2, %v3623_v27, %v3606_v38  ;;  %v3626_v54 = vsel %vm1180_vm2, %v3618_v21, %v3625_v52  ;;  %v3607_v58 = vrot.slane %v3594_v41, 4  ;;  %v3567_v25 = vrot.slane %v3548_v63, 4  ;;  %v6057_v38 = vld [vmem:[%s6927_s11 + $0x6] ss:$0 sm:$0xff] }
 0x72f   : > { %v3640_v30 = vpack.c.bf16 %v3624_v45, %v3624_v45  ;;  %v4285_v11 = vunpack.c.l.b16 %v3639_v56  ;;  %v3642_v40 = vpack.c.bf16 %v3626_v54, %v3626_v54  ;;  %v3565_v29 = vrot.slane %v3560_v3, 4  ;;  %v2891_v56 = vpop.f32.mrf.mxu2 }
 0x730   : > { %v3608_v37 = vsel %vm1180_vm2, %v3607_v58, %v7839_v13  ;;  %v3568_v44 = vsel %vm1180_vm2, %v3560_v3, %v3567_v25  ;;  %v3621_v48 = vrot.slane %v3602_v36, 4  ;;  %v2990_v19 = vsel %vm1180_vm2, %v7746_v24, %v2989_v0 }
 0x731   : > { %v4286_v12 = vunpack.c.l.b16 %v3640_v30  ;;  %v4310_v61 = vunpack.c.l.b16 %v3642_v40  ;;  %v3566_v35 = vsel %vm1180_vm2, %v3565_v29, %v3548_v63  ;;  %v3614_v53 = vperm.slane %v3608_v37, %v6984_v51 }
 0x732   : > { %v3635_v8 = vpack.c.bf16 %v3566_v35, %v3566_v35  ;;  %v3637_v6 = vpack.c.bf16 %v3568_v44, %v3568_v44  ;;  %v2998_v41 = vperm.slane %v2990_v19, %v6984_v51  ;;  %v3002_v13 = vsel %vm1180_vm2, %v7751_v57, %v3001_v9 }
 0x733   : > { %v4287_v14 = vpack.c.b16 %v4286_v12, %v4285_v11  ;;  %v4311_v47 = vpack.c.b16 %v4310_v61, %v4309_v59  ;;  %v3619_v32 = vrot.slane %v3614_v53, 4  ;;  %v3622_v24 = vsel %vm1180_vm2, %v3614_v53, %v3621_v48 }
 0x734   : > { %v4237_v0 = vunpack.c.l.b16 %v3635_v8  ;;  %v3638_v33 = vpack.c.bf16 %v3622_v24, %v3622_v24  ;;  %v4261_v42 = vunpack.c.l.b16 %v3637_v6  ;;  %v3010_v31 = vperm.slane %v3002_v13, %v6984_v51 }
 0x735   : > { %v4292_v39 = vsel %vm1914_vm3, %v4287_v14, 0  ;;  %v4316_v15 = vsel %vm1914_vm3, %v4311_v47, 0  ;;  %v3620_v22 = vsel %vm1180_vm2, %v3619_v32, %v3602_v36  ;;  %v3017_v7 = vrot.slane %v2998_v41, 4 }
 0x736   : > { %4301 = vmatpush.bf16.xpose.msrb.mxu3 %v4292_v39  ;;  %4325 = vmatpush.bf16.xpose.msra.mxu0 %v4316_v15  ;;  %v3636_v57 = vpack.c.bf16 %v3620_v22, %v3620_v22  ;;  %v4262_v9 = vunpack.c.l.b16 %v3638_v33  ;;  %v3015_v10 = vrot.slane %v3010_v31, 4  ;;  %v3108_v55 = vsel %vm1180_vm2, %v3107_v2, %v7868_v60 }
 0x737   : > { %v3121_v21 = vrot.slane %v7879_v23, 4  ;;  %v3018_v46 = vsel %vm1180_vm2, %v3010_v31, %v3017_v7  ;;  %v3114_v26 = vperm.slane %v3108_v55, %v6984_v51  ;;  %v3120_v20 = vsel %vm1180_vm2, %v3119_v50, %v7879_v23 }
 0x738   : > { %v4238_v49 = vunpack.c.l.b16 %v3636_v57  ;;  %v4263_v43 = vpack.c.b16 %v4262_v9, %v4261_v42  ;;  %v3016_v17 = vsel %vm1180_vm2, %v3015_v10, %v2998_v41  ;;  %v3142_v27 = vpack.c.bf16 %v3018_v46, %v3018_v46 }
 0x739   : > { %v3141_v52 = vpack.c.bf16 %v3016_v17, %v3016_v17  ;;  %v3126_v2 = vperm.slane %v3120_v20, %v6984_v51  ;;  %v3133_v63 = vrot.slane %v3114_v26, 4  ;;  %v3110_v23 = vsel %vm1180_vm2, %v7876_v62, %v3109_v28 }
 0x73a   : > { %v4239_v59 = vpack.c.b16 %v4238_v49, %v4237_v0  ;;  %v4268_v3 = vsel %vm1914_vm3, %v4263_v43, 0  ;;  %5716 = vmatmul.msk.bf16.vlgmr.msrb.gmra.mxu0 %vm1914_vm3, %v3142_v27  ;;  %v7956_v50 = vadd.f32 %v6057_v38, %v2889_v16  ;;  %v3122_v45 = vsel %vm1180_vm2, %v7889_v18, %v3121_v21 }
 0x73b   : > { %4277 = vmatpush.bf16.xpose.msra.mxu2 %v4268_v3  ;;  %5715 = vmatmul.msk.bf16.vlgmr.msra.gmra.mxu3 %vm1914_vm3, %v3141_v52  ;;  %v3131_v36 = vrot.slane %v3126_v2, 4  ;;  %v7962_v58 = vadd.f32 %v6057_v38, %v2891_v56  ;;  %v3134_v25 = vsel %vm1180_vm2, %v3126_v2, %v3133_v63  ;;  %v3118_v60 = vperm.slane %v3110_v23, %v6984_v51 }
 0x73c   : > { %v4244_v54 = vsel %vm1914_vm3, %v4239_v59, 0  ;;  %v3130_v62 = vperm.slane %v3122_v45, %v6984_v51  ;;  %v3144_v11 = vpack.c.bf16 %v3134_v25, %v3134_v25 }
 0x73d   : > { %4253 = vmatpush.bf16.xpose.msra.mxu1 %v4244_v54  ;;  %v6004_v28 = vpack.i.bf16 %v7962_v58, %v7956_v50  ;;  %v3132_v30 = vsel %vm1180_vm2, %v3131_v36, %v3114_v26  ;;  %v3137_v18 = vrot.slane %v3118_v60, 4 }
 0x73e   : > { %v3143_v40 = vpack.c.bf16 %v3132_v30, %v3132_v30  ;;  %v3135_v29 = vrot.slane %v3130_v62, 4 }
 0x73f   : > { %6005 = vrot.lane.b32.xlu1 %v6004_v28, %s6582_s22  ;;  %v3138_v16 = vsel %vm1180_vm2, %v3130_v62, %v3137_v18 }
 0x740   : > { %v3136_v37 = vsel %vm1180_vm2, %v3135_v29, %v3118_v60  ;;  %v3146_v44 = vpack.c.bf16 %v3138_v16, %v3138_v16 }
 0x741   : > { %v3145_v48 = vpack.c.bf16 %v3136_v37, %v3136_v37 }
 0x742   : > { %5718 = vmatmul.msk.bf16.vlgmr.msra.gmra.mxu2 %vm1914_vm3, %v3144_v11 }
 0x744   : > { %5717 = vmatmul.msk.bf16.vlgmr.msra.gmra.mxu1 %vm1914_vm3, %v3143_v40 }
 0x74a   : > { %5720 = vmatmul.msk.bf16.vlgmr.msra.gmra.mxu0 %vm1914_vm3, %v3146_v44 }
 0x74b   : > { %5719 = vmatmul.msk.bf16.vlgmr.msrb.gmra.mxu3 %vm1914_vm3, %v3145_v48 }
 0x78f   : > { %v2894_v6 = vpop.f32.mrf.mxu2 }
 0x790   : > { %v7980_v14 = vadd.f32 %v6057_v38, %v2894_v6 }
 0x797   : > { %v2896_v13 = vpop.f32.mrf.mxu2 }
 0x798   : > { %v7982_v47 = vadd.f32 %v6057_v38, %v2896_v13 }
 0x79a   : > { %v6019_v0 = vpack.i.bf16 %v7982_v47, %v7980_v14 }
 0x7a0   : > { %v4183_v19 = vpop.f32.mrf.mxu0 }
 0x7a1   : > { %v4334_v12 = vsel %vm2543_vm11, %v4183_v19, -inf }
 0x7a2   : > { %4335 = vmax.xlane.f32.xlu2 %v4334_v12 }
 0x7a4   : > { %v4159_v61 = vpop.f32.mrf.mxu3 }
 0x7a5   : > { %v4331_v35 = vsel %vm2543_vm11, %v4159_v61, -inf }
 0x7a6   : > { %4332 = vmax.xlane.f32.xlu1 %v4331_v35 }
 0x7a8   : > { %v4185_v53 = vpop.f32.mrf.mxu0 }
 0x7ac   : > { %v4161_v8 = vpop.f32.mrf.mxu3 }
 0x7b1   : > { %v6006_v20 = vpop.permute.xlu1 %6005 }
 0x7b2   : > { %v6007_v12 = vunpack.i.l.bf16 %v6006_v20 }
 0x7b4   : > { %v3677_v6 = vrot.slane %v6007_v12, 4 }
 0x7b7   : > { %v4231_v41 = vpop.f32.mrf.mxu0 }
 0x7b8   : > { %v4340_v57 = vsel %vm2543_vm11, %v4231_v41, -inf }
 0x7ba   : > { %6015 = vrot.lane.b32.xlu2 %v6004_v28, %s6581_s15 }
 0x7be   : > { %v4207_v32 = vpop.f32.mrf.mxu3 }
 0x7bf   : > { %v4233_v24 = vpop.f32.mrf.mxu0  ;;  %v4337_v38 = vsel %vm2543_vm11, %v4207_v32, -inf }
 0x7c1   : > { %v4255_v33 = vpop.f32.mrf.mxu1 }
 0x7c2   : > { %v4343_v42 = vsel %vm2543_vm11, %v4255_v33, -inf  ;;  %6020 = vrot.lane.b32.xlu2 %v6019_v0, %s6582_s22 }
 0x7c3   : > { %4344 = vmax.xlane.f32.xlu0 %v4343_v42 }
 0x7c5   : > { %v4279_v31 = vpop.f32.mrf.mxu2 }
 0x7c6   : > { %v4346_v39 = vsel %vm2543_vm11, %v4279_v31, -inf  ;;  %v4209_v15 = vpop.f32.mrf.mxu3 }
 0x7c7   : > { %4347 = vmax.xlane.f32.xlu1 %v4346_v39  ;;  %v7989_v22 = vpop.f32.mrf.mxu0  ;;  %v3665_v15 = vrot.slane %v7956_v50, 4 }
 0x7c8   : > { %v4352_v46 = vsel %vm2543_vm11, %v7989_v22, -inf }
 0x7c9   : > { %v4257_v7 = vpop.f32.mrf.mxu1 }
 0x7cb   : > { %4341 = vmax.xlane.f32.xlu0 %v4340_v57 }
 0x7cd   : > { %v4281_v9 = vpop.f32.mrf.mxu2 }
 0x7ce   : > { %v7992_v10 = vpop.f32.mrf.mxu3 }
 0x7cf   : > { %v4329_v55 = vpop.f32.mrf.mxu0  ;;  %v4349_v26 = vsel %vm2543_vm11, %v7992_v10, -inf }
 0x7d0   : > { %v3721_v55 = vrot.slane %v7962_v58, 4 }
 0x7d3   : > { %4338 = vmax.xlane.f32.xlu0 %v4337_v38 }
 0x7d6   : > { %v4305_v21 = vpop.f32.mrf.mxu3 }
 0x7e7   : > { %6010 = vrot.lane.b32.xlu0 %v6004_v28, %s6583_s18 }
 0x7eb   : > { %4353 = vmax.xlane.f32.xlu2 %v4352_v46 }
 0x7f3   : > { %4350 = vmax.xlane.f32.xlu2 %v4349_v26 }
 0x80b   : > { %6025 = vrot.lane.b32.xlu2 %v6019_v0, %s6583_s18 }
 0x815   : > { %v4336_v49 = vpop.xlane.xlu2 %4335 }
 0x816   : > { %v4356_v43 = vsub.f32 %v4183_v19, %v4336_v49  ;;  %v6008_v19 = vunpack.i.h.bf16 %v6006_v20 }
 0x818   : > { %v4365_v17 = vmul.f32 1.442695, %v4356_v43  ;;  %v3733_v8 = vrot.slane %v6008_v19, 4 }
 0x819   : > { %v4333_v27 = vpop.xlane.xlu1 %4332 }
 0x81a   : > { %6103 = vpow2.f32 %v4365_v17  ;;  %v4355_v63 = vsub.f32 %v4159_v61, %v4333_v27 }
 0x81c   : > { %v4363_v56 = vmul.f32 1.442695, %v4355_v63 }
 0x81d   : > { %v6016_v44 = vpop.permute.xlu2 %6015 }
 0x81e   : > { %6105 = vpow2.f32 %v4363_v56  ;;  %v6018_v61 = vunpack.i.h.bf16 %v6016_v44  ;;  %v6017_v35 = vunpack.i.l.bf16 %v6016_v44 }
 0x820   : > { %v8001_v52 = vpop.eup %6103 }
 0x821   : > { %v4382_v2 = vsel %vm2543_vm11, %v8001_v52, 0.0 }
 0x822   : > { %4383 = vadd.xlane.f32.xlu1 %v4382_v2 }
 0x824   : > { %v8005_v59 = vpop.eup %6105 }
 0x825   : > { %v4379_v3 = vsel %vm2543_vm11, %v8005_v59, 0.0  ;;  %v8028_v39 = vpop.permute.xlu2 %6020 }
 0x834   : > { %4380 = vadd.xlane.f32.xlu2 %v4379_v3 }
 0x836   : > { %v4345_v23 = vpop.xlane.xlu0 %4344 }
 0x837   : > { %v4359_v36 = vsub.f32 %v4255_v33, %v4345_v23  ;;  %v3678_v33 = vsel %vm1180_vm2, %v6017_v35, %v3677_v6 }
 0x838   : > { %v3686_v9 = vperm.slane %v3678_v33, %v6972_v34 }
 0x839   : > { %v4371_v45 = vmul.f32 1.442695, %v4359_v36 }
 0x83a   : > { %v4348_v30 = vpop.xlane.xlu1 %4347  ;;  %v3699_v63 = vrot.slane %v3686_v9, 4 }
 0x83b   : > { %6107 = vpow2.f32 %v4371_v45  ;;  %6030 = vrot.lane.b32.xlu1 %v6019_v0, %s6581_s15  ;;  %v4360_v29 = vsub.f32 %v4279_v31, %v4348_v30  ;;  %v3734_v0 = vsel %vm1180_vm2, %v6018_v61, %v3733_v8 }
 0x83c   : > { %v3742_v57 = vperm.slane %v3734_v0, %v6972_v34 }
 0x83d   : > { %v4373_v48 = vmul.f32 1.442695, %v4360_v29 }
 0x83e   : > { %v4342_v54 = vpop.xlane.xlu0 %4341  ;;  %v3755_v2 = vrot.slane %v3742_v57, 4 }
 0x83f   : > { %v4358_v25 = vsub.f32 %v4231_v41, %v4342_v54  ;;  %v3731_v41 = vrot.slane %v6018_v61, 4 }
 0x841   : > { %v8010_v60 = vpop.eup %6107  ;;  %v4369_v62 = vmul.f32 1.442695, %v4358_v25  ;;  %v3732_v24 = vsel %vm1180_vm2, %v3731_v41, %v6008_v19 }
 0x842   : > { %v4391_v28 = vsel %vm2543_vm11, %v8010_v60, 0.0  ;;  %v3738_v7 = vperm.slane %v3732_v24, %v6972_v34 }
 0x843   : > { %6109 = vpow2.f32 %v4369_v62  ;;  %4392 = vadd.xlane.f32.xlu2 %v4391_v28 }
 0x844   : > { %v3743_v23 = vrot.slane %v3738_v7, 4 }
 0x846   : > { %v4339_v11 = vpop.xlane.xlu0 %4338 }
 0x847   : > { %v4357_v18 = vsub.f32 %v4207_v32, %v4339_v11  ;;  %v3675_v32 = vrot.slane %v6017_v35, 4 }
 0x849   : > { %v8014_v40 = vpop.eup %6109  ;;  %v4367_v16 = vmul.f32 1.442695, %v4357_v18  ;;  %v3676_v31 = vsel %vm1180_vm2, %v3675_v32, %v6007_v12 }
 0x84a   : > { %v4388_v37 = vsel %vm2543_vm11, %v8014_v40, 0.0  ;;  %v3682_v21 = vperm.slane %v3676_v31, %v6972_v34 }
 0x84b   : > { %6111 = vpow2.f32 %v4367_v16  ;;  %4389 = vadd.xlane.f32.xlu0 %v4388_v37 }
 0x84c   : > { %6113 = vpow2.f32 %v4373_v48  ;;  %v3687_v36 = vrot.slane %v3682_v21, 4 }
 0x851   : > { %v8018_v53 = vpop.eup %6111 }
 0x852   : > { %v4385_v13 = vsel %vm2543_vm11, %v8018_v53, 0.0  ;;  %v8025_v42 = vpop.eup %6113 }
 0x853   : > { %4386 = vadd.xlane.f32.xlu0 %v4385_v13  ;;  %v4394_v20 = vsel %vm2543_vm11, %v8025_v42, 0.0 }
 0x859   : > { %v6011_v38 = vpop.permute.xlu0 %6010 }
 0x85a   : > { %v6013_v46 = vunpack.i.h.bf16 %v6011_v38  ;;  %v6012_v26 = vunpack.i.l.bf16 %v6011_v38 }
 0x85b   : > { %4395 = vadd.xlane.f32.xlu0 %v4394_v20 }
 0x85c   : > { %v3719_v49 = vrot.slane %v6013_v46, 4  ;;  %v3722_v43 = vsel %vm1180_vm2, %v6013_v46, %v3721_v55  ;;  %v3663_v17 = vrot.slane %v6012_v26, 4  ;;  %v3666_v27 = vsel %vm1180_vm2, %v6012_v26, %v3665_v15 }
 0x85d   : > { %v3730_v56 = vperm.slane %v3722_v43, %v6972_v34  ;;  %v3674_v3 = vperm.slane %v3666_v27, %v6972_v34 }
 0x85e   : > { %v3720_v45 = vsel %vm1180_vm2, %v3719_v49, %v7962_v58  ;;  %v3664_v54 = vsel %vm1180_vm2, %v3663_v17, %v7956_v50  ;;  %v8049_v11 = vpop.xlane.xlu2 %4353 }
 0x85f   : > { %v3726_v25 = vperm.slane %v3720_v45, %v6972_v34  ;;  %v3756_v62 = vsel %vm1180_vm2, %v3755_v2, %v3730_v56  ;;  %v3757_v28 = vrot.slane %v3730_v56, 4  ;;  %v3670_v30 = vperm.slane %v3664_v54, %v6972_v34 }
 0x860   : > { %v3762_v18 = vperm.slane %v3756_v62, %v6984_v51  ;;  %v3700_v29 = vsel %vm1180_vm2, %v3699_v63, %v3674_v3  ;;  %v3701_v16 = vrot.slane %v3674_v3, 4 }
 0x861   : > { %v3744_v37 = vsel %vm1180_vm2, %v3743_v23, %v3726_v25  ;;  %v3745_v58 = vrot.slane %v3726_v25, 4  ;;  %v3758_v44 = vsel %vm1180_vm2, %v3742_v57, %v3757_v28  ;;  %v3688_v50 = vsel %vm1180_vm2, %v3687_v36, %v3670_v30 }
 0x862   : > { %v3750_v48 = vperm.slane %v3744_v37, %v6984_v51  ;;  %v3766_v19 = vperm.slane %v3758_v44, %v6984_v51  ;;  %v3771_v12 = vrot.slane %v3762_v18, 4  ;;  %v3689_v61 = vrot.slane %v3670_v30, 4 }
 0x863   : > { %v3746_v35 = vsel %vm1180_vm2, %v3738_v7, %v3745_v58  ;;  %v3694_v8 = vperm.slane %v3688_v50, %v6984_v51  ;;  %v3702_v6 = vsel %vm1180_vm2, %v3686_v9, %v3701_v16  ;;  %v3706_v32 = vperm.slane %v3700_v29, %v6984_v51 }
 0x864   : > { %v3754_v41 = vperm.slane %v3746_v35, %v6984_v51  ;;  %v3773_v13 = vrot.slane %v3766_v19, 4  ;;  %v3767_v24 = vrot.slane %v3750_v48, 4  ;;  %v3690_v0 = vsel %vm1180_vm2, %v3682_v21, %v3689_v61 }
 0x865   : > { %v3710_v33 = vperm.slane %v3702_v6, %v6984_v51  ;;  %v3772_v15 = vsel %vm1180_vm2, 0.0, %v3771_v12  ;;  %v3698_v38 = vperm.slane %v3690_v0, %v6984_v51  ;;  %v3711_v46 = vrot.slane %v3694_v8, 4 }
 0x866   : > { %v3769_v31 = vrot.slane %v3754_v41, 4  ;;  %v3774_v57 = vsel %vm1180_vm2, 0.0, %v3773_v13  ;;  %v3840_v7 = vsel %vm1180_vm2, %v3773_v13, %v3762_v18  ;;  %v3715_v20 = vrot.slane %v3706_v32, 4  ;;  %v4351_v63 = vpop.xlane.xlu2 %4350 }
 0x867   : > { %v8069_v55 = vperm.slane %v3840_v7, %v6972_v34  ;;  %v3845_v9 = vrot.slane %v3774_v57, 4  ;;  %v3717_v49 = vrot.slane %v3710_v33, 4  ;;  %v3768_v43 = vsel %vm1180_vm2, 0.0, %v3767_v24 }
 0x868   : > { %v3770_v26 = vsel %vm1180_vm2, 0.0, %v3769_v31  ;;  %v3829_v21 = vsel %vm1180_vm2, %v3769_v31, %v3750_v48  ;;  %v3713_v3 = vrot.slane %v3698_v38, 4  ;;  %v3716_v30 = vsel %vm1180_vm2, 0.0, %v3715_v20 }
 0x869   : > { %v8076_v17 = vperm.slane %v3829_v21, %v6972_v34  ;;  %v3834_v27 = vrot.slane %v3770_v26, 4  ;;  %v3846_v2 = vsel %vm1180_vm2, %v3845_v9, %v3772_v15  ;;  %v3865_v56 = vrot.slane %v8069_v55, 4 }
 0x86a   : > { %v3718_v23 = vsel %vm1180_vm2, 0.0, %v3717_v49  ;;  %v3786_v36 = vsel %vm1180_vm2, %v3717_v49, %v3706_v32  ;;  %v3850_v54 = vperm.slane %v3846_v2, %v6972_v34  ;;  %v3714_v28 = vsel %vm1180_vm2, 0.0, %v3713_v3 }
 0x86b   : > { %v3835_v45 = vsel %vm1180_vm2, %v3834_v27, %v3768_v43  ;;  %v3790_v25 = vperm.slane %v3786_v36, %v6972_v34  ;;  %v3791_v62 = vrot.slane %v3718_v23, 4  ;;  %v3775_v18 = vsel %vm1180_vm2, %v3713_v3, %v3694_v8 }
 0x86c   : > { %v4361_v29 = vsub.f32 %v7992_v10, %v4351_v63  ;;  %v3779_v16 = vperm.slane %v3775_v18, %v6972_v34  ;;  %v3780_v37 = vrot.slane %v3714_v28, 4  ;;  %v3712_v50 = vsel %vm1180_vm2, 0.0, %v3711_v46 }
 0x86d   : > { %v3792_v58 = vsel %vm1180_vm2, %v3791_v62, %v3716_v30  ;;  %v3811_v44 = vrot.slane %v3790_v25, 4  ;;  %v3839_v12 = vperm.slane %v3835_v45, %v6972_v34  ;;  %v3853_v8 = vrot.slane %v8076_v17, 4 }
 0x86e   : > { %v3796_v48 = vperm.slane %v3792_v58, %v6972_v34  ;;  %v4375_v19 = vmul.f32 1.442695, %v4361_v29  ;;  %v3781_v61 = vsel %vm1180_vm2, %v3780_v37, %v3712_v50  ;;  %v3799_v35 = vrot.slane %v3779_v16, 4 }
 0x86f   : > { %v3866_v10 = vsel %vm1180_vm2, %v3850_v54, %v3865_v56  ;;  %v3785_v6 = vperm.slane %v3781_v61, %v6972_v34  ;;  %v4362_v13 = vsub.f32 %v7989_v22, %v8049_v11  ;;  %v3854_v24 = vsel %vm1180_vm2, %v3839_v12, %v3853_v8 }
 0x870   : > { %v3812_v41 = vsel %vm1180_vm2, %v3796_v48, %v3811_v44  ;;  %v3874_v0 = vperm.slane %v3866_v10, %v6984_v51  ;;  %v3862_v31 = vperm.slane %v3854_v24, %v6984_v51  ;;  %6115 = vpow2.f32 %v4375_v19 }
 0x871   : > { %v3820_v32 = vperm.slane %v3812_v41, %v6984_v51  ;;  %v3800_v33 = vsel %vm1180_vm2, %v3785_v6, %v3799_v35  ;;  %v3797_v15 = vrot.slane %v3785_v6, 4  ;;  %v3809_v38 = vrot.slane %v3796_v48, 4 }
 0x872   : > { %v3808_v57 = vperm.slane %v3800_v33, %v6984_v51  ;;  %v3879_v9 = vrot.slane %v3874_v0, 4  ;;  %v4377_v22 = vmul.f32 1.442695, %v4362_v13  ;;  %v3863_v21 = vrot.slane %v3850_v54, 4 }
 0x873   : > { %v3825_v7 = vrot.slane %v3820_v32, 4  ;;  %v3798_v46 = vsel %vm1180_vm2, %v3797_v15, %v3779_v16  ;;  %v3810_v63 = vsel %vm1180_vm2, %v3809_v38, %v3790_v25  ;;  %v3851_v23 = vrot.slane %v3839_v12, 4 }
 0x874   : > { %v3880_v26 = vsel %vm1180_vm2, %v3879_v9, %v3862_v31  ;;  %v3804_v43 = vperm.slane %v3798_v46, %v6984_v51  ;;  %6117 = vpow2.f32 %v4377_v22  ;;  %v3816_v3 = vperm.slane %v3810_v63, %v6984_v51  ;;  %v6026_v22 = vpop.permute.xlu2 %6025 }
 0x875   : > { %v3826_v11 = vsel %vm1180_vm2, %v3825_v7, %v3808_v57  ;;  %v4128_v49 = vpack.c.bf16 %v3880_v26, %v3880_v26  ;;  %v3864_v45 = vsel %vm1180_vm2, %v3863_v21, %v8069_v55  ;;  %v3827_v62 = vrot.slane %v3808_v57, 4 }
 0x876   : > { %v4127_v20 = vpack.c.bf16 %v3826_v11, %v3826_v11  ;;  %v8112_v56 = vpop.eup %6115  ;;  %v3881_v54 = vrot.slane %v3862_v31, 4  ;;  %v3821_v28 = vrot.slane %v3816_v3, 4  ;;  %v3852_v30 = vsel %vm1180_vm2, %v3851_v23, %v8076_v17 }
 0x877   : > { %v4578_v2 = vunpack.c.l.b16 %v4128_v49  ;;  %v3870_v18 = vperm.slane %v3864_v45, %v6984_v51  ;;  %v3823_v29 = vrot.slane %v3804_v43, 4  ;;  %v3858_v25 = vperm.slane %v3852_v30, %v6984_v51 }
 0x878   : > { %v4577_v27 = vunpack.c.l.b16 %v4127_v20  ;;  %v3828_v16 = vsel %vm1180_vm2, %v3820_v32, %v3827_v62  ;;  %v3882_v37 = vsel %vm1180_vm2, %v3874_v0, %v3881_v54  ;;  %v4397_v58 = vsel %vm2543_vm11, %v8112_v56, 0.0 }
 0x879   : > { %v3822_v55 = vsel %vm1180_vm2, %v3821_v28, %v3804_v43  ;;  %v3875_v44 = vrot.slane %v3870_v18, 4  ;;  %v4129_v50 = vpack.c.bf16 %v3828_v16, %v3828_v16  ;;  %v4130_v48 = vpack.c.bf16 %v3882_v37, %v3882_v37  ;;  %4398 = vadd.xlane.f32.xlu0 %v4397_v58 }
 0x87a   : > { %v4579_v36 = vpack.c.b16 %v4578_v2, %v4577_v27  ;;  %v4123_v17 = vpack.c.bf16 %v3822_v55, %v3822_v55  ;;  %v3824_v19 = vsel %vm1180_vm2, %v3816_v3, %v3823_v29  ;;  %v3877_v12 = vrot.slane %v3858_v25, 4  ;;  %v8127_v61 = vpop.eup %6117 }
 0x87b   : > { %v3876_v35 = vsel %vm1180_vm2, %v3875_v44, %v3858_v25  ;;  %v4599_v8 = vunpack.c.l.b16 %v4129_v50  ;;  %v4600_v10 = vunpack.c.l.b16 %v4130_v48  ;;  %v4125_v6 = vpack.c.bf16 %v3824_v19, %v3824_v19 }
 0x87c   : > { %4591 = vmatpush.bf16.msra.mxu3 %v4579_v36  ;;  %v4124_v41 = vpack.c.bf16 %v3876_v35, %v3876_v35  ;;  %v4533_v13 = vunpack.c.l.b16 %v4123_v17  ;;  %v3878_v32 = vsel %vm1180_vm2, %v3870_v18, %v3877_v12  ;;  %v4400_v7 = vsel %vm2543_vm11, %v8127_v61, 0.0 }
 0x87d   : > { %v4601_v24 = vpack.c.b16 %v4600_v10, %v4599_v8  ;;  %v4126_v0 = vpack.c.bf16 %v3878_v32, %v3878_v32  ;;  %v4555_v33 = vunpack.c.l.b16 %v4125_v6  ;;  %v6028_v21 = vunpack.i.h.bf16 %v6026_v22 }
 0x87e   : > { %v4534_v31 = vunpack.c.l.b16 %v4124_v41  ;;  %v6027_v20 = vunpack.i.l.bf16 %v6026_v22  ;;  %v3961_v36 = vrot.slane %v7982_v47, 4  ;;  %v3905_v18 = vrot.slane %v7980_v14, 4 }
 0x87f   : > { %4613 = vmatpush.bf16.msrb.mxu0 %v4601_v24  ;;  %v4556_v15 = vunpack.c.l.b16 %v4126_v0  ;;  %v3959_v63 = vrot.slane %v6028_v21, 4  ;;  %v6023_v16 = vunpack.i.h.bf16 %v8028_v39  ;;  %v6022_v58 = vunpack.i.l.bf16 %v8028_v39 }
 0x880   : > { %v4535_v57 = vpack.c.b16 %v4534_v31, %v4533_v13  ;;  %v3903_v3 = vrot.slane %v6027_v20, 4  ;;  %v3962_v54 = vsel %vm1180_vm2, %v6028_v21, %v3961_v36 }
 0x881   : > { %v4557_v9 = vpack.c.b16 %v4556_v15, %v4555_v33  ;;  %4401 = vadd.xlane.f32.xlu0 %v4400_v7  ;;  %v3960_v29 = vsel %vm1180_vm2, %v3959_v63, %v7982_v47  ;;  %v3970_v55 = vperm.slane %v3962_v54, %v6972_v34  ;;  %v3973_v47 = vrot.slane %v6023_v16, 4 }
 0x882   : > { %4547 = vmatpush.bf16.msrb.mxu1 %v4535_v57  ;;  %v3904_v25 = vsel %vm1180_vm2, %v3903_v3, %v7980_v14  ;;  %v3966_v44 = vperm.slane %v3960_v29, %v6972_v34  ;;  %v3917_v19 = vrot.slane %v6022_v58, 4 }
 0x883   : > { %4569 = vmatpush.bf16.msrb.mxu2 %v4557_v9  ;;  %v3910_v50 = vperm.slane %v3904_v25, %v6972_v34  ;;  %v3997_v12 = vrot.slane %v3970_v55, 4 }
 0x884   : > { %v3985_v39 = vrot.slane %v3966_v44, 4 }
 0x885   : > { %v3929_v10 = vrot.slane %v3910_v50, 4 }
 0x895   : > { %v4384_v38 = vpop.xlane.xlu1 %4383 }
 0x896   : > { %6119 = vrcp.f32 %v4384_v38  ;;  %v4429_v49 = vand.u32 2147483648, %v4384_v38  ;;  %v4427_v27 = vand.u32 2147483647, %v4384_v38  ;;  %vm4423_vm8 = vweird.f32 %v4384_v38 }
 0x898   : > { %v4430_v23 = vor.u32 1.1754944e-38, %v4429_v49  ;;  %vm4428_vm10 = vcmp.eq.f32.partialorder %v4427_v27, 8.507059e+37 }
 0x89c   : > { %v6120_v46 = vpop.eup %6119 }
 0x89d   : > { %v4419_v11 = vmul.f32 %v6120_v46, %v4384_v38  ;;  %vm4424_vm7 = vweird.f32 %v6120_v46 }
 0x89e   : > { %vm4425_vm9 = vmor %vm4423_vm8, %vm4424_vm7 }
 0x89f   : > { %v4420_v26 = vsub.f32 1.0, %v4419_v11 }
 0x8a1   : > { %v4421_v43 = vmul.f32 %v6120_v46, %v4420_v26 }
 0x8a3   : > { %v4422_v2 = vadd.f32 %v6120_v46, %v4421_v43 }
 0x8a5   : > { %v4426_v45 = vsel %vm4425_vm9, %v6120_v46, %v4422_v2 }
 0x8a6   : > { %v4431_v62 = vsel %vm4428_vm10, %v4430_v23, %v4426_v45 }
 0x8a7   : > { %v4432_v28 = vmul.f32 %v8001_v52, %v4431_v62  ;;  %v8136_v30 = vpop.xlane.xlu2 %4380  ;;  %v3906_v52 = vsel %vm1180_vm2, %v6027_v20, %v3905_v18 }
 0x8a8   : > { %6121 = vrcp.f32 %v8136_v30  ;;  %v3914_v14 = vperm.slane %v3906_v52, %v6972_v34  ;;  %v4414_v41 = vand.u32 2147483648, %v8136_v30  ;;  %vm4408_vm13 = vweird.f32 %v8136_v30 }
 0x8a9   : > { %v4524_v37 = vpack.c.bf16 %v4432_v28, %v4432_v28  ;;  %v4412_v7 = vand.u32 2147483647, %v8136_v30 }
 0x8aa   : > { %v3941_v33 = vrot.slane %v3914_v14, 4  ;;  %v4415_v26 = vor.u32 1.1754944e-38, %v4414_v41 }
 0x8ab   : > { %5722 = vmatmul.msk.bf16.vlgmr.msrb.gmra.mxu2 %vm2543_vm11, %v4524_v37  ;;  %vm4413_vm0 = vcmp.eq.f32.partialorder %v4412_v7, 8.507059e+37 }
 0x8ad   : > { %v6031_v48 = vpop.permute.xlu1 %6030 }
 0x8ae   : > { %v6122_v17 = vpop.eup %6121  ;;  %v6033_v35 = vunpack.i.h.bf16 %v6031_v48  ;;  %v6032_v8 = vunpack.i.l.bf16 %v6031_v48 }
 0x8af   : > { %v4404_v6 = vmul.f32 %v6122_v17, %v8136_v30  ;;  %vm4409_vm14 = vweird.f32 %v6122_v17 }
 0x8b0   : > { %v3971_v13 = vrot.slane %v6033_v35, 4  ;;  %v3974_v32 = vsel %vm1180_vm2, %v6033_v35, %v3973_v47  ;;  %v3915_v24 = vrot.slane %v6032_v8, 4  ;;  %v3918_v0 = vsel %vm1180_vm2, %v6032_v8, %v3917_v19  ;;  %vm8168_vm15 = vmor %vm4408_vm13, %vm4409_vm14 }
 0x8b1   : > { %v4405_v31 = vsub.f32 1.0, %v4404_v6  ;;  %v3982_v15 = vperm.slane %v3974_v32, %v6972_v34  ;;  %v3926_v57 = vperm.slane %v3918_v0, %v6972_v34 }
 0x8b2   : > { %v3972_v9 = vsel %vm1180_vm2, %v3971_v13, %v6023_v16  ;;  %v3916_v38 = vsel %vm1180_vm2, %v3915_v24, %v6022_v58 }
 0x8b3   : > { %v4406_v46 = vmul.f32 %v6122_v17, %v4405_v31  ;;  %v3978_v22 = vperm.slane %v3972_v9, %v6972_v34  ;;  %v3922_v11 = vperm.slane %v3916_v38, %v6972_v34  ;;  %v3995_v21 = vrot.slane %v3982_v15, 4 }
 0x8b4   : > { %v3939_v20 = vrot.slane %v3926_v57, 4  ;;  %v3942_v49 = vsel %vm1180_vm2, %v3926_v57, %v3941_v33  ;;  %v3998_v37 = vsel %vm1180_vm2, %v3982_v15, %v3997_v12 }
 0x8b5   : > { %v4407_v43 = vadd.f32 %v6122_v17, %v4406_v46  ;;  %v3983_v27 = vrot.slane %v3978_v22, 4  ;;  %v3927_v2 = vrot.slane %v3922_v11, 4  ;;  %v3930_v63 = vsel %vm1180_vm2, %v3922_v11, %v3929_v10 }
 0x8b6   : > { %v3938_v23 = vperm.slane %v3930_v63, %v6984_v51  ;;  %v3940_v36 = vsel %vm1180_vm2, %v3939_v20, %v3914_v14  ;;  %v3950_v45 = vperm.slane %v3942_v49, %v6984_v51  ;;  %v3986_v62 = vsel %vm1180_vm2, %v3978_v22, %v3985_v39  ;;  %v8194_v24 = vpop.xlane.xlu2 %4392 }
 0x8b7   : > { %v4411_v54 = vsel %vm8168_vm15, %v6122_v17, %v4407_v43  ;;  %v3928_v28 = vsel %vm1180_vm2, %v3927_v2, %v3910_v50  ;;  %v3946_v18 = vperm.slane %v3940_v36, %v6984_v51  ;;  %v3984_v30 = vsel %vm1180_vm2, %v3983_v27, %v3966_v44 }
 0x8b8   : > { %v3934_v29 = vperm.slane %v3928_v28, %v6984_v51  ;;  %v3953_v25 = vrot.slane %v3938_v23, 4  ;;  %v3957_v16 = vrot.slane %v3950_v45, 4  ;;  %v3994_v52 = vperm.slane %v3986_v62, %v6984_v51 }
 0x8b9   : > { %v3955_v58 = vrot.slane %v3946_v18, 4  ;;  %v4416_v47 = vsel %vm4413_vm0, %v4415_v26, %v4411_v54  ;;  %v3990_v14 = vperm.slane %v3984_v30, %v6984_v51  ;;  %v3996_v48 = vsel %vm1180_vm2, %v3995_v21, %v3970_v55 }
 0x8ba   : > { %v3958_v50 = vsel %vm1180_vm2, 0.0, %v3957_v16  ;;  %v4002_v17 = vperm.slane %v3996_v48, %v6984_v51  ;;  %v4006_v44 = vperm.slane %v3998_v37, %v6984_v51  ;;  %v3954_v19 = vsel %vm1180_vm2, 0.0, %v3953_v25 }
 0x8bb   : > { %v4009_v35 = vrot.slane %v3994_v52, 4  ;;  %v4015_v12 = vsel %vm1180_vm2, %v3953_v25, %v3934_v29  ;;  %v4417_v8 = vmul.f32 %v8005_v59, %v4416_v47  ;;  %v3956_v39 = vsel %vm1180_vm2, 0.0, %v3955_v58 }
 0x8bc   : > { %v4011_v10 = vrot.slane %v4002_v17, 4  ;;  %v4013_v6 = vrot.slane %v4006_v44, 4  ;;  %v3951_v41 = vrot.slane %v3934_v29, 4  ;;  %v4007_v13 = vrot.slane %v3990_v14, 4 }
 0x8bd   : > { %v4026_v55 = vsel %vm1180_vm2, %v3957_v16, %v3946_v18  ;;  %v4031_v32 = vrot.slane %v3958_v50, 4  ;;  %v8200_v31 = vperm.slane %v4015_v12, %v6972_v34  ;;  %v4020_v15 = vrot.slane %v3954_v19, 4 }
 0x8be   : > { %v8196_v0 = vpop.xlane.xlu0 %4389  ;;  %v4014_v33 = vsel %vm1180_vm2, 0.0, %v4013_v6  ;;  %v8203_v59 = vperm.slane %v4026_v55, %v6972_v34  ;;  %v4010_v57 = vsel %vm1180_vm2, 0.0, %v4009_v35  ;;  %v4080_v9 = vsel %vm1180_vm2, %v4013_v6, %v4002_v17 }
 0x8bf   : > { %v4032_v7 = vsel %vm1180_vm2, %v4031_v32, %v3956_v39  ;;  %v4085_v38 = vrot.slane %v4014_v33, 4  ;;  %v4012_v46 = vsel %vm1180_vm2, 0.0, %v4011_v10  ;;  %6123 = vrcp.f32 %v8194_v24 }
 0x8c0   : > { %v8210_v22 = vperm.slane %v4032_v7, %v6972_v34  ;;  %v4051_v11 = vrot.slane %v8203_v59, 4  ;;  %v3952_v26 = vsel %vm1180_vm2, 0.0, %v3951_v41  ;;  %v4008_v21 = vsel %vm1180_vm2, 0.0, %v4007_v13 }
 0x8c1   : > { %v4069_v20 = vsel %vm1180_vm2, %v4009_v35, %v3990_v14  ;;  %v4074_v49 = vrot.slane %v4010_v57, 4  ;;  %v8218_v43 = vperm.slane %v4080_v9, %v6972_v34  ;;  %6125 = vrcp.f32 %v8196_v0 }
 0x8c2   : > { %v4086_v27 = vsel %vm1180_vm2, %v4085_v38, %v4012_v46  ;;  %v4472_v2 = vand.u32 2147483647, %v8194_v24  ;;  %v4474_v63 = vand.u32 2147483648, %v8194_v24  ;;  %v4459_v3 = vand.u32 2147483648, %v8196_v0 }
 0x8c3   : > { %v4523_v23 = vpack.c.bf16 %v4417_v8, %v4417_v8  ;;  %v4021_v36 = vsel %vm1180_vm2, %v4020_v15, %v3952_v26  ;;  %v4039_v45 = vrot.slane %v8200_v31, 4  ;;  %v4052_v62 = vsel %vm1180_vm2, %v8210_v22, %v4051_v11 }
 0x8c4   : > { %v8230_v54 = vperm.slane %v4069_v20, %v6972_v34  ;;  %v4457_v28 = vand.u32 2147483647, %v8196_v0  ;;  %v4025_v30 = vperm.slane %v4021_v36, %v6972_v34  ;;  %v8237_v29 = vperm.slane %v4052_v62, %v6984_v51 }
 0x8c5   : > { %v6124_v25 = vpop.eup %6123  ;;  %v8240_v16 = vperm.slane %v4086_v27, %v6972_v34  ;;  %v4105_v37 = vrot.slane %v8218_v43, 4  ;;  %vm4468_vm4 = vweird.f32 %v8194_v24  ;;  %5721 = vmatmul.msk.bf16.vlgmr.msrb.gmra.mxu1 %vm2543_vm11, %v4523_v23  ;;  %v4475_v52 = vor.u32 1.1754944e-38, %v4474_v63 }
 0x8c6   : > { %v8233_v18 = vpop.xlane.xlu0 %4386  ;;  %v4464_v58 = vmul.f32 %v6124_v25, %v8194_v24  ;;  %vm4453_vm5 = vweird.f32 %v8196_v0  ;;  %v4040_v47 = vsel %vm1180_vm2, %v4025_v30, %v4039_v45  ;;  %v4065_v14 = vrot.slane %v8237_v29, 4 }
 0x8c7   : > { %6127 = vrcp.f32 %v8233_v18  ;;  %v6126_v48 = vpop.eup %6125  ;;  %vm8250_vm6 = vcmp.eq.f32.partialorder %v4472_v2, 8.507059e+37  ;;  %v4460_v17 = vor.u32 1.1754944e-38, %v4459_v3  ;;  %v4444_v44 = vand.u32 2147483648, %v8233_v18 }
 0x8c8   : > { %v8256_v19 = vperm.slane %v4040_v47, %v6984_v51  ;;  %v4075_v35 = vsel %vm1180_vm2, %v4074_v49, %v4008_v21  ;;  %v4465_v12 = vsub.f32 1.0, %v4464_v58  ;;  %v4449_v8 = vmul.f32 %v6126_v48, %v8196_v0 }
 0x8c9   : > { %vm8260_vm7 = vcmp.eq.f32.partialorder %v4457_v28, 8.507059e+37  ;;  %v4442_v10 = vand.u32 2147483647, %v8233_v18  ;;  %v4079_v6 = vperm.slane %v4075_v35, %v6972_v34  ;;  %v4093_v13 = vrot.slane %v8230_v54, 4 }
 0x8ca   : > { %v4066_v41 = vsel %vm1180_vm2, %v4065_v14, %v8256_v19  ;;  %v4106_v55 = vsel %vm1180_vm2, %v8240_v16, %v4105_v37  ;;  %v4037_v32 = vrot.slane %v4025_v30, 4  ;;  %v4466_v33 = vmul.f32 %v6124_v25, %v4465_v12 }
 0x8cb   : > { %vm4469_vm8 = vweird.f32 %v6124_v25  ;;  %v4450_v15 = vsub.f32 1.0, %v4449_v8  ;;  %vm4438_vm9 = vweird.f32 %v8233_v18  ;;  %vm4454_vm10 = vweird.f32 %v6126_v48 }
 0x8cc   : > { %v4445_v7 = vor.u32 1.1754944e-38, %v4444_v44  ;;  %v4094_v9 = vsel %vm1180_vm2, %v4079_v6, %v4093_v13  ;;  %v4114_v38 = vperm.slane %v4106_v55, %v6984_v51  ;;  %v4467_v46 = vadd.f32 %v6124_v25, %v4466_v33  ;;  %vm4470_vm14 = vmor %vm4468_vm4, %vm4469_vm8 }
 0x8cd   : > { %v6128_v57 = vpop.eup %6127  ;;  %v4451_v11 = vmul.f32 %v6126_v48, %v4450_v15  ;;  %vm8275_vm13 = vcmp.eq.f32.partialorder %v4442_v10, 8.507059e+37  ;;  %v4135_v49 = vpack.c.bf16 %v4066_v41, %v4066_v41  ;;  %v4038_v27 = vsel %vm1180_vm2, %v4037_v32, %v8200_v31  ;;  %vm4455_vm15 = vmor %vm4453_vm5, %vm4454_vm10 }
 0x8ce   : > { %v4434_v26 = vmul.f32 %v6128_v57, %v8233_v18  ;;  %v8279_v20 = vpop.xlane.xlu0 %4395  ;;  %v4049_v2 = vrot.slane %v8210_v22, 4  ;;  %v4091_v63 = vrot.slane %v4079_v6, 4  ;;  %v4471_v3 = vsel %vm4470_vm14, %v6124_v25, %v4467_v46 }
 0x8cf   : > { %6129 = vrcp.f32 %v8279_v20  ;;  %v4452_v23 = vadd.f32 %v6126_v48, %v4451_v11  ;;  %v4102_v45 = vperm.slane %v4094_v9, %v6984_v51  ;;  %vm4439_vm0 = vweird.f32 %v6128_v57 }
 0x8d0   : > { %v4435_v36 = vsub.f32 1.0, %v4434_v26  ;;  %v4487_v24 = vand.u32 2147483647, %v8279_v20  ;;  %v4489_v62 = vand.u32 2147483648, %v8279_v20  ;;  %v4119_v28 = vrot.slane %v4114_v38, 4  ;;  %vm4440_vm5 = vmor %vm4438_vm9, %vm4439_vm0 }
 0x8d1   : > { %v8295_v31 = vsel %vm8250_vm6, %v4475_v52, %v4471_v3  ;;  %v4456_v22 = vsel %vm4455_vm15, %v6126_v48, %v4452_v23  ;;  %v4665_v25 = vunpack.c.l.b16 %v4135_v49  ;;  %v4044_v0 = vperm.slane %v4038_v27, %v6984_v51 }
 0x8d2   : > { %v4436_v30 = vmul.f32 %v6128_v57, %v4435_v36  ;;  %v4461_v37 = vsel %vm8260_vm7, %v4460_v17, %v4456_v22  ;;  %v4120_v58 = vsel %vm1180_vm2, %v4119_v28, %v4102_v45  ;;  %v4050_v47 = vsel %vm1180_vm2, %v4049_v2, %v8203_v59 }
 0x8d3   : > { %v4462_v14 = vmul.f32 %v8014_v40, %v4461_v37  ;;  %vm4483_vm4 = vweird.f32 %v8279_v20  ;;  %v4136_v52 = vpack.c.bf16 %v4120_v58, %v4120_v58  ;;  %v4056_v48 = vperm.slane %v4050_v47, %v6984_v51 }
 0x8d4   : > { %v4437_v44 = vadd.f32 %v6128_v57, %v4436_v30  ;;  %v4092_v17 = vsel %vm1180_vm2, %v4091_v63, %v8230_v54  ;;  %v4103_v35 = vrot.slane %v8240_v16, 4  ;;  %v4067_v59 = vrot.slane %v8256_v19, 4 }
 0x8d5   : > { %v6130_v50 = vpop.eup %6129  ;;  %v4121_v12 = vrot.slane %v4102_v45, 4  ;;  %vm8314_vm7 = vcmp.eq.f32.partialorder %v4487_v24, 8.507059e+37  ;;  %v4526_v10 = vpack.c.bf16 %v4462_v14, %v4462_v14  ;;  %v4666_v6 = vunpack.c.l.b16 %v4136_v52 }
 0x8d6   : > { %v4441_v40 = vsel %vm4440_vm5, %v6128_v57, %v4437_v44  ;;  %v4479_v8 = vmul.f32 %v6130_v50, %v8279_v20  ;;  %vm4484_vm6 = vweird.f32 %v6130_v50  ;;  %v4061_v41 = vrot.slane %v4056_v48, 4 }
 0x8d7   : > { %v4446_v18 = vsel %vm8275_vm13, %v4445_v7, %v4441_v40  ;;  %v4098_v54 = vperm.slane %v4092_v17, %v6984_v51  ;;  %5724 = vmatmul.msk.bf16.vlgmr.msrb.gmra.mxu0 %vm2543_vm11, %v4526_v10  ;;  %v4104_v13 = vsel %vm1180_vm2, %v4103_v35, %v8218_v43  ;;  %v4068_v55 = vsel %vm1180_vm2, %v8237_v29, %v4067_v59  ;;  %vm4485_vm8 = vmor %vm4483_vm4, %vm4484_vm6 }
 0x8d8   : > { %v4447_v16 = vmul.f32 %v8018_v53, %v4446_v18  ;;  %v4480_v19 = vsub.f32 1.0, %v4479_v8  ;;  %v4667_v32 = vpack.c.b16 %v4666_v6, %v4665_v25  ;;  %v4062_v33 = vsel %vm1180_vm2, %v4061_v41, %v4044_v0 }
 0x8d9   : > { %v4110_v15 = vperm.slane %v4104_v13, %v6984_v51  ;;  %v4122_v57 = vsel %vm1180_vm2, %v4114_v38, %v4121_v12  ;;  %v4131_v9 = vpack.c.bf16 %v4062_v33, %v4062_v33  ;;  %v4137_v46 = vpack.c.bf16 %v4068_v55, %v4068_v55 }
 0x8da   : > { %v4481_v7 = vmul.f32 %v6130_v50, %v4480_v19  ;;  %v4138_v53 = vpack.c.bf16 %v4122_v57, %v4122_v57  ;;  %v4490_v11 = vor.u32 1.1754944e-38, %v4489_v62  ;;  %4679 = vmatpush.bf16.msrb.mxu3 %v4667_v32  ;;  %v4063_v21 = vrot.slane %v4044_v0, 4 }
 0x8db   : > { %v4115_v26 = vrot.slane %v4110_v15, 4  ;;  %v4117_v49 = vrot.slane %v4098_v54, 4  ;;  %v4621_v27 = vunpack.c.l.b16 %v4131_v9  ;;  %v4687_v2 = vunpack.c.l.b16 %v4137_v46 }
 0x8dc   : > { %v4482_v43 = vadd.f32 %v6130_v50, %v4481_v7  ;;  %v4688_v29 = vunpack.c.l.b16 %v4138_v53  ;;  %v4064_v38 = vsel %vm1180_vm2, %v4056_v48, %v4063_v21  ;;  %v4525_v23 = vpack.c.bf16 %v4447_v16, %v4447_v16 }
 0x8dd   : > { %v4116_v63 = vsel %vm1180_vm2, %v4115_v26, %v4098_v54  ;;  %v4118_v3 = vsel %vm1180_vm2, %v4110_v15, %v4117_v49  ;;  %v4133_v62 = vpack.c.bf16 %v4064_v38, %v4064_v38  ;;  %v4477_v37 = vmul.f32 %v8010_v60, %v8295_v31 }
 0x8de   : > { %v4486_v36 = vsel %vm4485_vm8, %v6130_v50, %v4482_v43  ;;  %v4132_v45 = vpack.c.bf16 %v4116_v63, %v4116_v63  ;;  %v4689_v24 = vpack.c.b16 %v4688_v29, %v4687_v2  ;;  %v4134_v22 = vpack.c.bf16 %v4118_v3, %v4118_v3  ;;  %5723 = vmatmul.msk.bf16.vlgmr.msra.gmra.mxu3 %vm2543_vm11, %v4525_v23 }
 0x8df   : > { %v4491_v28 = vsel %vm8314_vm7, %v4490_v11, %v4486_v36  ;;  %v4643_v25 = vunpack.c.l.b16 %v4133_v62  ;;  %v4527_v44 = vpack.c.bf16 %v4477_v37, %v4477_v37  ;;  %vm5122_vm8 = vcmask 523264  }
 0x8e0   : > { %v4492_v20 = vmul.f32 %v8025_v42, %v4491_v28  ;;  %v4622_v30 = vunpack.c.l.b16 %v4132_v45  ;;  %4701 = vmatpush.bf16.msra.mxu0 %v4689_v24  ;;  %v4644_v58 = vunpack.c.l.b16 %v4134_v22 }
 0x8e2   : > { %v4623_v0 = vpack.c.b16 %v4622_v30, %v4621_v27  ;;  %v4645_v47 = vpack.c.b16 %v4644_v58, %v4643_v25  ;;  %v4528_v14 = vpack.c.bf16 %v4492_v20, %v4492_v20 }
 0x8e4   : > { %4635 = vmatpush.bf16.msra.mxu1 %v4623_v0  ;;  %4657 = vmatpush.bf16.msra.mxu2 %v4645_v47 }
 0x8e7   : > { %5725 = vmatmul.msk.bf16.vlgmr.msra.gmra.mxu1 %vm2543_vm11, %v4527_v44  ;;  %5726 = vmatmul.msk.bf16.vlgmr.msra.gmra.mxu2 %vm2543_vm11, %v4528_v14 }
 0x8ec   : > { %v4399_v52 = vpop.xlane.xlu0 %4398 }
 0x8ed   : > { %6131 = vrcp.f32 %v4399_v52  ;;  %v4504_v35 = vand.u32 2147483648, %v4399_v52  ;;  %v4502_v31 = vand.u32 2147483647, %v4399_v52  ;;  %vm4498_vm10 = vweird.f32 %v4399_v52 }
 0x8ef   : > { %v4505_v40 = vor.u32 1.1754944e-38, %v4504_v35  ;;  %vm4503_vm14 = vcmp.eq.f32.partialorder %v4502_v31, 8.507059e+37 }
 0x8f3   : > { %v6132_v42 = vpop.eup %6131 }
 0x8f4   : > { %v4494_v48 = vmul.f32 %v6132_v42, %v4399_v52  ;;  %v4402_v50 = vpop.xlane.xlu0 %4401  ;;  %vm4499_vm9 = vweird.f32 %v6132_v42 }
 0x8f5   : > { %6133 = vrcp.f32 %v4402_v50  ;;  %vm4500_vm13 = vmor %vm4498_vm10, %vm4499_vm9  ;;  %v4519_v41 = vand.u32 2147483648, %v4402_v50  ;;  %v4517_v16 = vand.u32 2147483647, %v4402_v50  ;;  %vm4513_vm0 = vweird.f32 %v4402_v50 }
 0x8f6   : > { %v4495_v17 = vsub.f32 1.0, %v4494_v48 }
 0x8f7   : > { %v4520_v55 = vor.u32 1.1754944e-38, %v4519_v41  ;;  %vm4518_vm5 = vcmp.eq.f32.partialorder %v4517_v16, 8.507059e+37 }
 0x8f8   : > { %v4496_v60 = vmul.f32 %v6132_v42, %v4495_v17 }
 0x8fa   : > { %v4497_v59 = vadd.f32 %v6132_v42, %v4496_v60 }
 0x8fb   : > { %v6134_v12 = vpop.eup %6133 }
 0x8fc   : > { %v4501_v8 = vsel %vm4500_vm13, %v6132_v42, %v4497_v59  ;;  %v4509_v39 = vmul.f32 %v6134_v12, %v4402_v50  ;;  %vm4514_vm15 = vweird.f32 %v6134_v12 }
 0x8fd   : > { %v4506_v10 = vsel %vm4503_vm14, %v4505_v40, %v4501_v8  ;;  %vm4515_vm4 = vmor %vm4513_vm0, %vm4514_vm15 }
 0x8fe   : > { %v4507_v18 = vmul.f32 %v8112_v56, %v4506_v10  ;;  %v4510_v6 = vsub.f32 1.0, %v4509_v39 }
 0x900   : > { %v4511_v54 = vmul.f32 %v6134_v12, %v4510_v6  ;;  %v4529_v19 = vpack.c.bf16 %v4507_v18, %v4507_v18 }
 0x902   : > { %v4512_v13 = vadd.f32 %v6134_v12, %v4511_v54  ;;  %5727 = vmatmul.msk.bf16.vlgmr.msrb.gmra.mxu3 %vm2543_vm11, %v4529_v19 }
 0x904   : > { %v4516_v32 = vsel %vm4515_vm4, %v6134_v12, %v4512_v13 }
 0x905   : > { %v4521_v33 = vsel %vm4518_vm5, %v4520_v55, %v4516_v32 }
 0x906   : > { %v4522_v15 = vmul.f32 %v8127_v61, %v4521_v33 }
 0x908   : > { %v4530_v57 = vpack.c.bf16 %v4522_v15, %v4522_v15 }
 0x90a   : > { %5728 = vmatmul.msk.bf16.vlgmr.msra.gmra.mxu0 %vm2543_vm11, %v4530_v57 }
 0x92e   : > { %v4571_v56 = vpop.f32.mrf.mxu2 }
 0x92f   : > { %v4721_v11 = vrot.slane %v4571_v56, 4 }
 0x936   : > { %v4573_v7 = vpop.f32.mrf.mxu2 }
 0x942   : > { %v4549_v9 = vpop.f32.mrf.mxu1 }
 0x943   : > { %v4709_v2 = vrot.slane %v4549_v9, 4 }
 0x94a   : > { %v4551_v46 = vpop.f32.mrf.mxu1 }
 0x954   : > { %v4615_v53 = vpop.f32.mrf.mxu0 }
 0x955   : > { %v4719_v26 = vrot.slane %v4615_v53, 4  ;;  %v4722_v21 = vsel %vm1180_vm2, %v4615_v53, %v4721_v11 }
 0x956   : > { %v4730_v27 = vperm.slane %v4722_v21, %v6972_v34 }
 0x957   : > { %v4720_v43 = vsel %vm1180_vm2, %v4719_v26, %v4571_v56 }
 0x958   : > { %v4726_v61 = vperm.slane %v4720_v43, %v6972_v34  ;;  %v4743_v3 = vrot.slane %v4730_v27, 4 }
 0x95a   : > { %v4731_v24 = vrot.slane %v4726_v61, 4 }
 0x95c   : > { %v4617_v49 = vpop.f32.mrf.mxu0 }
 0x961   : > { %v4593_v29 = vpop.f32.mrf.mxu3 }
 0x962   : > { %v4707_v63 = vrot.slane %v4593_v29, 4  ;;  %v4710_v38 = vsel %vm1180_vm2, %v4593_v29, %v4709_v2 }
 0x963   : > { %v4718_v36 = vperm.slane %v4710_v38, %v6972_v34 }
 0x964   : > { %v8353_v23 = vpop.f32.mrf.mxu1  ;;  %v4708_v45 = vsel %vm1180_vm2, %v4707_v63, %v4549_v9 }
 0x965   : > { %v4714_v62 = vperm.slane %v4708_v45, %v6972_v34  ;;  %v4744_v28 = vsel %vm1180_vm2, %v4743_v3, %v4718_v36  ;;  %v4745_v22 = vrot.slane %v4718_v36, 4  ;;  %v4834_v38 = vrot.slane %v8353_v23, 4 }
 0x966   : > { %v4750_v20 = vperm.slane %v4744_v28, %v6984_v51 }
 0x967   : > { %v4732_v30 = vsel %vm1180_vm2, %v4731_v24, %v4714_v62  ;;  %v4733_v25 = vrot.slane %v4714_v62, 4  ;;  %v4746_v37 = vsel %vm1180_vm2, %v4730_v27, %v4745_v22 }
 0x968   : > { %v4738_v58 = vperm.slane %v4732_v30, %v6984_v51  ;;  %v4754_v0 = vperm.slane %v4746_v37, %v6984_v51  ;;  %v4759_v52 = vrot.slane %v4750_v20, 4 }
 0x969   : > { %v4734_v47 = vsel %vm1180_vm2, %v4726_v61, %v4733_v25  ;;  %v4595_v14 = vpop.f32.mrf.mxu3 }
 0x96a   : > { %v4742_v44 = vperm.slane %v4734_v47, %v6984_v51  ;;  %v4761_v42 = vrot.slane %v4754_v0, 4  ;;  %v4659_v48 = vpop.f32.mrf.mxu2  ;;  %v4755_v17 = vrot.slane %v4738_v58, 4  ;;  %v4760_v8 = vsel %vm1180_vm2, 0.0, %v4759_v52 }
 0x96b   : > { %v4846_v36 = vrot.slane %v4659_v48, 4 }
 0x96c   : > { %v4639_v50 = vpop.f32.mrf.mxu1  ;;  %v4757_v35 = vrot.slane %v4742_v44, 4  ;;  %v4762_v60 = vsel %vm1180_vm2, 0.0, %v4761_v42  ;;  %v4774_v31 = vsel %vm1180_vm2, %v4761_v42, %v4750_v20  ;;  %v4756_v54 = vsel %vm1180_vm2, 0.0, %v4755_v17 }
 0x96d   : > { %v4778_v59 = vperm.slane %v4774_v31, %v6972_v34  ;;  %v4779_v12 = vrot.slane %v4762_v60, 4 }
 0x96e   : > { %v4758_v40 = vsel %vm1180_vm2, 0.0, %v4757_v35  ;;  %v4763_v39 = vsel %vm1180_vm2, %v4757_v35, %v4738_v58 }
 0x96f   : > { %v4768_v10 = vrot.slane %v4758_v40, 4  ;;  %v4780_v18 = vsel %vm1180_vm2, %v4779_v12, %v4760_v8  ;;  %v4799_v6 = vrot.slane %v4778_v59, 4  ;;  %v4767_v41 = vperm.slane %v4763_v39, %v6972_v34 }
 0x970   : > { %v4784_v16 = vperm.slane %v4780_v18, %v6972_v34 }
 0x971   : > { %v4769_v19 = vsel %vm1180_vm2, %v4768_v10, %v4756_v54  ;;  %v4787_v13 = vrot.slane %v4767_v41, 4 }
 0x972   : > { %v4661_v55 = vpop.f32.mrf.mxu2  ;;  %v4773_v32 = vperm.slane %v4769_v19, %v6972_v34  ;;  %v4800_v33 = vsel %vm1180_vm2, %v4784_v16, %v4799_v6  ;;  %v4797_v15 = vrot.slane %v4784_v16, 4 }
 0x973   : > { %v4808_v57 = vperm.slane %v4800_v33, %v6984_v51 }
 0x974   : > { %v4788_v56 = vsel %vm1180_vm2, %v4773_v32, %v4787_v13  ;;  %v4785_v7 = vrot.slane %v4773_v32, 4  ;;  %v4798_v9 = vsel %vm1180_vm2, %v4797_v15, %v4778_v59 }
 0x975   : > { %v4796_v46 = vperm.slane %v4788_v56, %v6984_v51  ;;  %v4813_v53 = vrot.slane %v4808_v57, 4  ;;  %v4804_v11 = vperm.slane %v4798_v9, %v6984_v51 }
 0x976   : > { %v4786_v26 = vsel %vm1180_vm2, %v4785_v7, %v4767_v41 }
 0x977   : > { %v8386_v21 = vsel %vm1180_vm2, %v4813_v53, %v4796_v46  ;;  %v4815_v49 = vrot.slane %v4796_v46, 4  ;;  %v4792_v43 = vperm.slane %v4786_v26, %v6984_v51  ;;  %v4809_v27 = vrot.slane %v4804_v11, 4 }
 0x979   : > { %v8390_v2 = vsel %vm1180_vm2, %v4808_v57, %v4815_v49  ;;  %v4811_v61 = vrot.slane %v4792_v43, 4  ;;  %v8393_v29 = vsel %vm1180_vm2, %v4809_v27, %v4792_v43 }
 0x97b   : > { %v8396_v63 = vsel %vm1180_vm2, %v4804_v11, %v4811_v61 }
 0x985   : > { %v4681_v3 = vpop.f32.mrf.mxu3 }
 0x986   : > { %v4832_v45 = vrot.slane %v4681_v3, 4  ;;  %v4835_v24 = vsel %vm1180_vm2, %v4681_v3, %v4834_v38 }
 0x987   : > { %v4843_v62 = vperm.slane %v4835_v24, %v6972_v34  ;;  %v4703_v28 = vpop.f32.mrf.mxu0 }
 0x988   : > { %v4833_v22 = vsel %vm1180_vm2, %v4832_v45, %v8353_v23  ;;  %v4844_v20 = vrot.slane %v4703_v28, 4  ;;  %v4847_v30 = vsel %vm1180_vm2, %v4703_v28, %v4846_v36 }
 0x989   : > { %v4839_v25 = vperm.slane %v4833_v22, %v6972_v34  ;;  %v4870_v37 = vrot.slane %v4843_v62, 4  ;;  %v4855_v58 = vperm.slane %v4847_v30, %v6972_v34 }
 0x98a   : > { %v4845_v0 = vsel %vm1180_vm2, %v4844_v20, %v4659_v48 }
 0x98b   : > { %v4858_v47 = vrot.slane %v4839_v25, 4  ;;  %v4851_v14 = vperm.slane %v4845_v0, %v6972_v34  ;;  %v4868_v44 = vrot.slane %v4855_v58, 4  ;;  %v4871_v52 = vsel %vm1180_vm2, %v4855_v58, %v4870_v37  ;;  %v5795_v58 = vld [vmem:[%s878_s9 + $0x8] sm:$0xff] }
 0x98c   : > { %v4879_v42 = vperm.slane %v4871_v52, %v6984_v51  ;;  %4983 = vmatpush.bf16.msrb.mxu1 %v5795_v58 }
 0x98d   : > { %v4856_v50 = vrot.slane %v4851_v14, 4  ;;  %v4859_v23 = vsel %vm1180_vm2, %v4851_v14, %v4858_v47  ;;  %v4869_v17 = vsel %vm1180_vm2, %v4868_v44, %v4843_v62  ;;  %v4683_v35 = vpop.f32.mrf.mxu3 }
 0x98e   : > { %v4867_v60 = vperm.slane %v4859_v23, %v6984_v51  ;;  %v4875_v31 = vperm.slane %v4869_v17, %v6984_v51  ;;  %v4886_v59 = vrot.slane %v4879_v42, 4 }
 0x98f   : > { %v4857_v48 = vsel %vm1180_vm2, %v4856_v50, %v4839_v25  ;;  %v4705_v12 = vpop.f32.mrf.mxu0 }
 0x990   : > { %v4863_v40 = vperm.slane %v4857_v48, %v6984_v51  ;;  %v4882_v8 = vrot.slane %v4867_v60, 4  ;;  %v4884_v39 = vrot.slane %v4875_v31, 4  ;;  %v4887_v10 = vsel %vm1180_vm2, 0.0, %v4886_v59  ;;  %v6058_v12 = vld [vmem:[%s6927_s11 + $0x7] ss:$0 sm:$0xff] }
 0x991   : > { %v4899_v18 = vsel %vm1180_vm2, %v4886_v59, %v4875_v31  ;;  %v4904_v6 = vrot.slane %v4887_v10, 4 }
 0x992   : > { %v4880_v41 = vrot.slane %v4863_v40, 4  ;;  %v4883_v54 = vsel %vm1180_vm2, 0.0, %v4882_v8  ;;  %v4885_v16 = vsel %vm1180_vm2, 0.0, %v4884_v39  ;;  %v4888_v19 = vsel %vm1180_vm2, %v4882_v8, %v4863_v40 }
 0x993   : > { %v4893_v13 = vrot.slane %v4883_v54, 4  ;;  %v4903_v55 = vperm.slane %v4899_v18, %v6972_v34  ;;  %v4905_v32 = vsel %vm1180_vm2, %v4904_v6, %v4885_v16  ;;  %v4892_v33 = vperm.slane %v4888_v19, %v6972_v34 }
 0x994   : > { %v4909_v15 = vperm.slane %v4905_v32, %v6972_v34  ;;  %v4881_v57 = vsel %vm1180_vm2, 0.0, %v4880_v41 }
 0x995   : > { %v4924_v56 = vrot.slane %v4903_v55, 4  ;;  %v4894_v7 = vsel %vm1180_vm2, %v4893_v13, %v4881_v57  ;;  %v4912_v9 = vrot.slane %v4892_v33, 4 }
 0x996   : > { %v4898_v46 = vperm.slane %v4894_v7, %v6972_v34  ;;  %v4922_v53 = vrot.slane %v4909_v15, 4 }
 0x997   : > { %v4925_v11 = vsel %vm1180_vm2, %v4909_v15, %v4924_v56 }
 0x998   : > { %v4913_v26 = vsel %vm1180_vm2, %v4898_v46, %v4912_v9  ;;  %v4933_v49 = vperm.slane %v4925_v11, %v6984_v51  ;;  %v4910_v43 = vrot.slane %v4898_v46, 4  ;;  %v4923_v27 = vsel %vm1180_vm2, %v4922_v53, %v4903_v55  ;;  %v5797_v9 = vld [vmem:[%s888_s10 + $0x8] sm:$0xff]  ;;  %v5796_v46 = vld [vmem:[%s888_s10] sm:$0xff] }
 0x999   : > { %v4921_v61 = vperm.slane %v4913_v26, %v6984_v51  ;;  %v4929_v38 = vperm.slane %v4923_v27, %v6984_v51  ;;  %5079 = vmatpush.bf16.msrb.mxu2 %v5797_v9 }
 0x99a   : > { %v4938_v3 = vrot.slane %v4933_v49, 4  ;;  %v4911_v36 = vsel %vm1180_vm2, %v4910_v43, %v4892_v33 }
 0x99b   : > { %v4940_v45 = vrot.slane %v4921_v61, 4  ;;  %v4917_v34 = vperm.slane %v4911_v36, %v6984_v51  ;;  %v4934_v24 = vrot.slane %v4929_v38, 4 }
 0x99c   : > { %v4939_v62 = vsel %vm1180_vm2, %v4938_v3, %v4921_v61 }
 0x99d   : > { %v6039_v28 = vpack.i.bf16 %v4939_v62, %v8386_v21  ;;  %v4941_v22 = vsel %vm1180_vm2, %v4933_v49, %v4940_v45  ;;  %v4936_v20 = vrot.slane %v4917_v34, 4  ;;  %v4935_v30 = vsel %vm1180_vm2, %v4934_v24, %v4917_v34  ;;  %v5794_v21 = vld [vmem:[%s878_s9] sm:$0xff]  ;;  %5080 = vmatpush.bf16.msrb.mxu2 %v5796_v46 }
 0x99e   : > { %v6044_v25 = vpack.i.bf16 %v4941_v22, %v8390_v2  ;;  %4984 = vmatpush.bf16.msrb.mxu1 %v5794_v21  ;;  %v6059_v22 = vld [vmem:[%s6927_s11 + $0xa] ss:$0 sm:$0xff] }
 0x99f   : > { %6040 = vrot.lane.b32.xlu1 %v6039_v28, %s6587_s23  ;;  %v4937_v37 = vsel %vm1180_vm2, %v4929_v38, %v4936_v20 }
 0x9a0   : > { %6045 = vrot.lane.b32.xlu0 %v6044_v25, %s6586_s20  ;;  %v6034_v51 = vpack.i.bf16 %v4937_v37, %v8396_v63  ;;  %v6060_v37 = vld [vmem:[%s6927_s11 + $0xb] ss:$0 sm:$0xff] }
 0x9a2   : > { %6035 = vrot.lane.b32.xlu2 %v6034_v51, %s6588_s17 }
 0x9fc   : > { %v6036_v0 = vpop.permute.xlu2 %6035 }
 0x9fd   : > { %v6038_v47 = vunpack.i.h.bf16 %v6036_v0  ;;  %v6037_v2 = vunpack.i.l.bf16 %v6036_v0 }
 0x9ff   : > { %v4829_v50 = vsel %vm1914_vm3, %v8393_v29, %v6037_v2  ;;  %v4954_v63 = vsel %vm1914_vm3, %v4935_v30, %v6038_v47 }
 0xa11   : > { %v6041_v14 = vpop.permute.xlu1 %6040 }
 0xa12   : > { %v6043_v44 = vunpack.i.h.bf16 %v6041_v14  ;;  %v6042_v52 = vunpack.i.l.bf16 %v6041_v14  ;;  %v6046_v42 = vpop.permute.xlu0 %6045  ;;  %v5801_v14 = vld [vmem:[%s6913_s19 + $0x18] sm:$0xff] }
 0xa13   : > { %v6048_v23 = vunpack.i.h.bf16 %v6046_v42  ;;  %v6047_v17 = vunpack.i.l.bf16 %v6046_v42  ;;  %5130 = vmatpush.bf16.msra.mxu3 %v5801_v14  ;;  %v5798_v42 = vld [vmem:[%s6913_s19] sm:$0xff] }
 0xa14   : > { %v4830_v35 = vsel %vm2543_vm11, %v4829_v50, %v6042_v52  ;;  %v4955_v60 = vsel %vm2543_vm11, %v4954_v63, %v6043_v44  ;;  %v5800_v44 = vld [vmem:[%s6913_s19 + $0x10] sm:$0xff]  ;;  %v5799_v52 = vld [vmem:[%s6913_s19 + $0x8] sm:$0xff]  ;;  %v6061_v63 = vld [vmem:[%s1038_s6] ss:$0 sm:$0xff]  ;;  %s8619_s19 = smov (!%p5764_p3), %s8618_s28 }
 0xa15   : > { %v4831_v31 = vsel %vm2545_vm12, %v4830_v35, %v6047_v17  ;;  %v4956_v59 = vsel %vm2545_vm12, %v4955_v60, %v6048_v23 }
 0xa16   : > { %v4961_v48 = vpack.c.bf16 %v4956_v59, %v4831_v31 }
 0xa17   : > { %5131 = vmatpush.bf16.msra.mxu3 %v5800_v44 }
 0xa18   : > { %5737 = vmatmul.msk.bf16.vlgmr.msrb.gmra.mxu1 %vm1083_vm1, %v4961_v48  ;;  %v6062_v48 = vld [vmem:[%s6927_s11 + $0xe] ss:$0 sm:$0xff] }
 0xa1b   : > { %5132 = vmatpush.bf16.msra.mxu3 %v5799_v52 }
 0xa1f   : > { %5133 = vmatpush.bf16.msra.mxu3 %v5798_v42 }
 0xa95   : > { %v4986_v40 = vpop.f32.mrf.mxu1 }
 0xa96   : > { %v4991_v8 = vadd.f32 %v4986_v40, %v7562_v1 }
 0xa98   : > { %v4995_v29 = vadd.f32 %v6058_v12, %v4991_v8 }
 0xa9a   : > { %v4999_v39 = vsel %vm1083_vm1, %v4995_v29, 0.0 }
 0xa9b   : > { %5000 = vadd.xlane.f32.xlu1 %v4999_v39 }
 0xa9d   : > { %v4988_v10 = vpop.f32.mrf.mxu1 }
 0xa9e   : > { %v4992_v18 = vadd.f32 %v4988_v10, %v7564_v5 }
 0xaa0   : > { %v4996_v6 = vadd.f32 %v6058_v12, %v4992_v18 }
 0xaa2   : > { %v5002_v41 = vsel %vm1083_vm1, %v4996_v6, 0.0 }
 0xaa3   : > { %5003 = vadd.xlane.f32.xlu2 %v5002_v41 }
 0xb0e   : > { %v5001_v54 = vpop.xlane.xlu1 %5000 }
 0xb0f   : > { %v5005_v16 = vmul.f32 %v5001_v54, %v7527_v4 }
 0xb11   : > { %v5007_v19 = vsub.f32 %v4995_v29, %v5005_v16 }
 0xb13   : > { %v5009_v13 = vmul.f32 %v5007_v19, %v5007_v19 }
 0xb15   : > { %v5011_v1 = vsel %vm1083_vm1, %v5009_v13, 0.0 }
 0xb16   : > { %5012 = vadd.xlane.f32.xlu0 %v5011_v1  ;;  %v5004_v55 = vpop.xlane.xlu2 %5003 }
 0xb17   : > { %v5006_v32 = vmul.f32 %v5004_v55, %v7527_v4 }
 0xb19   : > { %v5008_v33 = vsub.f32 %v4996_v6, %v5006_v32 }
 0xb1b   : > { %v5010_v15 = vmul.f32 %v5008_v33, %v5008_v33 }
 0xb1d   : > { %v5014_v5 = vsel %vm1083_vm1, %v5010_v15, 0.0 }
 0xb1e   : > { %5015 = vadd.xlane.f32.xlu1 %v5014_v5 }
 0xb89   : > { %v5013_v57 = vpop.xlane.xlu0 %5012 }
 0xb8a   : > { %v5017_v56 = vmul.f32 %v5013_v57, %v7527_v4 }
 0xb8c   : > { %v5019_v7 = vadd.f32 1e-05, %v5017_v56 }
 0xb8e   : > { %6135 = vrsqrt.f32 %v5019_v7  ;;  %vm5027_vm3 = vweird.f32 %v5019_v7 }
 0xb91   : > { %v5016_v53 = vpop.xlane.xlu1 %5015 }
 0xb92   : > { %v5018_v11 = vmul.f32 %v5016_v53, %v7527_v4 }
 0xb94   : > { %v6136_v26 = vpop.eup %6135  ;;  %v5020_v49 = vadd.f32 1e-05, %v5018_v11 }
 0xb95   : > { %v5022_v43 = vmul.f32 %v6136_v26, %v5019_v7  ;;  %vm5028_vm2 = vweird.f32 %v6136_v26 }
 0xb96   : > { %6137 = vrsqrt.f32 %v5020_v49  ;;  %vm5029_vm11 = vmor %vm5027_vm3, %vm5028_vm2  ;;  %vm5037_vm6 = vweird.f32 %v5020_v49 }
 0xb97   : > { %v5023_v27 = vmul.f32 %v6136_v26, %v5022_v43 }
 0xb99   : > { %v5024_v61 = vmul.f32 0.5, %v5023_v27 }
 0xb9b   : > { %v5025_v38 = vsub.f32 1.5, %v5024_v61 }
 0xb9c   : > { %v6138_v3 = vpop.eup %6137 }
 0xb9d   : > { %v5026_v36 = vmul.f32 %v6136_v26, %v5025_v38  ;;  %v5032_v45 = vmul.f32 %v6138_v3, %v5020_v49  ;;  %vm5038_vm12 = vweird.f32 %v6138_v3 }
 0xb9e   : > { %vm5039_vm7 = vmor %vm5037_vm6, %vm5038_vm12 }
 0xb9f   : > { %v5033_v34 = vmul.f32 %v6138_v3, %v5032_v45  ;;  %v5030_v24 = vsel %vm5029_vm11, %v6136_v26, %v5026_v36 }
 0xba0   : > { %v5041_v20 = vmul.f32 %v5030_v24, %v5007_v19 }
 0xba1   : > { %v5034_v62 = vmul.f32 0.5, %v5033_v34  ;;  %v6064_v34 = vld [vmem:[%s6927_s11 + $0xd] ss:$0 sm:$0xff] }
 0xba2   : > { %v5044_v51 = vmul.f32 %v6059_v22, %v5041_v20 }
 0xba3   : > { %v5035_v28 = vsub.f32 1.5, %v5034_v62 }
 0xba4   : > { %v5047_v0 = vadd.f32 %v6060_v37, %v5044_v51 }
 0xba5   : > { %v5036_v30 = vmul.f32 %v6138_v3, %v5035_v28 }
 0xba7   : > { %v5040_v25 = vsel %vm5039_vm7, %v6138_v3, %v5036_v30  ;;  %v6063_v3 = vld [vmem:[%s6927_s11 + $0xc] ss:$0 sm:$0xff] }
 0xba8   : > { %v5042_v58 = vmul.f32 %v5040_v25, %v5008_v33 }
 0xbaa   : > { %v5045_v21 = vmul.f32 %v6059_v22, %v5042_v58 }
 0xbac   : > { %v5048_v47 = vadd.f32 %v6060_v37, %v5045_v21 }
 0xbae   : > { %v5053_v2 = vpack.c.bf16 %v5048_v47, %v5047_v0 }
 0xbb0   : > { %5746 = vmatmul.msk.bf16.vlgmr.msrb.gmra.mxu2 %vm1083_vm1, %v5053_v2 }
 0xc33   : > { %v5082_v50 = vpop.f32.mrf.mxu2 }
 0xc34   : > { %v5083_v23 = vadd.f32 %v6061_v63, %v5082_v50 }
 0xc36   : > { %v5087_v60 = vmax.f32 %v5083_v23, 0.0 }
 0xc3b   : > { %v5084_v17 = vpop.f32.mrf.mxu2 }
 0xc3c   : > { %v5085_v35 = vadd.f32 %v6061_v63, %v5084_v17 }
 0xc3e   : > { %v5088_v31 = vmax.f32 %v5085_v35, 0.0 }
 0xc40   : > { %v5097_v59 = vpack.c.bf16 %v5088_v31, %v5087_v60 }
 0xc42   : > { %5763 = vmatmul.msk.bf16.vlgmr.msra.gmra.mxu3 %vm5122_vm8, %v5097_v59 }
 0xcc5   : > { %v5135_v12 = vpop.f32.mrf.mxu3 }
 0xcc6   : > { %v5140_v40 = vadd.f32 %v5135_v12, %v5047_v0 }
 0xcc8   : > { %v5144_v8 = vadd.f32 %v6062_v48, %v5140_v40 }
 0xcca   : > { %v5148_v29 = vsel %vm1083_vm1, %v5144_v8, 0.0 }
 0xccb   : > { %5149 = vadd.xlane.f32.xlu1 %v5148_v29 }
 0xccd   : > { %v5137_v39 = vpop.f32.mrf.mxu3 }
 0xcce   : > { %v5141_v10 = vadd.f32 %v5137_v39, %v5048_v47 }
 0xcd0   : > { %v5145_v18 = vadd.f32 %v6062_v48, %v5141_v10 }
 0xcd2   : > { %v5151_v6 = vsel %vm1083_vm1, %v5145_v18, 0.0 }
 0xcd3   : > { %5152 = vadd.xlane.f32.xlu2 %v5151_v6 }
 0xd3e   : > { %v5150_v41 = vpop.xlane.xlu1 %5149 }
 0xd3f   : > { %v5154_v54 = vmul.f32 %v5150_v41, %v7527_v4 }
 0xd41   : > { %v5156_v16 = vsub.f32 %v5144_v8, %v5154_v54 }
 0xd43   : > { %v5158_v19 = vmul.f32 %v5156_v16, %v5156_v16 }
 0xd45   : > { %v5160_v13 = vsel %vm1083_vm1, %v5158_v19, 0.0 }
 0xd46   : > { %5161 = vadd.xlane.f32.xlu0 %v5160_v13  ;;  %v5153_v1 = vpop.xlane.xlu2 %5152 }
 0xd47   : > { %v5155_v55 = vmul.f32 %v5153_v1, %v7527_v4 }
 0xd49   : > { %v5157_v32 = vsub.f32 %v5145_v18, %v5155_v55 }
 0xd4b   : > { %v5159_v33 = vmul.f32 %v5157_v32, %v5157_v32 }
 0xd4d   : > { %v5163_v15 = vsel %vm1083_vm1, %v5159_v33, 0.0 }
 0xd4e   : > { %5164 = vadd.xlane.f32.xlu1 %v5163_v15 }
 0xdb9   : > { %v5162_v5 = vpop.xlane.xlu0 %5161 }
 0xdba   : > { %v5166_v57 = vmul.f32 %v5162_v5, %v7527_v4 }
 0xdbc   : > { %v5168_v56 = vadd.f32 1e-05, %v5166_v57 }
 0xdbe   : > { %6139 = vrsqrt.f32 %v5168_v56  ;;  %vm5176_vm10 = vweird.f32 %v5168_v56 }
 0xdc1   : > { %v5165_v7 = vpop.xlane.xlu1 %5164 }
 0xdc2   : > { %v5167_v9 = vmul.f32 %v5165_v7, %v7527_v4 }
 0xdc4   : > { %v6140_v46 = vpop.eup %6139  ;;  %v5169_v53 = vadd.f32 1e-05, %v5167_v9 }
 0xdc5   : > { %v5171_v11 = vmul.f32 %v6140_v46, %v5168_v56  ;;  %vm5177_vm9 = vweird.f32 %v6140_v46 }
 0xdc6   : > { %6141 = vrsqrt.f32 %v5169_v53  ;;  %vm5178_vm13 = vmor %vm5176_vm10, %vm5177_vm9  ;;  %vm5186_vm15 = vweird.f32 %v5169_v53 }
 0xdc7   : > { %v5172_v26 = vmul.f32 %v6140_v46, %v5171_v11 }
 0xdc9   : > { %v5173_v49 = vmul.f32 0.5, %v5172_v26 }
 0xdcb   : > { %v5174_v43 = vsub.f32 1.5, %v5173_v49 }
 0xdcc   : > { %v6142_v27 = vpop.eup %6141 }
 0xdcd   : > { %v5175_v61 = vmul.f32 %v6140_v46, %v5174_v43  ;;  %v5181_v38 = vmul.f32 %v6142_v27, %v5169_v53  ;;  %vm5187_vm14 = vweird.f32 %v6142_v27 }
 0xdce   : > { %vm5188_vm0 = vmor %vm5186_vm15, %vm5187_vm14 }
 0xdcf   : > { %v5179_v36 = vsel %vm5178_vm13, %v6140_v46, %v5175_v61  ;;  %v5182_v45 = vmul.f32 %v6142_v27, %v5181_v38 }
 0xdd0   : > { %v5190_v24 = vmul.f32 %v5179_v36, %v5156_v16 }
 0xdd1   : > { %v5183_v62 = vmul.f32 0.5, %v5182_v45 }
 0xdd2   : > { %v5193_v28 = vmul.f32 %v6063_v3, %v5190_v24 }
 0xdd3   : > { %v5184_v22 = vsub.f32 1.5, %v5183_v62 }
 0xdd4   : > { %v5196_v20 = vadd.f32 %v6064_v34, %v5193_v28 }
 0xdd5   : > { %v5185_v30 = vmul.f32 %v6142_v27, %v5184_v22 }
 0xdd6   : > { %5198 = vst.msk [vmem:[#allocation16] sm:$0xff] %vm1083_vm1, %v5196_v20 }
 0xdd7   : > { %v5189_v25 = vsel %vm5188_vm0, %v6142_v27, %v5185_v30 }
 0xdd8   : > { %v5191_v37 = vmul.f32 %v5189_v25, %v5157_v32 }
 0xdda   : > { %v5194_v51 = vmul.f32 %v6063_v3, %v5191_v37  ;;  %5203 = sbr.rel (%p5764_p3) target bundleno = 3829 (0xef5), region = 140 }
 0xddc   : > { %v5197_v58 = vadd.f32 %v6064_v34, %v5194_v51 }
 0xdde   : > { %5199 = vst.msk [vmem:[#allocation16 + $0x8] sm:$0xff] %vm1083_vm1, %v5197_v58 }
 0xddf   : > { %v5204_v21 = vld [vmem:[#allocation16] sm:$0xff] }
 0xde0   : > { %v5208_v0 = vsel %vm1083_vm1, %v5204_v21, 0.0  ;;  %v6147_v19 = vld [vmem:[%s8618_s28] ss:$0 sm:$0xff] }
 0xde1   : > { %5209 = vadd.xlane.f32.xlu0 %v5208_v0 }
 0xde5   : > { %v5205_v47 = vld [vmem:[#allocation16 + $0x8] sm:$0xff] }
 0xde6   : > { %v5211_v2 = vsel %vm1083_vm1, %v5205_v47, 0.0 }
 0xde9   : > { %5212 = vadd.xlane.f32.xlu0 %v5211_v2 }
 0xe54   : > { %v5210_v14 = vpop.xlane.xlu0 %5209 }
 0xe55   : > { %v5214_v44 = vmul.f32 %v5210_v14, %v7527_v4 }
 0xe57   : > { %v5216_v52 = vsub.f32 %v5204_v21, %v5214_v44 }
 0xe59   : > { %v5218_v42 = vmul.f32 %v5216_v52, %v5216_v52 }
 0xe5b   : > { %v5220_v50 = vsel %vm1083_vm1, %v5218_v42, 0.0 }
 0xe5c   : > { %5221 = vadd.xlane.f32.xlu1 %v5220_v50  ;;  %v5213_v63 = vpop.xlane.xlu0 %5212 }
 0xe5d   : > { %v5215_v23 = vmul.f32 %v5213_v63, %v7527_v4 }
 0xe5f   : > { %v5217_v17 = vsub.f32 %v5205_v47, %v5215_v23 }
 0xe61   : > { %v5219_v35 = vmul.f32 %v5217_v17, %v5217_v17 }
 0xe63   : > { %v5223_v60 = vsel %vm1083_vm1, %v5219_v35, 0.0 }
 0xe64   : > { %5224 = vadd.xlane.f32.xlu1 %v5223_v60 }
 0xecf   : > { %v5222_v31 = vpop.xlane.xlu1 %5221 }
 0xed0   : > { %v5226_v59 = vmul.f32 %v5222_v31, %v7527_v4 }
 0xed2   : > { %v5228_v48 = vadd.f32 1e-05, %v5226_v59 }
 0xed4   : > { %6149 = vrsqrt.f32 %v5228_v48  ;;  %vm5236_vm5 = vweird.f32 %v5228_v48 }
 0xed7   : > { %v5225_v12 = vpop.xlane.xlu1 %5224 }
 0xed8   : > { %v5227_v40 = vmul.f32 %v5225_v12, %v7527_v4  ;;  %v6148_v4 = vld [vmem:[%s8619_s19 + $0x1] ss:$0 sm:$0xff] }
 0xeda   : > { %v6150_v8 = vpop.eup %6149  ;;  %v5229_v29 = vadd.f32 1e-05, %v5227_v40 }
 0xedb   : > { %v5231_v39 = vmul.f32 %v6150_v8, %v5228_v48  ;;  %vm5237_vm4 = vweird.f32 %v6150_v8 }
 0xedc   : > { %6151 = vrsqrt.f32 %v5229_v29  ;;  %vm5238_vm2 = vmor %vm5236_vm5, %vm5237_vm4  ;;  %vm5246_vm11 = vweird.f32 %v5229_v29 }
 0xedd   : > { %v5232_v10 = vmul.f32 %v6150_v8, %v5231_v39 }
 0xedf   : > { %v5233_v18 = vmul.f32 0.5, %v5232_v10 }
 0xee1   : > { %v5234_v6 = vsub.f32 1.5, %v5233_v18 }
 0xee2   : > { %v6152_v41 = vpop.eup %6151 }
 0xee3   : > { %v5235_v54 = vmul.f32 %v6150_v8, %v5234_v6  ;;  %v5241_v16 = vmul.f32 %v6152_v41, %v5229_v29  ;;  %vm5247_vm3 = vweird.f32 %v6152_v41 }
 0xee4   : > { %vm5248_vm12 = vmor %vm5246_vm11, %vm5247_vm3 }
 0xee5   : > { %v5239_v13 = vsel %vm5238_vm2, %v6150_v8, %v5235_v54  ;;  %v5242_v1 = vmul.f32 %v6152_v41, %v5241_v16 }
 0xee6   : > { %v5250_v55 = vmul.f32 %v5239_v13, %v5216_v52 }
 0xee7   : > { %v5243_v32 = vmul.f32 0.5, %v5242_v1 }
 0xee8   : > { %v5253_v33 = vmul.f32 %v6147_v19, %v5250_v55 }
 0xee9   : > { %v5244_v15 = vsub.f32 1.5, %v5243_v32 }
 0xeea   : > { %v5256_v5 = vadd.f32 %v6148_v4, %v5253_v33 }
 0xeeb   : > { %v5245_v57 = vmul.f32 %v6152_v41, %v5244_v15 }
 0xeec   : > { %5258 = vst.msk [vmem:[#allocation16] sm:$0xff] %vm1083_vm1, %v5256_v5 }
 0xeed   : > { %v5249_v56 = vsel %vm5248_vm12, %v6152_v41, %v5245_v57 }
 0xeee   : > { %v5251_v7 = vmul.f32 %v5249_v56, %v5217_v17 }
 0xef0   : > { %v5254_v9 = vmul.f32 %v6147_v19, %v5251_v7 }
 0xef2   : > { %v5257_v46 = vadd.f32 %v6148_v4, %v5254_v9 }
 0xef4   : > { %5259 = vst.msk [vmem:[#allocation16 + $0x8] sm:$0xff] %vm1083_vm1, %v5257_v46 }
 0xef5 PF: > { %p5872_p4 = scmp.eq.s32.totalorder %s6711_s0, 1  ;;  %s8620_s20 = sld [smem:[#allocation40_spill]] }
 0xef6   : > { %s6590_s16 = smov [#allocation16]   ;;  %s6591_s3 = smov 128  }
 0xef7   : > { %s5268_s5 = sshll.u32 %s6590_s16, 4  ;;  %s5269_s5 = int_to_ptr.vmem [resolvable:$true] %s5268_s5 }
 0xefb   : > { %s5270_s23 = sshll.u32 %s8620_s20, 4  ;;  %s5271_s23 = int_to_ptr.hbm [resolvable:$true] %s5270_s23 }
 0xefc   : > { %5829 = dma.vmem_to_hbm [thread:$0]  (%p5872_p4), %s5269_s5, 256, %s5271_s23, [#allocation4], %s6591_s3, %s6591_s3, %s6588_s17  }
 0xefd   : > { %6548 = dma.done.wait (%p5872_p4), [#allocation4], 256  }
 0xefe   : > { %6550 = vsyncadd (%p5872_p4), [#allocation4], 4294967040 }
 0xeff PF: > { %s30_s29 = sadd.s32 1, %s6573_s29   ;;  %s8621_s2 = sld [smem:[#allocation21_spill]] }
 0xf00   : > { %p27_p5 = scmp.ge.s32.totalorder %s30_s29, 4   ;;  %s8622_s26 = sld [smem:[#allocation24_spill]] }
 0xf01   : > { %s8623_s27 = sld [smem:[#allocation22_spill]]  ;;  %s8625_s24 = smov %s6557_s25 }
 0xf02   : > { %s8624_s28 = sld [smem:[#allocation23_spill]]  ;;  %29 = sbr.rel (!%p27_p5) target bundleno = 22 (0x16), region = 246 }
 0xf05   : > { %s8626_s25 = smov %s8621_s2 }
 0xf07   :  { %5287 = vsyncpa [#allocation3], 1 }
 0xf08   :  { %5289 = vsyncpa [#allocation3 + $0x1], 1 }
 0xf09   :  { %5290 = vsyncpa [#allocation6], 1 }
 0xf0a   :  { %5291 = vsyncpa [#allocation4], 1 }
 0xf0b   :  { %5293 = vsyncpa [#allocation4 + $0x1], 1 }

</bundles_post_ra>
